<compile_context>
chip_gen: v7x
topology: tpu7x:2x2x1
jax: 0.10.0
libtpu: 0.0.40
codegen_flags: <defaults>
</compile_context>

<pallas_src>
import jax
import jax.numpy as jnp
import numpy as np
from jax.experimental import pallas as pl
from jax.experimental.pallas import tpu as pltpu


def _const_map(ndim):
    zeros = (0,) * ndim
    return lambda b: zeros


def _make_attn_kernel(N, C, head, sr_ratio, ln_eps=1e-5):
    d = C // head
    scale = float(d) ** -0.5

    def _attend(x, xr, wq_ref, bq_ref, wk_ref, bk_ref, wv_ref, bv_ref,
                wp_ref, bp_ref, o_ref):
        acc = jnp.zeros((N, C), jnp.float32)
        for h in range(head):  # static unroll; no lane-axis slicing anywhere
            q_h = jnp.dot(x, wq_ref[h], preferred_element_type=jnp.float32) + bq_ref[h]    # (N, d)
            k_h = jnp.dot(xr, wk_ref[h], preferred_element_type=jnp.float32) + bk_ref[h]   # (Nr, d)
            v_h = jnp.dot(xr, wv_ref[h], preferred_element_type=jnp.float32) + bv_ref[h]   # (Nr, d)
            # scores: contract the head dim of q and k (MXU "NT" matmul)
            s = jax.lax.dot_general(q_h, k_h, (((1,), (1,)), ((), ())),
                                    preferred_element_type=jnp.float32) * scale            # (N, Nr)
            m = jnp.max(s, axis=-1, keepdims=True)
            p = jnp.exp(s - m)
            denom = jnp.sum(p, axis=-1, keepdims=True)
            p = p * pl.reciprocal(denom, approx=True)
            o_h = jnp.dot(p, v_h, preferred_element_type=jnp.float32)                      # (N, d)
            # fold the per-head output straight into the output projection
            acc = acc + jnp.dot(o_h, wp_ref[h], preferred_element_type=jnp.float32)        # (N, C)
        o_ref[0] = (acc + bp_ref[...]).astype(o_ref.dtype)

    if sr_ratio > 1:
        def kernel(x_ref, xp_ref, wq_ref, bq_ref, wsr_ref, bsr_ref, g_ref, beta_ref,
                   wk_ref, bk_ref, wv_ref, bv_ref, wp_ref, bp_ref, o_ref):
            x = x_ref[0].astype(jnp.float32)                                # (N, C)
            # spatial reduction: patches @ folded-conv weight  (single MXU matmul)
            xr = jnp.dot(xp_ref[0], wsr_ref[...],
                         preferred_element_type=jnp.float32) + bsr_ref[...]  # (Nr, C)
            # LayerNorm over channels
            mu = jnp.mean(xr, axis=-1, keepdims=True)
            xc = xr - mu
            var = jnp.mean(xc * xc, axis=-1, keepdims=True)
            xr = xc * jax.lax.rsqrt(var + ln_eps) * g_ref[...] + beta_ref[...]
            _attend(x, xr, wq_ref, bq_ref, wk_ref, bk_ref, wv_ref, bv_ref,
                    wp_ref, bp_ref, o_ref)
    else:
        def kernel(x_ref, wq_ref, bq_ref, wk_ref, bk_ref, wv_ref, bv_ref,
                   wp_ref, bp_ref, o_ref):
            x = x_ref[0].astype(jnp.float32)
            _attend(x, x, wq_ref, bq_ref, wk_ref, bk_ref, wv_ref, bv_ref,
                    wp_ref, bp_ref, o_ref)

    return kernel


def attention_pallas(x, params, H, W, head, sr_ratio):
    """x: (B, N, C) with N = H*W.  params use JAX (in, out) layout for linears
    and the original PyTorch (O, I, kh, kw) layout for the sr conv."""
    B, N, C = x.shape
    assert N == H * W and C % head == 0
    d = C // head

    # ---- per-head weight slabs (wrapper-side layout plumbing; free) ----
    wq = params["wq"].reshape(C, head, d).transpose(1, 0, 2)       # (head, C, d)
    bq = params["bq"].reshape(head, 1, d)
    wkv = params["wkv"]                                            # (C, 2C): [:, :C]=k, [:, C:]=v
    wk = wkv[:, :C].reshape(C, head, d).transpose(1, 0, 2)
    wv = wkv[:, C:].reshape(C, head, d).transpose(1, 0, 2)
    bkv = params["bkv"]
    bk = bkv[:C].reshape(head, 1, d)
    bv = bkv[C:].reshape(head, 1, d)
    wp = params["wp"].reshape(head, d, C)                          # (head, d, C)
    bp = params["bp"].reshape(1, C)

    if sr_ratio > 1:
        Hr, Wr = H // sr_ratio, W // sr_ratio
        Nr = Hr * Wr
        ssC = sr_ratio * sr_ratio * C
        # non-overlapping sr x sr patches -> (B, Nr, sr*sr*C), feature order (di, dj, c)
        xp = x.reshape(B, Hr, sr_ratio, Wr, sr_ratio, C).transpose(0, 1, 3, 2, 4, 5)
        xp = xp.reshape(B, Nr, ssC)
        # conv weight (O, I, kh, kw) -> matmul weight ((di, dj, c), o)
        wsr = params["w_sr"].transpose(2, 3, 1, 0).reshape(ssC, C)
        bsr = params["b_sr"].reshape(1, C)
        g = params["ln_g"].reshape(1, C)
        beta = params["ln_b"].reshape(1, C)
        inputs = (x, xp, wq, bq, wsr, bsr, g, beta, wk, bk, wv, bv, wp, bp)
        in_specs = [
            pl.BlockSpec((1, N, C), lambda b: (b, 0, 0)),
            pl.BlockSpec((1, Nr, ssC), lambda b: (b, 0, 0)),
        ] + [pl.BlockSpec(w.shape, _const_map(w.ndim)) for w in inputs[2:]]
    else:
        inputs = (x, wq, bq, wk, bk, wv, bv, wp, bp)
        in_specs = [pl.BlockSpec((1, N, C), lambda b: (b, 0, 0))] + \
                   [pl.BlockSpec(w.shape, _const_map(w.ndim)) for w in inputs[1:]]

    kernel = _make_attn_kernel(N, C, head, sr_ratio)

    return pl.pallas_call(
        kernel,
        out_shape=jax.ShapeDtypeStruct((B, N, C), x.dtype),
        grid_spec=pltpu.PrefetchScalarGridSpec(
            num_scalar_prefetch=0,
            grid=(B,),
            in_specs=in_specs,
            out_specs=pl.BlockSpec((1, N, C), lambda b: (b, 0, 0)),
        ),
        compiler_params=pltpu.CompilerParams(
            dimension_semantics=("parallel",)),   # batch axis shards across v7x's 2 TCs
    )(*inputs)


def attention_reference(x, pt, H, W, head, sr_ratio):
    """Pure-JAX reference matching the PyTorch Attention.forward."""
    B, N, C = x.shape
    d = C // head
    scale = float(d) ** -0.5
    q = x @ pt["wq_pt"].T + pt["bq"]
    q = q.reshape(B, N, head, d).transpose(0, 2, 1, 3)             # (B, head, N, d)
    if sr_ratio > 1:
        xh = x.transpose(0, 2, 1).reshape(B, C, H, W)
        xr = jax.lax.conv_general_dilated(
            xh, pt["conv_w"], (sr_ratio, sr_ratio), "VALID",
            dimension_numbers=("NCHW", "OIHW", "NCHW"))
        xr = xr + pt["conv_b"][None, :, None, None]
        xr = xr.reshape(B, C, -1).transpose(0, 2, 1)                # (B, Nr, C)
        mu = xr.mean(-1, keepdims=True)
        var = ((xr - mu) ** 2).mean(-1, keepdims=True)
        xr = (xr - mu) / jnp.sqrt(var + 1e-5) * pt["ln_g"] + pt["ln_b"]
    else:
        xr = x
    Nr = xr.shape[1]
    kv = xr @ pt["wkv_pt"].T + pt["bkv"]
    kv = kv.reshape(B, Nr, 2, head, d).transpose(2, 0, 3, 1, 4)
    k, v = kv[0], kv[1]                                             # (B, head, Nr, d)
    attn = jnp.einsum("bhnd,bhmd->bhnm", q, k) * scale
    attn = jax.nn.softmax(attn, axis=-1)
    out = jnp.einsum("bhnm,bhmd->bhnd", attn, v)
    out = out.transpose(0, 2, 1, 3).reshape(B, N, C)
    return out @ pt["wp_pt"].T + pt["bp"]


if __name__ == "__main__":
    B, H, W = 2, 16, 16
    C, head, sr_ratio = 64, 2, 2
    N = H * W

    key = jax.random.PRNGKey(0)
    ks = jax.random.split(key, 12)

    def u(k, shape, scale=1.0):
        return jax.random.uniform(k, shape, jnp.float32, -1.0, 1.0) * scale

    x = jax.random.normal(ks[0], (B, N, C), jnp.float32)

    # PyTorch-layout parameters (nn.Linear: (out, in); Conv2d: (O, I, kh, kw))
    pt = dict(
        wq_pt=u(ks[1], (C, C), C ** -0.5), bq=u(ks[2], (C,), C ** -0.5),
        wkv_pt=u(ks[3], (2 * C, C), C ** -0.5), bkv=u(ks[4], (2 * C,), C ** -0.5),
        wp_pt=u(ks[5], (C, C), C ** -0.5), bp=u(ks[6], (C,), C ** -0.5),
        conv_w=u(ks[7], (C, C, sr_ratio, sr_ratio), (C * sr_ratio * sr_ratio) ** -0.5),
        conv_b=u(ks[8], (C,), (C * sr_ratio * sr_ratio) ** -0.5),
        ln_g=1.0 + 0.1 * u(ks[9], (C,)), ln_b=0.1 * u(ks[10], (C,)),
    )
    # JAX (in, out) layout for the kernel wrapper
    params = dict(
        wq=pt["wq_pt"].T, bq=pt["bq"],
        wkv=pt["wkv_pt"].T, bkv=pt["bkv"],
        wp=pt["wp_pt"].T, bp=pt["bp"],
        w_sr=pt["conv_w"], b_sr=pt["conv_b"],
        ln_g=pt["ln_g"], ln_b=pt["ln_b"],
    )

    # sr_ratio > 1 path (strided conv + LayerNorm before K/V)
    out = attention_pallas(x, params, H, W, head, sr_ratio)
    out = jax.block_until_ready(out)
    ref = attention_reference(x, pt, H, W, head, sr_ratio)
    np.testing.assert_allclose(np.asarray(out), np.asarray(ref), rtol=2e-3, atol=2e-3)

    # sr_ratio == 1 path (no spatial reduction)
    out1 = attention_pallas(x, params, H, W, head, sr_ratio=1)
    out1 = jax.block_until_ready(out1)
    ref1 = attention_reference(x, pt, H, W, head, sr_ratio=1)
    np.testing.assert_allclose(np.asarray(out1), np.asarray(ref1), rtol=2e-3, atol=2e-3)

    print("KERNEL_OK")
</pallas_src>

<mosaic_0001>
module attributes {stable_mosaic.version = 11 : i64} {
  func.func @kernel(%arg0: i32, %arg1: memref<1x256x64xf32, #tpu.memory_space<vmem>>, %arg2: memref<1x64x256xf32, #tpu.memory_space<vmem>>, %arg3: memref<2x64x32xf32, #tpu.memory_space<vmem>>, %arg4: memref<2x1x32xf32, #tpu.memory_space<vmem>>, %arg5: memref<256x64xf32, #tpu.memory_space<vmem>>, %arg6: memref<1x64xf32, #tpu.memory_space<vmem>>, %arg7: memref<1x64xf32, #tpu.memory_space<vmem>>, %arg8: memref<1x64xf32, #tpu.memory_space<vmem>>, %arg9: memref<2x64x32xf32, #tpu.memory_space<vmem>>, %arg10: memref<2x1x32xf32, #tpu.memory_space<vmem>>, %arg11: memref<2x64x32xf32, #tpu.memory_space<vmem>>, %arg12: memref<2x1x32xf32, #tpu.memory_space<vmem>>, %arg13: memref<2x32x64xf32, #tpu.memory_space<vmem>>, %arg14: memref<1x64xf32, #tpu.memory_space<vmem>>, %arg15: memref<1x256x64xf32, #tpu.memory_space<vmem>>) attributes {dimension_semantics = [#tpu.dimension_semantics<parallel>], iteration_bounds = array<i64: 2>, scalar_prefetch = 0 : i64, scratch_operands = 0 : i64, tpu.core_type = #tpu.core_type<tc>, window_params = [{transform_indices = @transform_0, window_bounds = array<i64: 1, 256, 64>}, {transform_indices = @transform_1, window_bounds = array<i64: 1, 64, 256>}, {pipeline_mode = #tpu.pipeline_mode<synchronous>, transform_indices = @transform_2, window_bounds = array<i64: 2, 64, 32>}, {pipeline_mode = #tpu.pipeline_mode<synchronous>, transform_indices = @transform_3, window_bounds = array<i64: 2, 1, 32>}, {pipeline_mode = #tpu.pipeline_mode<synchronous>, transform_indices = @transform_4, window_bounds = array<i64: 256, 64>}, {pipeline_mode = #tpu.pipeline_mode<synchronous>, transform_indices = @transform_5, window_bounds = array<i64: 1, 64>}, {pipeline_mode = #tpu.pipeline_mode<synchronous>, transform_indices = @transform_6, window_bounds = array<i64: 1, 64>}, {pipeline_mode = #tpu.pipeline_mode<synchronous>, transform_indices = @transform_7, window_bounds = array<i64: 1, 64>}, {pipeline_mode = #tpu.pipeline_mode<synchronous>, transform_indices = @transform_8, window_bounds = array<i64: 2, 64, 32>}, {pipeline_mode = #tpu.pipeline_mode<synchronous>, transform_indices = @transform_9, window_bounds = array<i64: 2, 1, 32>}, {pipeline_mode = #tpu.pipeline_mode<synchronous>, transform_indices = @transform_10, window_bounds = array<i64: 2, 64, 32>}, {pipeline_mode = #tpu.pipeline_mode<synchronous>, transform_indices = @transform_11, window_bounds = array<i64: 2, 1, 32>}, {pipeline_mode = #tpu.pipeline_mode<synchronous>, transform_indices = @transform_12, window_bounds = array<i64: 2, 32, 64>}, {pipeline_mode = #tpu.pipeline_mode<synchronous>, transform_indices = @transform_13, window_bounds = array<i64: 1, 64>}, {transform_indices = @transform_14, window_bounds = array<i64: 1, 256, 64>}]} {
    %c0 = arith.constant 0 : index
    %c0_0 = arith.constant 0 : index
    %c0_1 = arith.constant 0 : index
    %0 = vector.load %arg1[%c0, %c0_0, %c0_1] : memref<1x256x64xf32, #tpu.memory_space<vmem>>, vector<1x256x64xf32>
    %1 = vector.shape_cast %0 : vector<1x256x64xf32> to vector<256x64xf32>
    %c0_2 = arith.constant 0 : index
    %c0_3 = arith.constant 0 : index
    %c0_4 = arith.constant 0 : index
    %2 = vector.load %arg2[%c0_2, %c0_3, %c0_4] : memref<1x64x256xf32, #tpu.memory_space<vmem>>, vector<1x64x256xf32>
    %3 = vector.shape_cast %2 : vector<1x64x256xf32> to vector<64x256xf32>
    %c0_5 = arith.constant 0 : index
    %c0_6 = arith.constant 0 : index
    %4 = vector.load %arg5[%c0_5, %c0_6] : memref<256x64xf32, #tpu.memory_space<vmem>>, vector<256x64xf32>
    %cst = arith.constant dense<0.000000e+00> : vector<64x64xf32>
    %5 = tpu.matmul %3, %4, %cst {dimension_numbers = #tpu.dot_dimension_numbers<[1], [0], [0], [1], [0, 0, 1, 1], [], []>} : vector<64x256xf32>, vector<256x64xf32>, vector<64x64xf32> -> vector<64x64xf32>
    %c0_7 = arith.constant 0 : index
    %c0_8 = arith.constant 0 : index
    %6 = vector.load %arg6[%c0_7, %c0_8] : memref<1x64xf32, #tpu.memory_space<vmem>>, vector<1x64xf32>
    %7 = vector.broadcast %6 : vector<1x64xf32> to vector<64x64xf32>
    %8 = arith.addf %5, %7 : vector<64x64xf32>
    %cst_9 = arith.constant dense<0.000000e+00> : vector<64xf32>
    %9 = vector.multi_reduction <add>, %8, %cst_9 [1] : vector<64x64xf32> to vector<64xf32>
    %10 = vector.shape_cast %9 : vector<64xf32> to vector<64x1xf32>
    %cst_10 = arith.constant 6.400000e+01 : f32
    %11 = vector.broadcast %cst_10 : f32 to vector<64x1xf32>
    %12 = arith.divf %10, %11 : vector<64x1xf32>
    %13 = vector.broadcast %12 : vector<64x1xf32> to vector<64x64xf32>
    %14 = arith.subf %8, %13 : vector<64x64xf32>
    %15 = arith.mulf %14, %14 : vector<64x64xf32>
    %cst_11 = arith.constant dense<0.000000e+00> : vector<64xf32>
    %16 = vector.multi_reduction <add>, %15, %cst_11 [1] : vector<64x64xf32> to vector<64xf32>
    %17 = vector.shape_cast %16 : vector<64xf32> to vector<64x1xf32>
    %cst_12 = arith.constant 6.400000e+01 : f32
    %18 = vector.broadcast %cst_12 : f32 to vector<64x1xf32>
    %19 = arith.divf %17, %18 : vector<64x1xf32>
    %cst_13 = arith.constant 9.99999974E-6 : f32
    %20 = vector.broadcast %cst_13 : f32 to vector<64x1xf32>
    %21 = arith.addf %19, %20 : vector<64x1xf32>
    %22 = math.rsqrt %21 : vector<64x1xf32>
    %23 = vector.broadcast %22 : vector<64x1xf32> to vector<64x64xf32>
    %24 = arith.mulf %14, %23 : vector<64x64xf32>
    %c0_14 = arith.constant 0 : index
    %c0_15 = arith.constant 0 : index
    %25 = vector.load %arg7[%c0_14, %c0_15] : memref<1x64xf32, #tpu.memory_space<vmem>>, vector<1x64xf32>
    %26 = vector.broadcast %25 : vector<1x64xf32> to vector<64x64xf32>
    %27 = arith.mulf %24, %26 : vector<64x64xf32>
    %c0_16 = arith.constant 0 : index
    %c0_17 = arith.constant 0 : index
    %28 = vector.load %arg8[%c0_16, %c0_17] : memref<1x64xf32, #tpu.memory_space<vmem>>, vector<1x64xf32>
    %29 = vector.broadcast %28 : vector<1x64xf32> to vector<64x64xf32>
    %30 = arith.addf %27, %29 : vector<64x64xf32>
    %cst_18 = arith.constant 0.000000e+00 : f32
    %31 = vector.broadcast %cst_18 : f32 to vector<256x64xf32>
    %c0_19 = arith.constant 0 : index
    %c0_20 = arith.constant 0 : index
    %c0_21 = arith.constant 0 : index
    %32 = vector.load %arg3[%c0_19, %c0_20, %c0_21] : memref<2x64x32xf32, #tpu.memory_space<vmem>>, vector<1x64x32xf32>
    %33 = vector.shape_cast %32 : vector<1x64x32xf32> to vector<64x32xf32>
    %cst_22 = arith.constant dense<0.000000e+00> : vector<256x32xf32>
    %34 = tpu.matmul %1, %33, %cst_22 {dimension_numbers = #tpu.dot_dimension_numbers<[1], [0], [0], [1], [0, 0, 1, 1], [], []>} : vector<256x64xf32>, vector<64x32xf32>, vector<256x32xf32> -> vector<256x32xf32>
    %c0_23 = arith.constant 0 : index
    %c0_24 = arith.constant 0 : index
    %c0_25 = arith.constant 0 : index
    %35 = vector.load %arg4[%c0_23, %c0_24, %c0_25] : memref<2x1x32xf32, #tpu.memory_space<vmem>>, vector<1x1x32xf32>
    %36 = vector.shape_cast %35 : vector<1x1x32xf32> to vector<1x32xf32>
    %37 = vector.broadcast %36 : vector<1x32xf32> to vector<256x32xf32>
    %38 = arith.addf %34, %37 : vector<256x32xf32>
    %c0_26 = arith.constant 0 : index
    %c0_27 = arith.constant 0 : index
    %c0_28 = arith.constant 0 : index
    %39 = vector.load %arg9[%c0_26, %c0_27, %c0_28] : memref<2x64x32xf32, #tpu.memory_space<vmem>>, vector<1x64x32xf32>
    %40 = vector.shape_cast %39 : vector<1x64x32xf32> to vector<64x32xf32>
    %cst_29 = arith.constant dense<0.000000e+00> : vector<64x32xf32>
    %41 = tpu.matmul %30, %40, %cst_29 {dimension_numbers = #tpu.dot_dimension_numbers<[1], [0], [0], [1], [0, 0, 1, 1], [], []>} : vector<64x64xf32>, vector<64x32xf32>, vector<64x32xf32> -> vector<64x32xf32>
    %c0_30 = arith.constant 0 : index
    %c0_31 = arith.constant 0 : index
    %c0_32 = arith.constant 0 : index
    %42 = vector.load %arg10[%c0_30, %c0_31, %c0_32] : memref<2x1x32xf32, #tpu.memory_space<vmem>>, vector<1x1x32xf32>
    %43 = vector.shape_cast %42 : vector<1x1x32xf32> to vector<1x32xf32>
    %44 = vector.broadcast %43 : vector<1x32xf32> to vector<64x32xf32>
    %45 = arith.addf %41, %44 : vector<64x32xf32>
    %c0_33 = arith.constant 0 : index
    %c0_34 = arith.constant 0 : index
    %c0_35 = arith.constant 0 : index
    %46 = vector.load %arg11[%c0_33, %c0_34, %c0_35] : memref<2x64x32xf32, #tpu.memory_space<vmem>>, vector<1x64x32xf32>
    %47 = vector.shape_cast %46 : vector<1x64x32xf32> to vector<64x32xf32>
    %cst_36 = arith.constant dense<0.000000e+00> : vector<64x32xf32>
    %48 = tpu.matmul %30, %47, %cst_36 {dimension_numbers = #tpu.dot_dimension_numbers<[1], [0], [0], [1], [0, 0, 1, 1], [], []>} : vector<64x64xf32>, vector<64x32xf32>, vector<64x32xf32> -> vector<64x32xf32>
    %c0_37 = arith.constant 0 : index
    %c0_38 = arith.constant 0 : index
    %c0_39 = arith.constant 0 : index
    %49 = vector.load %arg12[%c0_37, %c0_38, %c0_39] : memref<2x1x32xf32, #tpu.memory_space<vmem>>, vector<1x1x32xf32>
    %50 = vector.shape_cast %49 : vector<1x1x32xf32> to vector<1x32xf32>
    %51 = vector.broadcast %50 : vector<1x32xf32> to vector<64x32xf32>
    %52 = arith.addf %48, %51 : vector<64x32xf32>
    %cst_40 = arith.constant dense<0.000000e+00> : vector<256x64xf32>
    %53 = tpu.matmul %38, %45, %cst_40 {dimension_numbers = #tpu.dot_dimension_numbers<[1], [1], [0], [0], [0, 0, 1, 0], [], []>} : vector<256x32xf32>, vector<64x32xf32>, vector<256x64xf32> -> vector<256x64xf32>
    %cst_41 = arith.constant 0.176776692 : f32
    %54 = vector.broadcast %cst_41 : f32 to vector<256x64xf32>
    %55 = arith.mulf %53, %54 : vector<256x64xf32>
    %cst_42 = arith.constant dense<0xFF800000> : vector<256xf32>
    %56 = vector.multi_reduction <maximumf>, %55, %cst_42 [1] : vector<256x64xf32> to vector<256xf32>
    %57 = vector.shape_cast %56 : vector<256xf32> to vector<256x1xf32>
    %58 = vector.broadcast %57 : vector<256x1xf32> to vector<256x64xf32>
    %59 = arith.subf %55, %58 : vector<256x64xf32>
    %60 = math.exp %59 : vector<256x64xf32>
    %cst_43 = arith.constant dense<0.000000e+00> : vector<256xf32>
    %61 = vector.multi_reduction <add>, %60, %cst_43 [1] : vector<256x64xf32> to vector<256xf32>
    %62 = vector.shape_cast %61 : vector<256xf32> to vector<256x1xf32>
    %63 = tpu.reciprocal %62 {approx = true} : vector<256x1xf32> -> vector<256x1xf32>
    %64 = vector.broadcast %63 : vector<256x1xf32> to vector<256x64xf32>
    %65 = arith.mulf %60, %64 : vector<256x64xf32>
    %cst_44 = arith.constant dense<0.000000e+00> : vector<256x32xf32>
    %66 = tpu.matmul %65, %52, %cst_44 {dimension_numbers = #tpu.dot_dimension_numbers<[1], [0], [0], [1], [0, 0, 1, 1], [], []>} : vector<256x64xf32>, vector<64x32xf32>, vector<256x32xf32> -> vector<256x32xf32>
    %c0_45 = arith.constant 0 : index
    %c0_46 = arith.constant 0 : index
    %c0_47 = arith.constant 0 : index
    %67 = vector.load %arg13[%c0_45, %c0_46, %c0_47] : memref<2x32x64xf32, #tpu.memory_space<vmem>>, vector<1x32x64xf32>
    %68 = vector.shape_cast %67 : vector<1x32x64xf32> to vector<32x64xf32>
    %cst_48 = arith.constant dense<0.000000e+00> : vector<256x64xf32>
    %69 = tpu.matmul %66, %68, %cst_48 {dimension_numbers = #tpu.dot_dimension_numbers<[1], [0], [0], [1], [0, 0, 1, 1], [], []>} : vector<256x32xf32>, vector<32x64xf32>, vector<256x64xf32> -> vector<256x64xf32>
    %70 = arith.addf %31, %69 : vector<256x64xf32>
    %c1 = arith.constant 1 : index
    %c0_49 = arith.constant 0 : index
    %c0_50 = arith.constant 0 : index
    %71 = vector.load %arg3[%c1, %c0_49, %c0_50] : memref<2x64x32xf32, #tpu.memory_space<vmem>>, vector<1x64x32xf32>
    %72 = vector.shape_cast %71 : vector<1x64x32xf32> to vector<64x32xf32>
    %cst_51 = arith.constant dense<0.000000e+00> : vector<256x32xf32>
    %73 = tpu.matmul %1, %72, %cst_51 {dimension_numbers = #tpu.dot_dimension_numbers<[1], [0], [0], [1], [0, 0, 1, 1], [], []>} : vector<256x64xf32>, vector<64x32xf32>, vector<256x32xf32> -> vector<256x32xf32>
    %c1_52 = arith.constant 1 : index
    %c0_53 = arith.constant 0 : index
    %c0_54 = arith.constant 0 : index
    %74 = vector.load %arg4[%c1_52, %c0_53, %c0_54] : memref<2x1x32xf32, #tpu.memory_space<vmem>>, vector<1x1x32xf32>
    %75 = vector.shape_cast %74 : vector<1x1x32xf32> to vector<1x32xf32>
    %76 = vector.broadcast %75 : vector<1x32xf32> to vector<256x32xf32>
    %77 = arith.addf %73, %76 : vector<256x32xf32>
    %c1_55 = arith.constant 1 : index
    %c0_56 = arith.constant 0 : index
    %c0_57 = arith.constant 0 : index
    %78 = vector.load %arg9[%c1_55, %c0_56, %c0_57] : memref<2x64x32xf32, #tpu.memory_space<vmem>>, vector<1x64x32xf32>
    %79 = vector.shape_cast %78 : vector<1x64x32xf32> to vector<64x32xf32>
    %cst_58 = arith.constant dense<0.000000e+00> : vector<64x32xf32>
    %80 = tpu.matmul %30, %79, %cst_58 {dimension_numbers = #tpu.dot_dimension_numbers<[1], [0], [0], [1], [0, 0, 1, 1], [], []>} : vector<64x64xf32>, vector<64x32xf32>, vector<64x32xf32> -> vector<64x32xf32>
    %c1_59 = arith.constant 1 : index
    %c0_60 = arith.constant 0 : index
    %c0_61 = arith.constant 0 : index
    %81 = vector.load %arg10[%c1_59, %c0_60, %c0_61] : memref<2x1x32xf32, #tpu.memory_space<vmem>>, vector<1x1x32xf32>
    %82 = vector.shape_cast %81 : vector<1x1x32xf32> to vector<1x32xf32>
    %83 = vector.broadcast %82 : vector<1x32xf32> to vector<64x32xf32>
    %84 = arith.addf %80, %83 : vector<64x32xf32>
    %c1_62 = arith.constant 1 : index
    %c0_63 = arith.constant 0 : index
    %c0_64 = arith.constant 0 : index
    %85 = vector.load %arg11[%c1_62, %c0_63, %c0_64] : memref<2x64x32xf32, #tpu.memory_space<vmem>>, vector<1x64x32xf32>
    %86 = vector.shape_cast %85 : vector<1x64x32xf32> to vector<64x32xf32>
    %cst_65 = arith.constant dense<0.000000e+00> : vector<64x32xf32>
    %87 = tpu.matmul %30, %86, %cst_65 {dimension_numbers = #tpu.dot_dimension_numbers<[1], [0], [0], [1], [0, 0, 1, 1], [], []>} : vector<64x64xf32>, vector<64x32xf32>, vector<64x32xf32> -> vector<64x32xf32>
    %c1_66 = arith.constant 1 : index
    %c0_67 = arith.constant 0 : index
    %c0_68 = arith.constant 0 : index
    %88 = vector.load %arg12[%c1_66, %c0_67, %c0_68] : memref<2x1x32xf32, #tpu.memory_space<vmem>>, vector<1x1x32xf32>
    %89 = vector.shape_cast %88 : vector<1x1x32xf32> to vector<1x32xf32>
    %90 = vector.broadcast %89 : vector<1x32xf32> to vector<64x32xf32>
    %91 = arith.addf %87, %90 : vector<64x32xf32>
    %cst_69 = arith.constant dense<0.000000e+00> : vector<256x64xf32>
    %92 = tpu.matmul %77, %84, %cst_69 {dimension_numbers = #tpu.dot_dimension_numbers<[1], [1], [0], [0], [0, 0, 1, 0], [], []>} : vector<256x32xf32>, vector<64x32xf32>, vector<256x64xf32> -> vector<256x64xf32>
    %cst_70 = arith.constant 0.176776692 : f32
    %93 = vector.broadcast %cst_70 : f32 to vector<256x64xf32>
    %94 = arith.mulf %92, %93 : vector<256x64xf32>
    %cst_71 = arith.constant dense<0xFF800000> : vector<256xf32>
    %95 = vector.multi_reduction <maximumf>, %94, %cst_71 [1] : vector<256x64xf32> to vector<256xf32>
    %96 = vector.shape_cast %95 : vector<256xf32> to vector<256x1xf32>
    %97 = vector.broadcast %96 : vector<256x1xf32> to vector<256x64xf32>
    %98 = arith.subf %94, %97 : vector<256x64xf32>
    %99 = math.exp %98 : vector<256x64xf32>
    %cst_72 = arith.constant dense<0.000000e+00> : vector<256xf32>
    %100 = vector.multi_reduction <add>, %99, %cst_72 [1] : vector<256x64xf32> to vector<256xf32>
    %101 = vector.shape_cast %100 : vector<256xf32> to vector<256x1xf32>
    %102 = tpu.reciprocal %101 {approx = true} : vector<256x1xf32> -> vector<256x1xf32>
    %103 = vector.broadcast %102 : vector<256x1xf32> to vector<256x64xf32>
    %104 = arith.mulf %99, %103 : vector<256x64xf32>
    %cst_73 = arith.constant dense<0.000000e+00> : vector<256x32xf32>
    %105 = tpu.matmul %104, %91, %cst_73 {dimension_numbers = #tpu.dot_dimension_numbers<[1], [0], [0], [1], [0, 0, 1, 1], [], []>} : vector<256x64xf32>, vector<64x32xf32>, vector<256x32xf32> -> vector<256x32xf32>
    %c1_74 = arith.constant 1 : index
    %c0_75 = arith.constant 0 : index
    %c0_76 = arith.constant 0 : index
    %106 = vector.load %arg13[%c1_74, %c0_75, %c0_76] : memref<2x32x64xf32, #tpu.memory_space<vmem>>, vector<1x32x64xf32>
    %107 = vector.shape_cast %106 : vector<1x32x64xf32> to vector<32x64xf32>
    %cst_77 = arith.constant dense<0.000000e+00> : vector<256x64xf32>
    %108 = tpu.matmul %105, %107, %cst_77 {dimension_numbers = #tpu.dot_dimension_numbers<[1], [0], [0], [1], [0, 0, 1, 1], [], []>} : vector<256x32xf32>, vector<32x64xf32>, vector<256x64xf32> -> vector<256x64xf32>
    %109 = arith.addf %70, %108 : vector<256x64xf32>
    %c0_78 = arith.constant 0 : index
    %c0_79 = arith.constant 0 : index
    %110 = vector.load %arg14[%c0_78, %c0_79] : memref<1x64xf32, #tpu.memory_space<vmem>>, vector<1x64xf32>
    %111 = vector.broadcast %110 : vector<1x64xf32> to vector<256x64xf32>
    %112 = arith.addf %109, %111 : vector<256x64xf32>
    %c0_80 = arith.constant 0 : index
    %c0_81 = arith.constant 0 : index
    %c0_82 = arith.constant 0 : index
    %113 = vector.load %arg15[%c0_80, %c0_81, %c0_82] : memref<1x256x64xf32, #tpu.memory_space<vmem>>, vector<1x256x64xf32>
    %114 = vector.shape_cast %113 : vector<1x256x64xf32> to vector<256x64xf32>
    %115 = vector.shape_cast %112 : vector<256x64xf32> to vector<1x256x64xf32>
    tpu.vector_store %arg15[%c0_80, %c0_81, %c0_82], %115 {strides = array<i32>} : memref<1x256x64xf32, #tpu.memory_space<vmem>>, vector<1x256x64xf32>,
    return
  }
  func.func @transform_0(%arg0: i32) -> (i32, i32, i32) {
    %c0_i32 = arith.constant 0 : i32
    %c0_i32_0 = arith.constant 0 : i32
    %c0_i32_1 = arith.constant 0 : i32
    return %arg0, %c0_i32, %c0_i32_0 : i32, i32, i32
  }
  func.func @transform_1(%arg0: i32) -> (i32, i32, i32) {
    %c0_i32 = arith.constant 0 : i32
    %c0_i32_0 = arith.constant 0 : i32
    %c0_i32_1 = arith.constant 0 : i32
    return %arg0, %c0_i32, %c0_i32_0 : i32, i32, i32
  }
  func.func @transform_2(%arg0: i32) -> (i32, i32, i32) {
    %c0_i32 = arith.constant 0 : i32
    %c0_i32_0 = arith.constant 0 : i32
    %c0_i32_1 = arith.constant 0 : i32
    %c0_i32_2 = arith.constant 0 : i32
    return %c0_i32, %c0_i32_0, %c0_i32_1 : i32, i32, i32
  }
  func.func @transform_3(%arg0: i32) -> (i32, i32, i32) {
    %c0_i32 = arith.constant 0 : i32
    %c0_i32_0 = arith.constant 0 : i32
    %c0_i32_1 = arith.constant 0 : i32
    %c0_i32_2 = arith.constant 0 : i32
    return %c0_i32, %c0_i32_0, %c0_i32_1 : i32, i32, i32
  }
  func.func @transform_4(%arg0: i32) -> (i32, i32) {
    %c0_i32 = arith.constant 0 : i32
    %c0_i32_0 = arith.constant 0 : i32
    %c0_i32_1 = arith.constant 0 : i32
    return %c0_i32, %c0_i32_0 : i32, i32
  }
  func.func @transform_5(%arg0: i32) -> (i32, i32) {
    %c0_i32 = arith.constant 0 : i32
    %c0_i32_0 = arith.constant 0 : i32
    %c0_i32_1 = arith.constant 0 : i32
    return %c0_i32, %c0_i32_0 : i32, i32
  }
  func.func @transform_6(%arg0: i32) -> (i32, i32) {
    %c0_i32 = arith.constant 0 : i32
    %c0_i32_0 = arith.constant 0 : i32
    %c0_i32_1 = arith.constant 0 : i32
    return %c0_i32, %c0_i32_0 : i32, i32
  }
  func.func @transform_7(%arg0: i32) -> (i32, i32) {
    %c0_i32 = arith.constant 0 : i32
    %c0_i32_0 = arith.constant 0 : i32
    %c0_i32_1 = arith.constant 0 : i32
    return %c0_i32, %c0_i32_0 : i32, i32
  }
  func.func @transform_8(%arg0: i32) -> (i32, i32, i32) {
    %c0_i32 = arith.constant 0 : i32
    %c0_i32_0 = arith.constant 0 : i32
    %c0_i32_1 = arith.constant 0 : i32
    %c0_i32_2 = arith.constant 0 : i32
    return %c0_i32, %c0_i32_0, %c0_i32_1 : i32, i32, i32
  }
  func.func @transform_9(%arg0: i32) -> (i32, i32, i32) {
    %c0_i32 = arith.constant 0 : i32
    %c0_i32_0 = arith.constant 0 : i32
    %c0_i32_1 = arith.constant 0 : i32
    %c0_i32_2 = arith.constant 0 : i32
    return %c0_i32, %c0_i32_0, %c0_i32_1 : i32, i32, i32
  }
  func.func @transform_10(%arg0: i32) -> (i32, i32, i32) {
    %c0_i32 = arith.constant 0 : i32
    %c0_i32_0 = arith.constant 0 : i32
    %c0_i32_1 = arith.constant 0 : i32
    %c0_i32_2 = arith.constant 0 : i32
    return %c0_i32, %c0_i32_0, %c0_i32_1 : i32, i32, i32
  }
  func.func @transform_11(%arg0: i32) -> (i32, i32, i32) {
    %c0_i32 = arith.constant 0 : i32
    %c0_i32_0 = arith.constant 0 : i32
    %c0_i32_1 = arith.constant 0 : i32
    %c0_i32_2 = arith.constant 0 : i32
    return %c0_i32, %c0_i32_0, %c0_i32_1 : i32, i32, i32
  }
  func.func @transform_12(%arg0: i32) -> (i32, i32, i32) {
    %c0_i32 = arith.constant 0 : i32
    %c0_i32_0 = arith.constant 0 : i32
    %c0_i32_1 = arith.constant 0 : i32
    %c0_i32_2 = arith.constant 0 : i32
    return %c0_i32, %c0_i32_0, %c0_i32_1 : i32, i32, i32
  }
  func.func @transform_13(%arg0: i32) -> (i32, i32) {
    %c0_i32 = arith.constant 0 : i32
    %c0_i32_0 = arith.constant 0 : i32
    %c0_i32_1 = arith.constant 0 : i32
    return %c0_i32, %c0_i32_0 : i32, i32
  }
  func.func @transform_14(%arg0: i32) -> (i32, i32, i32) {
    %c0_i32 = arith.constant 0 : i32
    %c0_i32_0 = arith.constant 0 : i32
    %c0_i32_1 = arith.constant 0 : i32
    return %arg0, %c0_i32, %c0_i32_0 : i32, i32, i32
  }
}

</mosaic_0001>

<bundles_post_ra>
// kernel: tpu_custom_call.1
= control target key start
LH: loop header
LB: loop body
LE: loop exit
PB: predicated region body
PF: predicated region fallthrough
CT: control target
= control target key end

     0   :  { %s6844_s29 = smov 0   ;;  %s8715_s0 = inlined_call_operand.vmem [shape: f32[2,256,64], index: 0, kind: input, shape index: {}]   ;;  %s8716_s1 = inlined_call_operand.vmem [shape: f32[2,64,256], index: 1, kind: input, shape index: {}]   ;;  %s8717_s2 = inlined_call_operand.vmem [shape: f32[2,64,32], index: 2, kind: input, shape index: {}]   ;;  %s8718_s3 = inlined_call_operand.vmem [shape: f32[2,1,32], index: 3, kind: input, shape index: {}]   ;;  %s8719_s4 = inlined_call_operand.vmem [shape: f32[256,64], index: 4, kind: input, shape index: {}]   ;;  %s8720_s5 = inlined_call_operand.vmem [shape: f32[1,64], index: 5, kind: input, shape index: {}]   ;;  %s8721_s6 = inlined_call_operand.vmem [shape: f32[1,64], index: 6, kind: input, shape index: {}]   ;;  %s8722_s7 = inlined_call_operand.vmem [shape: f32[1,64], index: 7, kind: input, shape index: {}]   ;;  %s8723_s8 = inlined_call_operand.vmem [shape: f32[2,64,32], index: 8, kind: input, shape index: {}]   ;;  %s8724_s9 = inlined_call_operand.vmem [shape: f32[2,1,32], index: 9, kind: input, shape index: {}]   ;;  %s8725_s10 = inlined_call_operand.vmem [shape: f32[2,64,32], index: 10, kind: input, shape index: {}]   ;;  %s8726_s11 = inlined_call_operand.vmem [shape: f32[2,1,32], index: 11, kind: input, shape index: {}]   ;;  %s8727_s12 = inlined_call_operand.vmem [shape: f32[2,32,64], index: 12, kind: input, shape index: {}]   ;;  %s8728_s13 = inlined_call_operand.vmem [shape: f32[1,64], index: 13, kind: input, shape index: {}]   ;;  %s8729_s14 = inlined_call_operand.vmem [shape: f32[2,256,64], index: 14, kind: output, shape index: {}]  }
   0x1 LB: > { %s4792_s30 = sadd.s32 4294967295, %s6767_s29   ;;  %p4796_p0 = scmp.ge.s32.totalorder %s6767_s29, 1  ;;  %s6767_s29 = sphi %s6844_s29, %s24_s29  }
   0x2   : > { %p422_p1 = scmp.lt.s32.totalorder %s6767_s29, 3 }
   0x4   : > { %p423_p2 = pnand %p4796_p0, %p422_p1 }
   0x6   : > { %426 = sbr.rel (%p423_p2) target bundleno = 2725 (0xaa5), region = 76 }
   0xd   : > { %v552_v0 = vld [vmem:[%s8719_s4 + $0x80] sm:$0xff]  ;;  %v553_v1 = vld [vmem:[%s8719_s4 + $0x88] sm:$0xff]  ;;  %p473_p3 = scmp.lt.s32.totalorder %s4792_s30, 1  ;;  %v554_v5 = vld [vmem:[%s8719_s4 + $0x90] sm:$0xff]  ;;  %vm680_vm0 = vcmask 523264   ;;  %vm1416_vm1 = vcmask 261120  }
   0xe   : > { %v536_v2 = vld [vmem:[%s8719_s4] sm:$0xff]  ;;  %v6193_v3 = vpack.c.bf16 %v553_v1, %v552_v0  ;;  %v537_v4 = vld [vmem:[%s8719_s4 + $0x8] sm:$0xff]  ;;  %v555_v6 = vld [vmem:[%s8719_s4 + $0x98] sm:$0xff] }
   0xf   : > { %v6195_v7 = vpack.c.bf16 %v537_v4, %v536_v2  ;;  %v6197_v8 = vpack.c.bf16 %v555_v6, %v554_v5  ;;  %v538_v9 = vld [vmem:[%s8719_s4 + $0x10] sm:$0xff]  ;;  %v539_v10 = vld [vmem:[%s8719_s4 + $0x18] sm:$0xff]  ;;  %v556_v11 = vld [vmem:[%s8719_s4 + $0xa0] sm:$0xff]  ;;  %s8761_s30 = smov (!%p473_p3, %s4792_s30), 1 }
  0x10   : > { %6194 = vmatprep.subr.bf16.mxu0 %v6193_v3  ;;  %v557_v12 = vld [vmem:[%s8719_s4 + $0xa8] sm:$0xff]  ;;  %v6199_v13 = vpack.c.bf16 %v539_v10, %v538_v9  ;;  %s5151_s21 = sshll.u32 %s8761_s30, 7  ;;  %v540_v15 = vld [vmem:[%s8719_s4 + $0x20] sm:$0xff]  ;;  %v558_v17 = vld [vmem:[%s8719_s4 + $0xb0] sm:$0xff]  ;;  %s5150_s22 = sshll.u32 %s8761_s30, 8 }
  0x11   : > { %6196 = vmatpush3.bf16.msra.mxu0 %v6195_v7  ;;  %v6201_v14 = vpack.c.bf16 %v557_v12, %v556_v11  ;;  %v541_v16 = vld [vmem:[%s8719_s4 + $0x28] sm:$0xff]  ;;  %v559_v18 = vld [vmem:[%s8719_s4 + $0xb8] sm:$0xff]  ;;  %s6900_s18 = scalar_lea.vmem %s8716_s1, %s5151_s21  ;;  %v542_v21 = vld [vmem:[%s8719_s4 + $0x30] sm:$0xff]  ;;  %s7083_s21 = scalar_lea.vmem %s8715_s0, %s5150_s22 }
  0x12   : > { %6198 = vmatprep.subr.bf16.mxu0 %v6197_v8  ;;  %v6203_v19 = vpack.c.bf16 %v541_v16, %v540_v15  ;;  %v6205_v20 = vpack.c.bf16 %v559_v18, %v558_v17  ;;  %v543_v22 = vld [vmem:[%s8719_s4 + $0x38] sm:$0xff]  ;;  %v560_v23 = vld [vmem:[%s8719_s4 + $0xc0] sm:$0xff]  ;;  %v561_v24 = vld [vmem:[%s8719_s4 + $0xc8] sm:$0xff]  ;;  %s8614_s27 = scalar_lea.vmem %s8729_s14, %s5150_s22 }
  0x13   : > { %v521_v25 = vld [vmem:[%s6900_s18 + $0x8] sm:$0xff]  ;;  %v6207_v26 = vpack.c.bf16 %v543_v22, %v542_v21  ;;  %v6209_v27 = vpack.c.bf16 %v561_v24, %v560_v23  ;;  %v544_v28 = vld [vmem:[%s8719_s4 + $0x40] sm:$0xff]  ;;  %v562_v30 = vld [vmem:[%s8719_s4 + $0xd0] sm:$0xff] }
  0x14   : > { %639 = vmatprep.mubr.f32.mxu0 %v521_v25  ;;  %v545_v29 = vld [vmem:[%s8719_s4 + $0x48] sm:$0xff]  ;;  %v563_v31 = vld [vmem:[%s8719_s4 + $0xd8] sm:$0xff]  ;;  %v546_v34 = vld [vmem:[%s8719_s4 + $0x50] sm:$0xff] }
  0x15   : > { %6200 = vmatpush3.bf16.msra.mxu0 %v6199_v13  ;;  %v6211_v32 = vpack.c.bf16 %v545_v29, %v544_v28  ;;  %v6213_v33 = vpack.c.bf16 %v563_v31, %v562_v30  ;;  %v547_v35 = vld [vmem:[%s8719_s4 + $0x58] sm:$0xff]  ;;  %v564_v36 = vld [vmem:[%s8719_s4 + $0xe0] sm:$0xff]  ;;  %v565_v37 = vld [vmem:[%s8719_s4 + $0xe8] sm:$0xff] }
  0x16   : > { %6202 = vmatprep.subr.bf16.mxu0 %v6201_v14  ;;  %v6215_v38 = vpack.c.bf16 %v547_v35, %v546_v34  ;;  %v6217_v39 = vpack.c.bf16 %v565_v37, %v564_v36  ;;  %v548_v40 = vld [vmem:[%s8719_s4 + $0x60] sm:$0xff]  ;;  %v549_v41 = vld [vmem:[%s8719_s4 + $0x68] sm:$0xff]  ;;  %v566_v42 = vld [vmem:[%s8719_s4 + $0xf0] sm:$0xff] }
  0x17   : > { %v567_v43 = vld [vmem:[%s8719_s4 + $0xf8] sm:$0xff]  ;;  %v6219_v44 = vpack.c.bf16 %v549_v41, %v548_v40  ;;  %v550_v46 = vld [vmem:[%s8719_s4 + $0x70] sm:$0xff]  ;;  %v520_v49 = vld [vmem:[%s6900_s18] sm:$0xff] }
  0x18   : > { %v6221_v45 = vpack.c.bf16 %v567_v43, %v566_v42  ;;  %v551_v47 = vld [vmem:[%s8719_s4 + $0x78] sm:$0xff]  ;;  %v522_v51 = vld [vmem:[%s6900_s18 + $0x10] sm:$0xff]  ;;  %v525_v52 = vld [vmem:[%s6900_s18 + $0x28] sm:$0xff] }
  0x19   : > { %6204 = vmatpush3.bf16.msra.mxu0 %v6203_v19  ;;  %v6223_v48 = vpack.c.bf16 %v551_v47, %v550_v46  ;;  %v523_v50 = vld [vmem:[%s6900_s18 + $0x18] sm:$0xff]  ;;  %v524_v53 = vld [vmem:[%s6900_s18 + $0x20] sm:$0xff]  ;;  %v526_v55 = vld [vmem:[%s6900_s18 + $0x30] sm:$0xff] }
  0x1a   : > { %6206 = vmatprep.subr.bf16.mxu0 %v6205_v20  ;;  %v527_v54 = vld [vmem:[%s6900_s18 + $0x38] sm:$0xff]  ;;  %v529_v56 = vld [vmem:[%s6900_s18 + $0x48] sm:$0xff]  ;;  %v528_v57 = vld [vmem:[%s6900_s18 + $0x40] sm:$0xff] }
  0x1b   : > { %v531_v58 = vld [vmem:[%s6900_s18 + $0x58] sm:$0xff]  ;;  %v530_v59 = vld [vmem:[%s6900_s18 + $0x50] sm:$0xff]  ;;  %v533_v60 = vld [vmem:[%s6900_s18 + $0x68] sm:$0xff] }
  0x1c   : > { %v532_v61 = vld [vmem:[%s6900_s18 + $0x60] sm:$0xff]  ;;  %v535_v62 = vld [vmem:[%s6900_s18 + $0x78] sm:$0xff]  ;;  %v534_v63 = vld [vmem:[%s6900_s18 + $0x70] sm:$0xff] }
  0x1d   : > { %6208 = vmatpush3.bf16.msra.mxu0 %v6207_v26  ;;  %v4803_v2 = vld [vmem:[%s8720_s5] ss:$0 sm:$0xff]  ;;  %vm7432_vm2 = vmpackc.low %vm1416_vm1, %vm1416_vm1 }
  0x1e   : > { %6210 = vmatprep.subr.bf16.mxu0 %v6209_v27 }
  0x21   : > { %6212 = vmatpush3.bf16.msra.mxu0 %v6211_v32 }
  0x22   : > { %6214 = vmatprep.subr.bf16.mxu0 %v6213_v33 }
  0x25   : > { %6216 = vmatpush3.bf16.msra.mxu0 %v6215_v38 }
  0x26   : > { %6218 = vmatprep.subr.bf16.mxu0 %v6217_v39 }
  0x29   : > { %6220 = vmatpush3.bf16.msra.mxu0 %v6219_v44 }
  0x2a   : > { %6222 = vmatprep.subr.bf16.mxu0 %v6221_v45 }
  0x2d   : > { %6224 = vmatpush3.bf16.msra.mxu0 %v6223_v48 }
  0x30   : > { %640 = vmatmul.mubr.f32.vlgmr.msra.gmra.mrb[0].mxu0 %v520_v49 }
  0x31   : > { %644 = vmatprep.mubr.f32.mxu0 %v523_v50 }
  0x34   : > { %645 = vmatmul.mubr.f32.gmra.mrb[2].mxu0 %v522_v51 }
  0x35   : > { %649 = vmatprep.mubr.f32.mxu0 %v525_v52 }
  0x38   : > { %650 = vmatmul.mubr.f32.gmra.mrb[4].mxu0 %v524_v53 }
  0x39   : > { %654 = vmatprep.mubr.f32.mxu0 %v527_v54 }
  0x3c   : > { %655 = vmatmul.mubr.f32.gmra.mrb[6].mxu0 %v526_v55 }
  0x3d   : > { %659 = vmatprep.mubr.f32.mxu0 %v529_v56 }
  0x40   : > { %660 = vmatmul.mubr.f32.gmra.mrb[8].mxu0 %v528_v57 }
  0x41   : > { %664 = vmatprep.mubr.f32.mxu0 %v531_v58 }
  0x44   : > { %665 = vmatmul.mubr.f32.gmra.mrb[10].mxu0 %v530_v59 }
  0x45   : > { %669 = vmatprep.mubr.f32.mxu0 %v533_v60 }
  0x48   : > { %670 = vmatmul.mubr.f32.gmra.mrb[12].mxu0 %v532_v61 }
  0x49   : > { %674 = vmatprep.mubr.f32.mxu0 %v535_v62 }
  0x4c   : > { %675 = vmatmul.mubr.f32.gmra.mrb[14].mxu0 %v534_v63 }
 0x103   : > { %v5185_v0 = vpop.f32.mrb[0].mxu0 }
 0x104   : > { %v5186_v1 = vpop.f32.mrb[1].mxu0 }
 0x105   : > { %v5187_v3 = vadd.f32 %v5186_v1, %v5185_v0 }
 0x107   : > { %v5188_v4 = vpop.f32.mrb[2].mxu0  ;;  %v642_v5 = vadd.f32 %v5187_v3, %v4803_v2 }
 0x108   : > { %v5189_v6 = vpop.f32.mrb[3].mxu0 }
 0x109   : > { %v5190_v7 = vadd.f32 %v5189_v6, %v5188_v4  ;;  %v681_v8 = vsel %vm680_vm0, %v642_v5, 0.0 }
 0x10a   : > { %682 = vadd.xlane.f32.xlu0 %v681_v8 }
 0x10b   : > { %v5191_v9 = vpop.f32.mrb[4].mxu0  ;;  %v647_v10 = vadd.f32 %v5190_v7, %v4803_v2 }
 0x10c   : > { %v5192_v11 = vpop.f32.mrb[5].mxu0 }
 0x10d   : > { %v5193_v12 = vadd.f32 %v5192_v11, %v5191_v9  ;;  %v684_v13 = vsel %vm680_vm0, %v647_v10, 0.0  ;;  %v1152_v11 = vld [vmem:[%s8723_s8] sm:$0xff] }
 0x10e   : > { %685 = vadd.xlane.f32.xlu0 %v684_v13 }
 0x10f   : > { %v5194_v14 = vpop.f32.mrb[6].mxu0  ;;  %v652_v15 = vadd.f32 %v5193_v12, %v4803_v2  ;;  %v1153_v12 = vld [vmem:[%s8723_s8 + $0x8] sm:$0xff] }
 0x110   : > { %v5195_v16 = vpop.f32.mrb[7].mxu0 }
 0x111   : > { %v5196_v17 = vadd.f32 %v5195_v16, %v5194_v14  ;;  %v687_v18 = vsel %vm680_vm0, %v652_v15, 0.0 }
 0x112   : > { %688 = vadd.xlane.f32.xlu1 %v687_v18  ;;  %v1154_v18 = vld [vmem:[%s8723_s8 + $0x10] sm:$0xff] }
 0x113   : > { %v5197_v19 = vpop.f32.mrb[8].mxu0  ;;  %v657_v20 = vadd.f32 %v5196_v17, %v4803_v2 }
 0x114   : > { %v5198_v21 = vpop.f32.mrb[9].mxu0 }
 0x115   : > { %v5199_v22 = vadd.f32 %v5198_v21, %v5197_v19  ;;  %v690_v23 = vsel %vm680_vm0, %v657_v20, 0.0  ;;  %v1155_v19 = vld [vmem:[%s8723_s8 + $0x18] sm:$0xff] }
 0x116   : > { %691 = vadd.xlane.f32.xlu1 %v690_v23  ;;  %v6245_v21 = vpack.c.bf16 %v1155_v19, %v1154_v18  ;;  %v1156_v23 = vld [vmem:[%s8723_s8 + $0x20] sm:$0xff]  ;;  %v518_v18 = vld [vmem:[%s7083_s21 + $0xf0] sm:$0xff]  ;;  %v519_v19 = vld [vmem:[%s7083_s21 + $0xf8] sm:$0xff] }
 0x117   : > { %v5200_v24 = vpop.f32.mrb[10].mxu0  ;;  %v662_v25 = vadd.f32 %v5199_v22, %v4803_v2 }
 0x118   : > { %v5201_v26 = vpop.f32.mrb[11].mxu0 }
 0x119   : > { %v5202_v27 = vadd.f32 %v5201_v26, %v5200_v24  ;;  %v693_v28 = vsel %vm680_vm0, %v662_v25, 0.0  ;;  %v1157_v24 = vld [vmem:[%s8723_s8 + $0x28] sm:$0xff]  ;;  %v1158_v26 = vld [vmem:[%s8723_s8 + $0x30] sm:$0xff] }
 0x11a   : > { %694 = vadd.xlane.f32.xlu0 %v693_v28 }
 0x11b   : > { %v5203_v29 = vpop.f32.mrb[12].mxu0  ;;  %v667_v30 = vadd.f32 %v5202_v27, %v4803_v2  ;;  %v1159_v27 = vld [vmem:[%s8723_s8 + $0x38] sm:$0xff] }
 0x11c   : > { %v5204_v31 = vpop.f32.mrb[13].mxu0  ;;  %v6253_v28 = vpack.c.bf16 %v1159_v27, %v1158_v26 }
 0x11d   : > { %v5205_v32 = vadd.f32 %v5204_v31, %v5203_v29  ;;  %v696_v33 = vsel %vm680_vm0, %v667_v30, 0.0  ;;  %v1296_v29 = vld [vmem:[%s8725_s10] sm:$0xff] }
 0x11e   : > { %697 = vadd.xlane.f32.xlu1 %v696_v33  ;;  %v817_v33 = vld [vmem:[%s8717_s2 + $0x8] sm:$0xff] }
 0x11f   : > { %v5206_v34 = vpop.f32.mrb[14].mxu0  ;;  %v672_v35 = vadd.f32 %v5205_v32, %v4803_v2  ;;  %v816_v32 = vld [vmem:[%s8717_s2] sm:$0xff] }
 0x120   : > { %v5207_v36 = vpop.f32.mrb[15].mxu0 }
 0x121   : > { %v5208_v37 = vadd.f32 %v5207_v36, %v5206_v34  ;;  %v699_v38 = vsel %vm680_vm0, %v672_v35, 0.0  ;;  %v6225_v34 = vpack.c.bf16 %v817_v33, %v816_v32  ;;  %v819_v36 = vld [vmem:[%s8717_s2 + $0x18] sm:$0xff]  ;;  %v7155_v33 = vld [vmem:[%s8721_s6] ss:$0 sm:$0xff] }
 0x122   : > { %700 = vadd.xlane.f32.xlu0 %v699_v38  ;;  %v820_v38 = vld [vmem:[%s8717_s2 + $0x20] sm:$0xff] }
 0x123   : > { %v677_v39 = vadd.f32 %v5208_v37, %v4803_v2  ;;  %6226 = vmatprep.subr.bf16.mxu1 %v6225_v34 }
 0x124   : > { %6228 = vmatpush3.bf16.msra.mxu1 %v6225_v34 }
 0x125   : > { %v702_v40 = vsel %vm680_vm0, %v677_v39, 0.0 }
 0x126   : > { %703 = vadd.xlane.f32.xlu1 %v702_v40 }
 0x197   : > { %v683_v41 = vpop.xlane.xlu0 %682 }
 0x198   : > { %v706_v42 = vmul.f32 0.015625, %v683_v41  ;;  %v822_v41 = vld [vmem:[%s8717_s2 + $0x30] sm:$0xff] }
 0x19a   : > { %v6983_v43 = vsub.f32 %v642_v5, %v706_v42  ;;  %v823_v42 = vld [vmem:[%s8717_s2 + $0x38] sm:$0xff] }
 0x19b   : > { %v686_v44 = vpop.xlane.xlu0 %685 }
 0x19c   : > { %v707_v45 = vmul.f32 0.015625, %v686_v44  ;;  %v722_v46 = vmul.f32 %v6983_v43, %v6983_v43  ;;  %v6237_v44 = vpack.c.bf16 %v823_v42, %v822_v41 }
 0x19e   : > { %v6987_v47 = vsub.f32 %v647_v10, %v707_v45  ;;  %v730_v48 = vsel %vm680_vm0, %v722_v46, 0.0  ;;  %v488_v45 = vld [vmem:[%s7083_s21] sm:$0xff]  ;;  %v489_v46 = vld [vmem:[%s7083_s21 + $0x8] sm:$0xff] }
 0x19f   : > { %v689_v49 = vpop.xlane.xlu1 %688  ;;  %731 = vadd.xlane.f32.xlu0 %v730_v48  ;;  %5601 = vmatprep.mubr.msk.f32.mxu1 %vm680_vm0, %v488_v45  ;;  %v490_v48 = vld [vmem:[%s7083_s21 + $0x10] sm:$0xff] }
 0x1a0   : > { %v708_v50 = vmul.f32 0.015625, %v689_v49  ;;  %v723_v51 = vmul.f32 %v6987_v47, %v6987_v47  ;;  %v491_v49 = vld [vmem:[%s7083_s21 + $0x18] sm:$0xff] }
 0x1a2   : > { %v6992_v52 = vsub.f32 %v652_v15, %v708_v50  ;;  %v733_v53 = vsel %vm680_vm0, %v723_v51, 0.0  ;;  %v6241_v15 = vpack.c.bf16 %v1153_v12, %v1152_v11  ;;  %v492_v50 = vld [vmem:[%s7083_s21 + $0x20] sm:$0xff]  ;;  %v493_v51 = vld [vmem:[%s7083_s21 + $0x28] sm:$0xff] }
 0x1a3   : > { %v692_v54 = vpop.xlane.xlu1 %691  ;;  %734 = vadd.xlane.f32.xlu1 %v733_v53  ;;  %v494_v53 = vld [vmem:[%s7083_s21 + $0x30] sm:$0xff]  ;;  %v512_v11 = vld [vmem:[%s7083_s21 + $0xc0] sm:$0xff]  ;;  %v513_v12 = vld [vmem:[%s7083_s21 + $0xc8] sm:$0xff] }
 0x1a4   : > { %v709_v55 = vmul.f32 0.015625, %v692_v54  ;;  %v724_v56 = vmul.f32 %v6992_v52, %v6992_v52  ;;  %6242 = vmatprep.subr.bf16.mxu0 %v6241_v15  ;;  %v495_v54 = vld [vmem:[%s7083_s21 + $0x38] sm:$0xff] }
 0x1a5   : > { %6244 = vmatpush3.bf16.msra.mxu0 %v6241_v15  ;;  %v516_v15 = vld [vmem:[%s7083_s21 + $0xe0] sm:$0xff] }
 0x1a6   : > { %v6997_v57 = vsub.f32 %v657_v20, %v709_v55  ;;  %v736_v58 = vsel %vm680_vm0, %v724_v56, 0.0  ;;  %6246 = vmatprep.subr.bf16.mxu0 %v6245_v21  ;;  %v496_v55 = vld [vmem:[%s7083_s21 + $0x40] sm:$0xff]  ;;  %v497_v56 = vld [vmem:[%s7083_s21 + $0x48] sm:$0xff] }
 0x1a7   : > { %737 = vadd.xlane.f32.xlu0 %v736_v58  ;;  %v695_v59 = vpop.xlane.xlu0 %694  ;;  %v498_v58 = vld [vmem:[%s7083_s21 + $0x50] sm:$0xff] }
 0x1a8   : > { %v710_v60 = vmul.f32 0.015625, %v695_v59  ;;  %v725_v61 = vmul.f32 %v6997_v57, %v6997_v57  ;;  %v499_v59 = vld [vmem:[%s7083_s21 + $0x58] sm:$0xff] }
 0x1a9   : > { %6248 = vmatpush3.bf16.msra.mxu0 %v6245_v21 }
 0x1aa   : > { %v7002_v62 = vsub.f32 %v662_v25, %v710_v60  ;;  %v739_v63 = vsel %vm680_vm0, %v725_v61, 0.0  ;;  %v6249_v25 = vpack.c.bf16 %v1157_v24, %v1156_v23  ;;  %v500_v60 = vld [vmem:[%s7083_s21 + $0x60] sm:$0xff]  ;;  %v501_v61 = vld [vmem:[%s7083_s21 + $0x68] sm:$0xff] }
 0x1ab   : > { %v698_v0 = vpop.xlane.xlu1 %697  ;;  %740 = vadd.xlane.f32.xlu1 %v739_v63  ;;  %v502_v63 = vld [vmem:[%s7083_s21 + $0x70] sm:$0xff] }
 0x1ac   : > { %v711_v1 = vmul.f32 0.015625, %v698_v0  ;;  %v726_v2 = vmul.f32 %v7002_v62, %v7002_v62  ;;  %6250 = vmatprep.subr.bf16.mxu0 %v6249_v25  ;;  %v503_v0 = vld [vmem:[%s7083_s21 + $0x78] sm:$0xff] }
 0x1ad   : > { %6252 = vmatpush3.bf16.msra.mxu0 %v6249_v25 }
 0x1ae   : > { %v7007_v3 = vsub.f32 %v667_v30, %v711_v1  ;;  %v742_v4 = vsel %vm680_vm0, %v726_v2, 0.0  ;;  %6254 = vmatprep.subr.bf16.mxu0 %v6253_v28  ;;  %v1297_v30 = vld [vmem:[%s8725_s10 + $0x8] sm:$0xff]  ;;  %v504_v1 = vld [vmem:[%s7083_s21 + $0x80] sm:$0xff] }
 0x1af   : > { %743 = vadd.xlane.f32.xlu0 %v742_v4  ;;  %v701_v5 = vpop.xlane.xlu0 %700  ;;  %v7053_v31 = vpack.c.bf16 %v1297_v30, %v1296_v29  ;;  %v505_v2 = vld [vmem:[%s7083_s21 + $0x88] sm:$0xff]  ;;  %v506_v4 = vld [vmem:[%s7083_s21 + $0x90] sm:$0xff] }
 0x1b0   : > { %v712_v6 = vmul.f32 0.015625, %v701_v5  ;;  %v727_v7 = vmul.f32 %v7007_v3, %v7007_v3  ;;  %v507_v5 = vld [vmem:[%s7083_s21 + $0x98] sm:$0xff] }
 0x1b1   : > { %6256 = vmatpush3.bf16.msra.mxu0 %v6253_v28 }
 0x1b2   : > { %v7012_v8 = vsub.f32 %v672_v35, %v712_v6  ;;  %v745_v9 = vsel %vm680_vm0, %v727_v7, 0.0  ;;  %6258 = vmatprep.subr.bf16.mxu0 %v7053_v31  ;;  %v818_v35 = vld [vmem:[%s8717_s2 + $0x10] sm:$0xff]  ;;  %v508_v6 = vld [vmem:[%s7083_s21 + $0xa0] sm:$0xff]  ;;  %v509_v7 = vld [vmem:[%s7083_s21 + $0xa8] sm:$0xff] }
 0x1b3   : > { %v704_v10 = vpop.xlane.xlu1 %703  ;;  %746 = vadd.xlane.f32.xlu1 %v745_v9  ;;  %v6229_v37 = vpack.c.bf16 %v819_v36, %v818_v35  ;;  %v510_v9 = vld [vmem:[%s7083_s21 + $0xb0] sm:$0xff] }
 0x1b4   : > { %v713_v13 = vmul.f32 0.015625, %v704_v10  ;;  %v728_v14 = vmul.f32 %v7012_v8, %v7012_v8  ;;  %v511_v10 = vld [vmem:[%s7083_s21 + $0xb8] sm:$0xff] }
 0x1b5   : > { %6230 = vmatprep.subr.bf16.mxu1 %v6229_v37 }
 0x1b6   : > { %v7023_v16 = vsub.f32 %v677_v39, %v713_v13  ;;  %v748_v17 = vsel %vm680_vm0, %v728_v14, 0.0  ;;  %6232 = vmatpush3.bf16.msra.mxu1 %v6229_v37  ;;  %v821_v39 = vld [vmem:[%s8717_s2 + $0x28] sm:$0xff]  ;;  %v514_v13 = vld [vmem:[%s7083_s21 + $0xd0] sm:$0xff]  ;;  %v515_v14 = vld [vmem:[%s7083_s21 + $0xd8] sm:$0xff] }
 0x1b7   : > { %749 = vadd.xlane.f32.xlu0 %v748_v17  ;;  %v6233_v40 = vpack.c.bf16 %v821_v39, %v820_v38  ;;  %v517_v17 = vld [vmem:[%s7083_s21 + $0xe8] sm:$0xff]  ;;  %v7161_v38 = vld [vmem:[%s8722_s7] ss:$0 sm:$0xff] }
 0x1b8   : > { %v729_v20 = vmul.f32 %v7023_v16, %v7023_v16 }
 0x1b9   : > { %6234 = vmatprep.subr.bf16.mxu1 %v6233_v40 }
 0x1ba   : > { %v751_v22 = vsel %vm680_vm0, %v729_v20, 0.0  ;;  %6236 = vmatpush3.bf16.msra.mxu1 %v6233_v40 }
 0x1bb   : > { %752 = vadd.xlane.f32.xlu1 %v751_v22  ;;  %6238 = vmatprep.subr.bf16.mxu1 %v6237_v44 }
 0x1be   : > { %6240 = vmatpush3.bf16.msra.mxu1 %v6237_v44 }
 0x1c1   : > { %5602 = vmatmul.mubr.msk.f32.vlgmr.msra.gmra.mrb[0].mxu1 %vm680_vm0, %v489_v46 }
 0x1c2   : > { %5604 = vmatprep.mubr.msk.f32.mxu1 %vm680_vm0, %v490_v48  ;;  %v1299_v48 = vld [vmem:[%s8725_s10 + $0x18] sm:$0xff] }
 0x1c5   : > { %5605 = vmatmul.mubr.msk.f32.gmra.mrb[2].mxu1 %vm680_vm0, %v491_v49 }
 0x1c6   : > { %5607 = vmatprep.mubr.msk.f32.mxu1 %vm680_vm0, %v492_v50 }
 0x1c9   : > { %5608 = vmatmul.mubr.msk.f32.gmra.mrb[4].mxu1 %vm680_vm0, %v493_v51 }
 0x1ca   : > { %5610 = vmatprep.mubr.msk.f32.mxu1 %vm680_vm0, %v494_v53 }
 0x1cd   : > { %5611 = vmatmul.mubr.msk.f32.gmra.mrb[6].mxu1 %vm680_vm0, %v495_v54 }
 0x1ce   : > { %5613 = vmatprep.mubr.msk.f32.mxu1 %vm680_vm0, %v496_v55 }
 0x1d1   : > { %5614 = vmatmul.mubr.msk.f32.gmra.mrb[8].mxu1 %vm680_vm0, %v497_v56 }
 0x1d2   : > { %5616 = vmatprep.mubr.msk.f32.mxu1 %vm680_vm0, %v498_v58  ;;  %v1300_v58 = vld [vmem:[%s8725_s10 + $0x20] sm:$0xff] }
 0x1d5   : > { %5617 = vmatmul.mubr.msk.f32.gmra.mrb[10].mxu1 %vm680_vm0, %v499_v59  ;;  %v1301_v59 = vld [vmem:[%s8725_s10 + $0x28] sm:$0xff] }
 0x1d6   : > { %5619 = vmatprep.mubr.msk.f32.mxu1 %vm680_vm0, %v500_v60 }
 0x1d9   : > { %5620 = vmatmul.mubr.msk.f32.gmra.mrb[12].mxu1 %vm680_vm0, %v501_v61 }
 0x1da   : > { %5622 = vmatprep.mubr.msk.f32.mxu1 %vm680_vm0, %v502_v63 }
 0x1dd   : > { %5623 = vmatmul.mubr.msk.f32.gmra.mrb[14].mxu1 %vm680_vm0, %v503_v0 }
 0x1de   : > { %5625 = vmatprep.mubr.msk.f32.mxu1 %vm680_vm0, %v504_v1 }
 0x1e1   : > { %5626 = vmatmul.mubr.msk.f32.gmra.mrb[16].mxu1 %vm680_vm0, %v505_v2  ;;  %v6265_v2 = vpack.c.bf16 %v1301_v59, %v1300_v58 }
 0x1e2   : > { %5628 = vmatprep.mubr.msk.f32.mxu1 %vm680_vm0, %v506_v4 }
 0x1e5   : > { %5629 = vmatmul.mubr.msk.f32.gmra.mrb[18].mxu1 %vm680_vm0, %v507_v5  ;;  %v1302_v5 = vld [vmem:[%s8725_s10 + $0x30] sm:$0xff] }
 0x1e6   : > { %5631 = vmatprep.mubr.msk.f32.mxu1 %vm680_vm0, %v508_v6  ;;  %v1303_v6 = vld [vmem:[%s8725_s10 + $0x38] sm:$0xff] }
 0x1e9   : > { %5632 = vmatmul.mubr.msk.f32.gmra.mrb[20].mxu1 %vm680_vm0, %v509_v7 }
 0x1ea   : > { %5634 = vmatprep.mubr.msk.f32.mxu1 %vm680_vm0, %v510_v9 }
 0x1ed   : > { %5635 = vmatmul.mubr.msk.f32.gmra.mrb[22].mxu1 %vm680_vm0, %v511_v10 }
 0x1ee   : > { %5637 = vmatprep.mubr.msk.f32.mxu1 %vm680_vm0, %v512_v11  ;;  %v6269_v11 = vpack.c.bf16 %v1303_v6, %v1302_v5 }
 0x1f1   : > { %5638 = vmatmul.mubr.msk.f32.gmra.mrb[24].mxu1 %vm680_vm0, %v513_v12  ;;  %v4971_v12 = vld [vmem:[%s8723_s8 + $0x40] sm:$0xff] }
 0x1f2   : > { %5640 = vmatprep.mubr.msk.f32.mxu1 %vm680_vm0, %v514_v13  ;;  %v4972_v13 = vld [vmem:[%s8723_s8 + $0x48] sm:$0xff] }
 0x1f5   : > { %5641 = vmatmul.mubr.msk.f32.gmra.mrb[26].mxu1 %vm680_vm0, %v515_v14 }
 0x1f6   : > { %5643 = vmatprep.mubr.msk.f32.mxu1 %vm680_vm0, %v516_v15 }
 0x1f9   : > { %5644 = vmatmul.mubr.msk.f32.gmra.mrb[28].mxu1 %vm680_vm0, %v517_v17 }
 0x1fa   : > { %5646 = vmatprep.mubr.msk.f32.mxu1 %vm680_vm0, %v518_v18  ;;  %v6329_v18 = vpack.c.bf16 %v4972_v13, %v4971_v12 }
 0x1fd   : > { %5647 = vmatmul.mubr.msk.f32.gmra.mrb[30].mxu1 %vm680_vm0, %v519_v19 }
 0x22c   : > { %v732_v20 = vpop.xlane.xlu0 %731 }
 0x22d   : > { %v754_v21 = vmul.f32 0.015625, %v732_v20 }
 0x22f   : > { %v762_v22 = vadd.f32 1e-05, %v754_v21 }
 0x230   : > { %v735_v23 = vpop.xlane.xlu1 %734 }
 0x231   : > { %6457 = vrsqrt.f32 %v762_v22  ;;  %v755_v24 = vmul.f32 0.015625, %v735_v23 }
 0x233   : > { %v763_v25 = vadd.f32 1e-05, %v755_v24 }
 0x234   : > { %v738_v26 = vpop.xlane.xlu0 %737 }
 0x235   : > { %6459 = vrsqrt.f32 %v763_v25  ;;  %v756_v27 = vmul.f32 0.015625, %v738_v26 }
 0x237   : > { %v764_v28 = vadd.f32 1e-05, %v756_v27 }
 0x238   : > { %v741_v29 = vpop.xlane.xlu1 %740 }
 0x239   : > { %6461 = vrsqrt.f32 %v764_v28  ;;  %v757_v30 = vmul.f32 0.015625, %v741_v29  ;;  %v4974_v28 = vld [vmem:[%s8723_s8 + $0x58] sm:$0xff]  ;;  %v4975_v29 = vld [vmem:[%s8723_s8 + $0x60] sm:$0xff] }
 0x23b   : > { %v6458_v32 = vpop.eup %6457  ;;  %v765_v34 = vadd.f32 1e-05, %v757_v30  ;;  %v4976_v30 = vld [vmem:[%s8723_s8 + $0x68] sm:$0xff] }
 0x23c   : > { %v744_v35 = vpop.xlane.xlu0 %743  ;;  %v778_v36 = vmul.f32 %v6458_v32, %v6983_v43  ;;  %v1298_v43 = vld [vmem:[%s8725_s10 + $0x10] sm:$0xff]  ;;  %v6337_v32 = vpack.c.bf16 %v4976_v30, %v4975_v29 }
 0x23d   : > { %6463 = vrsqrt.f32 %v765_v34  ;;  %v758_v37 = vmul.f32 0.015625, %v744_v35  ;;  %v6261_v55 = vpack.c.bf16 %v1299_v48, %v1298_v43  ;;  %v4978_v34 = vld [vmem:[%s8723_s8 + $0x78] sm:$0xff]  ;;  %v4995_v43 = vld [vmem:[%s8725_s10 + $0x70] sm:$0xff] }
 0x23e   : > { %v793_v39 = vmul.f32 %v7155_v33, %v778_v36  ;;  %v4989_v36 = vld [vmem:[%s8725_s10 + $0x40] sm:$0xff]  ;;  %v4996_v48 = vld [vmem:[%s8725_s10 + $0x78] sm:$0xff] }
 0x23f   : > { %v6460_v40 = vpop.eup %6459  ;;  %v766_v41 = vadd.f32 1e-05, %v758_v37  ;;  %v4990_v37 = vld [vmem:[%s8725_s10 + $0x48] sm:$0xff] }
 0x240   : > { %v779_v42 = vmul.f32 %v6460_v40, %v6987_v47  ;;  %v747_v44 = vpop.xlane.xlu1 %746  ;;  %v7166_v45 = vadd.f32 %v7161_v38, %v793_v39  ;;  %v4991_v39 = vld [vmem:[%s8725_s10 + $0x50] sm:$0xff]  ;;  %v4992_v40 = vld [vmem:[%s8725_s10 + $0x58] sm:$0xff] }
 0x241   : > { %6465 = vrsqrt.f32 %v766_v41  ;;  %v759_v46 = vmul.f32 0.015625, %v747_v44  ;;  %v6349_v41 = vpack.c.bf16 %v4992_v40, %v4991_v39  ;;  %v4994_v44 = vld [vmem:[%s8725_s10 + $0x68] sm:$0xff] }
 0x242   : > { %v794_v49 = vmul.f32 %v7155_v33, %v779_v42  ;;  %5665 = vmatprep.mubr.msk.f32.mxu0 %vm680_vm0, %v7166_v45  ;;  %v4993_v42 = vld [vmem:[%s8725_s10 + $0x60] sm:$0xff] }
 0x243   : > { %v6462_v47 = vpop.eup %6461  ;;  %v767_v50 = vadd.f32 1e-05, %v759_v46  ;;  %v6353_v46 = vpack.c.bf16 %v4994_v44, %v4993_v42 }
 0x244   : > { %v750_v51 = vpop.xlane.xlu0 %749  ;;  %v7178_v53 = vadd.f32 %v7161_v38, %v794_v49  ;;  %v780_v54 = vmul.f32 %v6462_v47, %v6992_v52  ;;  %v6357_v49 = vpack.c.bf16 %v4996_v48, %v4995_v43  ;;  %v7330_v47 = vld [vmem:[%s8718_s3] ss:$0 sm:$0xff] }
 0x245   : > { %6467 = vrsqrt.f32 %v767_v50  ;;  %v760_v56 = vmul.f32 0.015625, %v750_v51 }
 0x246   : > { %5666 = vmatmul.mubr.msk.f32.vlgmr.msra.gmra.mrb[16].mxu0 %vm680_vm0, %v7178_v53  ;;  %v795_v60 = vmul.f32 %v7155_v33, %v780_v54 }
 0x247   : > { %v6464_v61 = vpop.eup %6463  ;;  %v768_v63 = vadd.f32 1e-05, %v760_v56  ;;  %6260 = vmatpush3.bf16.msra.mxu0 %v7053_v31 }
 0x248   : > { %v753_v52 = vpop.xlane.xlu1 %752  ;;  %v7192_v0 = vadd.f32 %v7161_v38, %v795_v60  ;;  %v781_v1 = vmul.f32 %v6464_v61, %v6997_v57  ;;  %6262 = vmatprep.subr.bf16.mxu0 %v6261_v55 }
 0x249   : > { %6469 = vrsqrt.f32 %v768_v63  ;;  %v761_v4 = vmul.f32 0.015625, %v753_v52 }
 0x24a   : > { %5668 = vmatprep.mubr.msk.f32.mxu0 %vm680_vm0, %v7192_v0  ;;  %v796_v31 = vmul.f32 %v7155_v33, %v781_v1 }
 0x24b   : > { %v6466_v7 = vpop.eup %6465  ;;  %v769_v9 = vadd.f32 1e-05, %v761_v4  ;;  %6264 = vmatpush3.bf16.msra.mxu0 %v6261_v55 }
 0x24c   : > { %v7205_v57 = vadd.f32 %v7161_v38, %v796_v31  ;;  %v782_v10 = vmul.f32 %v6466_v7, %v7002_v62  ;;  %6266 = vmatprep.subr.bf16.mxu0 %v6265_v2 }
 0x24d   : > { %6471 = vrsqrt.f32 %v769_v9 }
 0x24e   : > { %5669 = vmatmul.mubr.msk.f32.gmra.mrb[18].mxu0 %vm680_vm0, %v7205_v57  ;;  %v797_v14 = vmul.f32 %v7155_v33, %v782_v10 }
 0x24f   : > { %v6468_v15 = vpop.eup %6467  ;;  %6268 = vmatpush3.bf16.msra.mxu0 %v6265_v2 }
 0x250   : > { %v7218_v62 = vadd.f32 %v7161_v38, %v797_v14  ;;  %v783_v17 = vmul.f32 %v6468_v15, %v7007_v3  ;;  %6270 = vmatprep.subr.bf16.mxu0 %v6269_v11 }
 0x252   : > { %5671 = vmatprep.mubr.msk.f32.mxu0 %vm680_vm0, %v7218_v62  ;;  %v798_v19 = vmul.f32 %v7155_v33, %v783_v17 }
 0x253   : > { %v6470_v20 = vpop.eup %6469  ;;  %6272 = vmatpush3.bf16.msra.mxu0 %v6269_v11 }
 0x254   : > { %v7225_v21 = vadd.f32 %v7161_v38, %v798_v19  ;;  %v784_v22 = vmul.f32 %v6470_v20, %v7012_v8  ;;  %6330 = vmatprep.subr.bf16.mxu0 %v6329_v18  ;;  %v4973_v8 = vld [vmem:[%s8723_s8 + $0x50] sm:$0xff] }
 0x256   : > { %5672 = vmatmul.mubr.msk.f32.gmra.mrb[20].mxu0 %vm680_vm0, %v7225_v21  ;;  %v799_v3 = vmul.f32 %v7155_v33, %v784_v22 }
 0x257   : > { %v6472_v23 = vpop.eup %6471 }
 0x258   : > { %v7232_v24 = vadd.f32 %v7161_v38, %v799_v3  ;;  %v785_v25 = vmul.f32 %v6472_v23, %v7023_v16  ;;  %v6333_v16 = vpack.c.bf16 %v4974_v28, %v4973_v8 }
 0x25a   : > { %5674 = vmatprep.mubr.msk.f32.mxu0 %vm680_vm0, %v7232_v24  ;;  %v800_v26 = vmul.f32 %v7155_v33, %v785_v25  ;;  %v4977_v33 = vld [vmem:[%s8723_s8 + $0x70] sm:$0xff] }
 0x25b   : > { %v6341_v35 = vpack.c.bf16 %v4978_v34, %v4977_v33 }
 0x25c   : > { %v815_v27 = vadd.f32 %v7161_v38, %v800_v26  ;;  %v6345_v38 = vpack.c.bf16 %v4990_v37, %v4989_v36 }
 0x25e   : > { %5675 = vmatmul.mubr.msk.f32.gmra.mrb[22].mxu0 %vm680_vm0, %v815_v27 }
 0x25f   : > { %5693 = vmatprep.mubr.msk.f32.mxu0 %vm680_vm0, %v7166_v45 }
 0x262   : > { %5694 = vmatmul.mubr.msk.f32.vlgmr.msra.gmra.mrb[24].mxu0 %vm680_vm0, %v7178_v53 }
 0x263   : > { %5696 = vmatprep.mubr.msk.f32.mxu0 %vm680_vm0, %v7192_v0  ;;  %6332 = vmatpush3.bf16.msra.mxu0 %v6329_v18 }
 0x264   : > { %6334 = vmatprep.subr.bf16.mxu0 %v6333_v16 }
 0x266   : > { %5697 = vmatmul.mubr.msk.f32.gmra.mrb[26].mxu0 %vm680_vm0, %v7205_v57 }
 0x267   : > { %5699 = vmatprep.mubr.msk.f32.mxu0 %vm680_vm0, %v7218_v62  ;;  %6336 = vmatpush3.bf16.msra.mxu0 %v6333_v16 }
 0x268   : > { %6338 = vmatprep.subr.bf16.mxu0 %v6337_v32 }
 0x26a   : > { %5700 = vmatmul.mubr.msk.f32.gmra.mrb[28].mxu0 %vm680_vm0, %v7225_v21 }
 0x26b   : > { %5702 = vmatprep.mubr.msk.f32.mxu0 %vm680_vm0, %v7232_v24  ;;  %6340 = vmatpush3.bf16.msra.mxu0 %v6337_v32 }
 0x26c   : > { %6342 = vmatprep.subr.bf16.mxu0 %v6341_v35 }
 0x26e   : > { %5703 = vmatmul.mubr.msk.f32.gmra.mrb[30].mxu0 %vm680_vm0, %v815_v27 }
 0x26f   : > { %6344 = vmatpush3.bf16.msra.mxu0 %v6341_v35  ;;  %5913 = vmatprep.mubr.msk.f32.mxu0 %vm680_vm0, %v7166_v45 }
 0x270   : > { %6346 = vmatprep.subr.bf16.mxu0 %v6345_v38 }
 0x272   : > { %5914 = vmatmul.mubr.msk.f32.vlgmr.msra.gmra.mrb[32].mxu0 %vm680_vm0, %v7178_v53 }
 0x273   : > { %5916 = vmatprep.mubr.msk.f32.mxu0 %vm680_vm0, %v7192_v0  ;;  %6348 = vmatpush3.bf16.msra.mxu0 %v6345_v38 }
 0x274   : > { %6350 = vmatprep.subr.bf16.mxu0 %v6349_v41 }
 0x276   : > { %5917 = vmatmul.mubr.msk.f32.gmra.mrb[34].mxu0 %vm680_vm0, %v7205_v57 }
 0x277   : > { %5919 = vmatprep.mubr.msk.f32.mxu0 %vm680_vm0, %v7218_v62  ;;  %6352 = vmatpush3.bf16.msra.mxu0 %v6349_v41 }
 0x278   : > { %6354 = vmatprep.subr.bf16.mxu0 %v6353_v46 }
 0x27a   : > { %5920 = vmatmul.mubr.msk.f32.gmra.mrb[36].mxu0 %vm680_vm0, %v7225_v21 }
 0x27b   : > { %5922 = vmatprep.mubr.msk.f32.mxu0 %vm680_vm0, %v7232_v24  ;;  %6356 = vmatpush3.bf16.msra.mxu0 %v6353_v46 }
 0x27c   : > { %6358 = vmatprep.subr.bf16.mxu0 %v6357_v49 }
 0x27e   : > { %5923 = vmatmul.mubr.msk.f32.gmra.mrb[38].mxu0 %vm680_vm0, %v815_v27 }
 0x27f   : > { %6360 = vmatpush3.bf16.msra.mxu0 %v6357_v49  ;;  %5941 = vmatprep.mubr.msk.f32.mxu0 %vm680_vm0, %v7166_v45 }
 0x282   : > { %5942 = vmatmul.mubr.msk.f32.vlgmr.msra.gmra.mrb[40].mxu0 %vm680_vm0, %v7178_v53 }
 0x283   : > { %5944 = vmatprep.mubr.msk.f32.mxu0 %vm680_vm0, %v7192_v0 }
 0x286   : > { %5945 = vmatmul.mubr.msk.f32.gmra.mrb[42].mxu0 %vm680_vm0, %v7205_v57 }
 0x287   : > { %5947 = vmatprep.mubr.msk.f32.mxu0 %vm680_vm0, %v7218_v62 }
 0x28a   : > { %5948 = vmatmul.mubr.msk.f32.gmra.mrb[44].mxu0 %vm680_vm0, %v7225_v21 }
 0x28b   : > { %5950 = vmatprep.mubr.msk.f32.mxu0 %vm680_vm0, %v7232_v24 }
 0x28e   : > { %5951 = vmatmul.mubr.msk.f32.gmra.mrb[46].mxu0 %vm680_vm0, %v815_v27 }
 0x294   : > { %v5603_v45 = vpop.f32.mrb[0].mxu1 }
 0x295   : > { %v7333_v50 = vadd.f32 %v5603_v45, %v7330_v47  ;;  %v993_v51 = vpop.f32.mrb[1].mxu1 }
 0x296   : > { %v994_v53 = vadd.f32 %v7330_v47, %v993_v51  ;;  %v4839_v51 = vld [vmem:[%s8724_s9] ss:$0 sm:$0xff] }
 0x298   : > { %v5606_v54 = vpop.f32.mrb[2].mxu1  ;;  %5721 = vmatprep.mubr.msk.f32.mxu1 %vm1416_vm1, %v994_v53 }
 0x299   : > { %v7338_v55 = vadd.f32 %v5606_v54, %v7330_v47  ;;  %v1003_v56 = vpop.f32.mrb[3].mxu1 }
 0x29a   : > { %v7341_v58 = vadd.f32 %v7330_v47, %v1003_v56 }
 0x29c   : > { %v5609_v59 = vpop.f32.mrb[4].mxu1 }
 0x29d   : > { %v7344_v60 = vadd.f32 %v5609_v59, %v7330_v47  ;;  %v1013_v61 = vpop.f32.mrb[5].mxu1 }
 0x29e   : > { %v7347_v63 = vadd.f32 %v7330_v47, %v1013_v61 }
 0x2a0   : > { %v5612_v52 = vpop.f32.mrb[6].mxu1 }
 0x2a1   : > { %v7350_v0 = vadd.f32 %v5612_v52, %v7330_v47  ;;  %v1023_v1 = vpop.f32.mrb[7].mxu1 }
 0x2a2   : > { %v7353_v2 = vadd.f32 %v7330_v47, %v1023_v1 }
 0x2a4   : > { %v5615_v4 = vpop.f32.mrb[8].mxu1 }
 0x2a5   : > { %v7356_v5 = vadd.f32 %v5615_v4, %v7330_v47  ;;  %v1033_v6 = vpop.f32.mrb[9].mxu1 }
 0x2a6   : > { %v7359_v31 = vadd.f32 %v7330_v47, %v1033_v6 }
 0x2a8   : > { %v5618_v7 = vpop.f32.mrb[10].mxu1 }
 0x2a9   : > { %v7362_v9 = vadd.f32 %v5618_v7, %v7330_v47  ;;  %v1043_v57 = vpop.f32.mrb[11].mxu1 }
 0x2aa   : > { %v7365_v10 = vadd.f32 %v7330_v47, %v1043_v57 }
 0x2ac   : > { %v5621_v11 = vpop.f32.mrb[12].mxu1 }
 0x2ad   : > { %v7368_v12 = vadd.f32 %v5621_v11, %v7330_v47  ;;  %v1053_v13 = vpop.f32.mrb[13].mxu1 }
 0x2ae   : > { %v7371_v14 = vadd.f32 %v7330_v47, %v1053_v13 }
 0x2b0   : > { %v5624_v15 = vpop.f32.mrb[14].mxu1 }
 0x2b1   : > { %v7374_v62 = vadd.f32 %v5624_v15, %v7330_v47  ;;  %v1063_v17 = vpop.f32.mrb[15].mxu1 }
 0x2b2   : > { %v7377_v18 = vadd.f32 %v7330_v47, %v1063_v17 }
 0x2b4   : > { %v5627_v19 = vpop.f32.mrb[16].mxu1 }
 0x2b5   : > { %v7380_v20 = vadd.f32 %v5627_v19, %v7330_v47  ;;  %v1073_v21 = vpop.f32.mrb[17].mxu1 }
 0x2b6   : > { %v7383_v22 = vadd.f32 %v7330_v47, %v1073_v21 }
 0x2b8   : > { %v5630_v3 = vpop.f32.mrb[18].mxu1 }
 0x2b9   : > { %v7386_v23 = vadd.f32 %v5630_v3, %v7330_v47  ;;  %v1083_v24 = vpop.f32.mrb[19].mxu1 }
 0x2ba   : > { %v7389_v25 = vadd.f32 %v7330_v47, %v1083_v24 }
 0x2bc   : > { %v5633_v26 = vpop.f32.mrb[20].mxu1 }
 0x2bd   : > { %v7392_v27 = vadd.f32 %v5633_v26, %v7330_v47  ;;  %v1093_v8 = vpop.f32.mrb[21].mxu1  ;;  %v4848_v26 = vld [vmem:[%s8726_s11] ss:$0 sm:$0xff] }
 0x2be   : > { %v7395_v28 = vadd.f32 %v7330_v47, %v1093_v8 }
 0x2c0   : > { %v5636_v16 = vpop.f32.mrb[22].mxu1 }
 0x2c1   : > { %v7398_v29 = vadd.f32 %v5636_v16, %v7330_v47  ;;  %v1103_v30 = vpop.f32.mrb[23].mxu1 }
 0x2c2   : > { %v7401_v32 = vadd.f32 %v7330_v47, %v1103_v30 }
 0x2c4   : > { %v5639_v33 = vpop.f32.mrb[24].mxu1 }
 0x2c5   : > { %v7404_v34 = vadd.f32 %v5639_v33, %v7330_v47  ;;  %v1113_v35 = vpop.f32.mrb[25].mxu1 }
 0x2c6   : > { %v7407_v36 = vadd.f32 %v7330_v47, %v1113_v35 }
 0x2c8   : > { %v5642_v37 = vpop.f32.mrb[26].mxu1 }
 0x2c9   : > { %v7410_v38 = vadd.f32 %v5642_v37, %v7330_v47  ;;  %v1123_v39 = vpop.f32.mrb[27].mxu1 }
 0x2ca   : > { %v7413_v40 = vadd.f32 %v7330_v47, %v1123_v39 }
 0x2cc   : > { %v5645_v41 = vpop.f32.mrb[28].mxu1 }
 0x2cd   : > { %v7416_v42 = vadd.f32 %v5645_v41, %v7330_v47  ;;  %v1133_v44 = vpop.f32.mrb[29].mxu1 }
 0x2ce   : > { %v7419_v46 = vadd.f32 %v7330_v47, %v1133_v44 }
 0x2d0   : > { %v5648_v43 = vpop.f32.mrb[30].mxu1 }
 0x2d1   : > { %v7422_v48 = vadd.f32 %v5648_v43, %v7330_v47  ;;  %v1143_v49 = vpop.f32.mrb[31].mxu1 }
 0x2d2   : > { %v7425_v45 = vadd.f32 %v7330_v47, %v1143_v49 }
 0x319   : > { %v5667_v53 = vpop.f32.mrb[16].mxu0 }
 0x31a   : > { %v1263_v54 = vadd.f32 %v5667_v53, %v4839_v51  ;;  %v1257_v56 = vpop.f32.mrb[17].mxu0 }
 0x31b   : > { %v1258_v59 = vadd.f32 %v4839_v51, %v1257_v56 }
 0x31d   : > { %v6273_v52 = vpack.c.bf16 %v1263_v54, %v1258_v59 }
 0x31f   : > { %6275 = vmatprep.subr.msk.bf16.mxu1 %vm7432_vm2, %v6273_v52 }
 0x320   : > { %6278 = vmatpush3.bf16.xpose.msk.msra.mxu1 %vm7432_vm2, %v6273_v52 }
 0x321   : > { %v5670_v47 = vpop.f32.mrb[18].mxu0 }
 0x322   : > { %v1273_v1 = vadd.f32 %v5670_v47, %v4839_v51  ;;  %v1267_v4 = vpop.f32.mrb[19].mxu0 }
 0x323   : > { %v1268_v6 = vadd.f32 %v4839_v51, %v1267_v4 }
 0x325   : > { %v6279_v7 = vpack.c.bf16 %v1273_v1, %v1268_v6  ;;  %v4980_v6 = vld [vmem:[%s8724_s9 + $0x1] ss:$0 sm:$0xff] }
 0x327   : > { %6281 = vmatprep.subr.msk.bf16.mxu1 %vm7432_vm2, %v6279_v7 }
 0x328   : > { %6284 = vmatpush3.bf16.xpose.msk.msra.mxu1 %vm7432_vm2, %v6279_v7 }
 0x329   : > { %v5673_v57 = vpop.f32.mrb[20].mxu0 }
 0x32a   : > { %v1283_v11 = vadd.f32 %v5673_v57, %v4839_v51  ;;  %v1277_v13 = vpop.f32.mrb[21].mxu0 }
 0x32b   : > { %v1278_v15 = vadd.f32 %v4839_v51, %v1277_v13 }
 0x32d   : > { %v6285_v17 = vpack.c.bf16 %v1283_v11, %v1278_v15 }
 0x32f   : > { %6287 = vmatprep.subr.msk.bf16.mxu1 %vm7432_vm2, %v6285_v17 }
 0x330   : > { %6290 = vmatpush3.bf16.xpose.msk.msra.mxu1 %vm7432_vm2, %v6285_v17 }
 0x331   : > { %v5676_v19 = vpop.f32.mrb[22].mxu0 }
 0x332   : > { %v1293_v21 = vadd.f32 %v5676_v19, %v4839_v51  ;;  %v1287_v3 = vpop.f32.mrb[23].mxu0 }
 0x333   : > { %v1288_v24 = vadd.f32 %v4839_v51, %v1287_v3 }
 0x335   : > { %v6291_v8 = vpack.c.bf16 %v1293_v21, %v1288_v24  ;;  %v5695_v16 = vpop.f32.mrb[24].mxu0 }
 0x336   : > { %v1383_v30 = vadd.f32 %v5695_v16, %v4848_v26  ;;  %v1377_v33 = vpop.f32.mrb[25].mxu0 }
 0x337   : > { %v1378_v35 = vadd.f32 %v4848_v26, %v1377_v33  ;;  %6293 = vmatprep.subr.msk.bf16.mxu1 %vm7432_vm2, %v6291_v8 }
 0x338   : > { %6296 = vmatpush3.bf16.xpose.msk.msra.mxu1 %vm7432_vm2, %v6291_v8 }
 0x339   : > { %v6297_v37 = vpack.c.bf16 %v1383_v30, %v1378_v35  ;;  %v5698_v39 = vpop.f32.mrb[26].mxu0 }
 0x33a   : > { %v1393_v41 = vadd.f32 %v5698_v39, %v4848_v26  ;;  %v1387_v44 = vpop.f32.mrb[27].mxu0 }
 0x33b   : > { %v1388_v43 = vadd.f32 %v4848_v26, %v1387_v44  ;;  %6298 = vmatprep.subr.bf16.mxu1 %v6297_v37 }
 0x33d   : > { %v6301_v49 = vpack.c.bf16 %v1393_v41, %v1388_v43  ;;  %v5701_v51 = vpop.f32.mrb[28].mxu0 }
 0x33e   : > { %v1403_v53 = vadd.f32 %v5701_v51, %v4848_v26  ;;  %v1397_v54 = vpop.f32.mrb[29].mxu0 }
 0x33f   : > { %v1398_v56 = vadd.f32 %v4848_v26, %v1397_v54  ;;  %5722 = vmatmul.mubr.msk.f32.vlgmr.msra.gmra.mrb[32].mxu1 %vm1416_vm1, %v7333_v50 }
 0x340   : > { %6300 = vmatpush3.bf16.msra.mxu1 %v6297_v37  ;;  %5724 = vmatprep.mubr.msk.f32.mxu1 %vm1416_vm1, %v7341_v58 }
 0x341   : > { %v6305_v59 = vpack.c.bf16 %v1403_v53, %v1398_v56  ;;  %v5704_v52 = vpop.f32.mrb[30].mxu0  ;;  %6302 = vmatprep.subr.bf16.mxu1 %v6301_v49 }
 0x342   : > { %v1413_v47 = vadd.f32 %v5704_v52, %v4848_v26  ;;  %v1407_v1 = vpop.f32.mrb[31].mxu0 }
 0x343   : > { %v1408_v4 = vadd.f32 %v4848_v26, %v1407_v1  ;;  %5725 = vmatmul.mubr.msk.f32.gmra.mrb[34].mxu1 %vm1416_vm1, %v7338_v55 }
 0x344   : > { %6304 = vmatpush3.bf16.msra.mxu1 %v6301_v49  ;;  %5727 = vmatprep.mubr.msk.f32.mxu1 %vm1416_vm1, %v7347_v63 }
 0x345   : > { %v6309_v50 = vpack.c.bf16 %v1413_v47, %v1408_v4  ;;  %6306 = vmatprep.subr.bf16.mxu1 %v6305_v59  ;;  %v5915_v58 = vpop.f32.mrb[32].mxu0 }
 0x346   : > { %v2802_v7 = vadd.f32 %v5915_v58, %v4980_v6  ;;  %v2796_v57 = vpop.f32.mrb[33].mxu0 }
 0x347   : > { %v2797_v11 = vadd.f32 %v4980_v6, %v2796_v57  ;;  %5728 = vmatmul.mubr.msk.f32.gmra.mrb[36].mxu1 %vm1416_vm1, %v7344_v60 }
 0x348   : > { %6308 = vmatpush3.bf16.msra.mxu1 %v6305_v59  ;;  %5730 = vmatprep.mubr.msk.f32.mxu1 %vm1416_vm1, %v7353_v2 }
 0x349   : > { %v6361_v55 = vpack.c.bf16 %v2802_v7, %v2797_v11  ;;  %6310 = vmatprep.subr.bf16.mxu1 %v6309_v50  ;;  %v5918_v13 = vpop.f32.mrb[34].mxu0 }
 0x34a   : > { %v2812_v15 = vadd.f32 %v5918_v13, %v4980_v6  ;;  %v2806_v17 = vpop.f32.mrb[35].mxu0 }
 0x34b   : > { %v2807_v19 = vadd.f32 %v4980_v6, %v2806_v17  ;;  %5731 = vmatmul.mubr.msk.f32.gmra.mrb[38].mxu1 %vm1416_vm1, %v7350_v0  ;;  %6363 = vmatprep.subr.msk.bf16.mxu0 %vm7432_vm2, %v6361_v55 }
 0x34c   : > { %6312 = vmatpush3.bf16.msra.mxu1 %v6309_v50  ;;  %6366 = vmatpush3.bf16.xpose.msk.msra.mxu0 %vm7432_vm2, %v6361_v55 }
 0x34d   : > { %v6367_v60 = vpack.c.bf16 %v2812_v15, %v2807_v19  ;;  %v5921_v63 = vpop.f32.mrb[36].mxu0  ;;  %5733 = vmatprep.mubr.msk.f32.mxu1 %vm1416_vm1, %v7359_v31  ;;  %v4998_v31 = vld [vmem:[%s8726_s11 + $0x1] ss:$0 sm:$0xff] }
 0x34e   : > { %v2822_v2 = vadd.f32 %v5921_v63, %v4980_v6  ;;  %v2816_v21 = vpop.f32.mrb[37].mxu0 }
 0x34f   : > { %v2817_v3 = vadd.f32 %v4980_v6, %v2816_v21  ;;  %5734 = vmatmul.mubr.msk.f32.gmra.mrb[40].mxu1 %vm1416_vm1, %v7356_v5  ;;  %6369 = vmatprep.subr.msk.bf16.mxu0 %vm7432_vm2, %v6367_v60 }
 0x350   : > { %5736 = vmatprep.mubr.msk.f32.mxu1 %vm1416_vm1, %v7365_v10 }
 0x351   : > { %v6373_v0 = vpack.c.bf16 %v2822_v2, %v2817_v3  ;;  %v5924_v24 = vpop.f32.mrb[38].mxu0 }
 0x352   : > { %v2832_v26 = vadd.f32 %v5924_v24, %v4980_v6  ;;  %v2826_v8 = vpop.f32.mrb[39].mxu0 }
 0x353   : > { %v2827_v16 = vadd.f32 %v4980_v6, %v2826_v8  ;;  %5737 = vmatmul.mubr.msk.f32.gmra.mrb[42].mxu1 %vm1416_vm1, %v7362_v9 }
 0x354   : > { %6372 = vmatpush3.bf16.xpose.msk.msra.mxu0 %vm7432_vm2, %v6367_v60  ;;  %5739 = vmatprep.mubr.msk.f32.mxu1 %vm1416_vm1, %v7371_v14 }
 0x355   : > { %v6379_v5 = vpack.c.bf16 %v2832_v26, %v2827_v16  ;;  %v5943_v10 = vpop.f32.mrb[40].mxu0  ;;  %6375 = vmatprep.subr.msk.bf16.mxu0 %vm7432_vm2, %v6373_v0 }
 0x356   : > { %v2924_v30 = vadd.f32 %v5943_v10, %v4998_v31  ;;  %v2918_v33 = vpop.f32.mrb[41].mxu0 }
 0x357   : > { %v2919_v35 = vadd.f32 %v4998_v31, %v2918_v33  ;;  %5740 = vmatmul.mubr.msk.f32.gmra.mrb[44].mxu1 %vm1416_vm1, %v7368_v12 }
 0x358   : > { %5742 = vmatprep.mubr.msk.f32.mxu1 %vm1416_vm1, %v7377_v18 }
 0x359   : > { %v7499_v9 = vpack.c.bf16 %v2924_v30, %v2919_v35  ;;  %v5946_v37 = vpop.f32.mrb[42].mxu0 }
 0x35a   : > { %v2934_v39 = vadd.f32 %v5946_v37, %v4998_v31  ;;  %v2928_v41 = vpop.f32.mrb[43].mxu0 }
 0x35b   : > { %v2929_v14 = vadd.f32 %v4998_v31, %v2928_v41  ;;  %5743 = vmatmul.mubr.msk.f32.gmra.mrb[46].mxu1 %vm1416_vm1, %v7374_v62 }
 0x35c   : > { %6378 = vmatpush3.bf16.xpose.msk.msra.mxu0 %vm7432_vm2, %v6373_v0  ;;  %5745 = vmatprep.mubr.msk.f32.mxu1 %vm1416_vm1, %v7383_v22 }
 0x35d   : > { %v7507_v44 = vpack.c.bf16 %v2934_v39, %v2929_v14  ;;  %v5949_v12 = vpop.f32.mrb[44].mxu0  ;;  %6381 = vmatprep.subr.msk.bf16.mxu0 %vm7432_vm2, %v6379_v5 }
 0x35e   : > { %v2944_v18 = vadd.f32 %v5949_v12, %v4998_v31  ;;  %v2938_v43 = vpop.f32.mrb[45].mxu0 }
 0x35f   : > { %v2939_v49 = vadd.f32 %v4998_v31, %v2938_v43  ;;  %5746 = vmatmul.mubr.msk.f32.gmra.mrb[48].mxu1 %vm1416_vm1, %v7380_v20 }
 0x360   : > { %5748 = vmatprep.mubr.msk.f32.mxu1 %vm1416_vm1, %v7389_v25 }
 0x361   : > { %v7515_v62 = vpack.c.bf16 %v2944_v18, %v2939_v49  ;;  %v5952_v51 = vpop.f32.mrb[46].mxu0 }
 0x362   : > { %v2954_v53 = vadd.f32 %v5952_v51, %v4998_v31  ;;  %v2948_v22 = vpop.f32.mrb[47].mxu0 }
 0x363   : > { %v2949_v54 = vadd.f32 %v4998_v31, %v2948_v22  ;;  %5749 = vmatmul.mubr.msk.f32.gmra.mrb[50].mxu1 %vm1416_vm1, %v7386_v23 }
 0x364   : > { %6384 = vmatpush3.bf16.xpose.msk.msra.mxu0 %vm7432_vm2, %v6379_v5  ;;  %5751 = vmatprep.mubr.msk.f32.mxu1 %vm1416_vm1, %v7395_v28 }
 0x365   : > { %v7523_v56 = vpack.c.bf16 %v2954_v53, %v2949_v54 }
 0x367   : > { %5752 = vmatmul.mubr.msk.f32.gmra.mrb[52].mxu1 %vm1416_vm1, %v7392_v27 }
 0x368   : > { %5754 = vmatprep.mubr.msk.f32.mxu1 %vm1416_vm1, %v7401_v32 }
 0x36b   : > { %5755 = vmatmul.mubr.msk.f32.gmra.mrb[54].mxu1 %vm1416_vm1, %v7398_v29 }
 0x36c   : > { %5757 = vmatprep.mubr.msk.f32.mxu1 %vm1416_vm1, %v7407_v36 }
 0x36f   : > { %5758 = vmatmul.mubr.msk.f32.gmra.mrb[56].mxu1 %vm1416_vm1, %v7404_v34 }
 0x370   : > { %5760 = vmatprep.mubr.msk.f32.mxu1 %vm1416_vm1, %v7413_v40 }
 0x373   : > { %5761 = vmatmul.mubr.msk.f32.gmra.mrb[58].mxu1 %vm1416_vm1, %v7410_v38 }
 0x374   : > { %5763 = vmatprep.mubr.msk.f32.mxu1 %vm1416_vm1, %v7419_v46 }
 0x377   : > { %5764 = vmatmul.mubr.msk.f32.gmra.mrb[60].mxu1 %vm1416_vm1, %v7416_v42 }
 0x378   : > { %5766 = vmatprep.mubr.msk.f32.mxu1 %vm1416_vm1, %v7425_v45 }
 0x37b   : > { %5767 = vmatmul.mubr.msk.f32.gmra.mrb[62].mxu1 %vm1416_vm1, %v7422_v48 }
 0x412   : > { %v5723_v20 = vpop.f32.mrb[32].mxu1 }
 0x413   : > { %v7547_v23 = vmul.f32 0.17677669, %v5723_v20  ;;  %v1603_v25 = vpop.f32.mrb[33].mxu1 }
 0x414   : > { %v7549_v27 = vmul.f32 0.17677669, %v1603_v25 }
 0x415   : > { %v1797_v28 = vsel %vm680_vm0, %v7547_v23, -inf }
 0x416   : > { %1798 = vmax.xlane.f32.xlu1 %v1797_v28  ;;  %v5726_v29 = vpop.f32.mrb[34].mxu1  ;;  %v1794_v32 = vsel %vm680_vm0, %v7549_v27, -inf }
 0x417   : > { %v7555_v34 = vmul.f32 0.17677669, %v5726_v29  ;;  %1795 = vmax.xlane.f32.xlu0 %v1794_v32  ;;  %v1613_v36 = vpop.f32.mrb[35].mxu1 }
 0x418   : > { %v7557_v38 = vmul.f32 0.17677669, %v1613_v36 }
 0x419   : > { %v1803_v40 = vsel %vm680_vm0, %v7555_v34, -inf }
 0x41a   : > { %1804 = vmax.xlane.f32.xlu1 %v1803_v40  ;;  %v5729_v42 = vpop.f32.mrb[36].mxu1  ;;  %v1800_v46 = vsel %vm680_vm0, %v7557_v38, -inf }
 0x41b   : > { %v7563_v48 = vmul.f32 0.17677669, %v5729_v42  ;;  %1801 = vmax.xlane.f32.xlu0 %v1800_v46  ;;  %v1623_v45 = vpop.f32.mrb[37].mxu1 }
 0x41c   : > { %v7565_v61 = vmul.f32 0.17677669, %v1623_v45 }
 0x41d   : > { %v1809_v59 = vsel %vm680_vm0, %v7563_v48, -inf }
 0x41e   : > { %1810 = vmax.xlane.f32.xlu1 %v1809_v59  ;;  %v5732_v52 = vpop.f32.mrb[38].mxu1  ;;  %v1806_v47 = vsel %vm680_vm0, %v7565_v61, -inf }
 0x41f   : > { %v7571_v1 = vmul.f32 0.17677669, %v5732_v52  ;;  %1807 = vmax.xlane.f32.xlu0 %v1806_v47  ;;  %v1633_v4 = vpop.f32.mrb[39].mxu1 }
 0x420   : > { %v7573_v6 = vmul.f32 0.17677669, %v1633_v4 }
 0x421   : > { %v1815_v50 = vsel %vm680_vm0, %v7571_v1, -inf }
 0x422   : > { %1816 = vmax.xlane.f32.xlu1 %v1815_v50  ;;  %v5735_v58 = vpop.f32.mrb[40].mxu1  ;;  %v1812_v7 = vsel %vm680_vm0, %v7573_v6, -inf }
 0x423   : > { %v7579_v57 = vmul.f32 0.17677669, %v5735_v58  ;;  %1813 = vmax.xlane.f32.xlu0 %v1812_v7  ;;  %v1643_v11 = vpop.f32.mrb[41].mxu1 }
 0x424   : > { %v7581_v55 = vmul.f32 0.17677669, %v1643_v11 }
 0x425   : > { %v1821_v13 = vsel %vm680_vm0, %v7579_v57, -inf }
 0x426   : > { %1822 = vmax.xlane.f32.xlu1 %v1821_v13  ;;  %v5738_v15 = vpop.f32.mrb[42].mxu1  ;;  %v1818_v17 = vsel %vm680_vm0, %v7581_v55, -inf }
 0x427   : > { %v7587_v19 = vmul.f32 0.17677669, %v5738_v15  ;;  %1819 = vmax.xlane.f32.xlu0 %v1818_v17  ;;  %v1653_v60 = vpop.f32.mrb[43].mxu1 }
 0x428   : > { %v7589_v63 = vmul.f32 0.17677669, %v1653_v60 }
 0x429   : > { %v1827_v2 = vsel %vm680_vm0, %v7587_v19, -inf }
 0x42a   : > { %1828 = vmax.xlane.f32.xlu1 %v1827_v2  ;;  %v5741_v21 = vpop.f32.mrb[44].mxu1  ;;  %v1824_v3 = vsel %vm680_vm0, %v7589_v63, -inf }
 0x42b   : > { %v7595_v0 = vmul.f32 0.17677669, %v5741_v21  ;;  %1825 = vmax.xlane.f32.xlu0 %v1824_v3  ;;  %v1663_v24 = vpop.f32.mrb[45].mxu1 }
 0x42c   : > { %v7597_v26 = vmul.f32 0.17677669, %v1663_v24 }
 0x42d   : > { %v1833_v8 = vsel %vm680_vm0, %v7595_v0, -inf }
 0x42e   : > { %1834 = vmax.xlane.f32.xlu1 %v1833_v8  ;;  %v5744_v16 = vpop.f32.mrb[46].mxu1  ;;  %v1830_v31 = vsel %vm680_vm0, %v7597_v26, -inf }
 0x42f   : > { %v7603_v5 = vmul.f32 0.17677669, %v5744_v16  ;;  %1831 = vmax.xlane.f32.xlu0 %v1830_v31  ;;  %v1673_v10 = vpop.f32.mrb[47].mxu1 }
 0x430   : > { %v7605_v30 = vmul.f32 0.17677669, %v1673_v10 }
 0x431   : > { %v1839_v33 = vsel %vm680_vm0, %v7603_v5, -inf }
 0x432   : > { %1840 = vmax.xlane.f32.xlu1 %v1839_v33  ;;  %v5747_v35 = vpop.f32.mrb[48].mxu1  ;;  %v1836_v37 = vsel %vm680_vm0, %v7605_v30, -inf }
 0x433   : > { %v7611_v39 = vmul.f32 0.17677669, %v5747_v35  ;;  %1837 = vmax.xlane.f32.xlu0 %v1836_v37  ;;  %v1683_v41 = vpop.f32.mrb[49].mxu1 }
 0x434   : > { %v7613_v14 = vmul.f32 0.17677669, %v1683_v41 }
 0x435   : > { %v1845_v12 = vsel %vm680_vm0, %v7611_v39, -inf }
 0x436   : > { %1846 = vmax.xlane.f32.xlu1 %v1845_v12  ;;  %v5750_v18 = vpop.f32.mrb[50].mxu1  ;;  %v1842_v43 = vsel %vm680_vm0, %v7613_v14, -inf }
 0x437   : > { %v7619_v49 = vmul.f32 0.17677669, %v5750_v18  ;;  %1843 = vmax.xlane.f32.xlu0 %v1842_v43  ;;  %v1693_v51 = vpop.f32.mrb[51].mxu1 }
 0x438   : > { %v7621_v53 = vmul.f32 0.17677669, %v1693_v51 }
 0x439   : > { %v1851_v22 = vsel %vm680_vm0, %v7619_v49, -inf }
 0x43a   : > { %1852 = vmax.xlane.f32.xlu1 %v1851_v22  ;;  %v5753_v54 = vpop.f32.mrb[52].mxu1  ;;  %v1848_v20 = vsel %vm680_vm0, %v7621_v53, -inf }
 0x43b   : > { %v7627_v25 = vmul.f32 0.17677669, %v5753_v54  ;;  %1849 = vmax.xlane.f32.xlu0 %v1848_v20  ;;  %v1703_v28 = vpop.f32.mrb[53].mxu1 }
 0x43c   : > { %v7629_v29 = vmul.f32 0.17677669, %v1703_v28 }
 0x43d   : > { %v1857_v32 = vsel %vm680_vm0, %v7627_v25, -inf }
 0x43e   : > { %1858 = vmax.xlane.f32.xlu1 %v1857_v32  ;;  %v5756_v36 = vpop.f32.mrb[54].mxu1  ;;  %v1854_v40 = vsel %vm680_vm0, %v7629_v29, -inf }
 0x43f   : > { %v7635_v42 = vmul.f32 0.17677669, %v5756_v36  ;;  %1855 = vmax.xlane.f32.xlu0 %v1854_v40  ;;  %v1713_v46 = vpop.f32.mrb[55].mxu1 }
 0x440   : > { %v7637_v45 = vmul.f32 0.17677669, %v1713_v46 }
 0x441   : > { %v1863_v59 = vsel %vm680_vm0, %v7635_v42, -inf }
 0x442   : > { %1864 = vmax.xlane.f32.xlu1 %v1863_v59  ;;  %v5759_v52 = vpop.f32.mrb[56].mxu1  ;;  %v1860_v47 = vsel %vm680_vm0, %v7637_v45, -inf }
 0x443   : > { %v7643_v4 = vmul.f32 0.17677669, %v5759_v52  ;;  %1861 = vmax.xlane.f32.xlu0 %v1860_v47  ;;  %v1723_v50 = vpop.f32.mrb[57].mxu1 }
 0x444   : > { %v7645_v58 = vmul.f32 0.17677669, %v1723_v50 }
 0x445   : > { %v1869_v7 = vsel %vm680_vm0, %v7643_v4, -inf }
 0x446   : > { %1870 = vmax.xlane.f32.xlu1 %v1869_v7  ;;  %v5762_v11 = vpop.f32.mrb[58].mxu1  ;;  %v1866_v13 = vsel %vm680_vm0, %v7645_v58, -inf }
 0x447   : > { %v7651_v15 = vmul.f32 0.17677669, %v5762_v11  ;;  %1867 = vmax.xlane.f32.xlu0 %v1866_v13  ;;  %v1733_v17 = vpop.f32.mrb[59].mxu1 }
 0x448   : > { %v7653_v60 = vmul.f32 0.17677669, %v1733_v17 }
 0x449   : > { %v1875_v2 = vsel %vm680_vm0, %v7651_v15, -inf }
 0x44a   : > { %1876 = vmax.xlane.f32.xlu1 %v1875_v2  ;;  %v5765_v21 = vpop.f32.mrb[60].mxu1  ;;  %v1872_v3 = vsel %vm680_vm0, %v7653_v60, -inf }
 0x44b   : > { %v7659_v24 = vmul.f32 0.17677669, %v5765_v21  ;;  %1873 = vmax.xlane.f32.xlu0 %v1872_v3  ;;  %v1743_v8 = vpop.f32.mrb[61].mxu1 }
 0x44c   : > { %v7661_v16 = vmul.f32 0.17677669, %v1743_v8 }
 0x44d   : > { %v1881_v31 = vsel %vm680_vm0, %v7659_v24, -inf }
 0x44e   : > { %1882 = vmax.xlane.f32.xlu1 %v1881_v31  ;;  %v5768_v10 = vpop.f32.mrb[62].mxu1  ;;  %v1878_v33 = vsel %vm680_vm0, %v7661_v16, -inf }
 0x44f   : > { %v7667_v35 = vmul.f32 0.17677669, %v5768_v10  ;;  %1879 = vmax.xlane.f32.xlu0 %v1878_v33  ;;  %v1753_v37 = vpop.f32.mrb[63].mxu1 }
 0x450   : > { %v7669_v41 = vmul.f32 0.17677669, %v1753_v37 }
 0x451   : > { %v1887_v12 = vsel %vm680_vm0, %v7667_v35, -inf }
 0x452   : > { %1888 = vmax.xlane.f32.xlu1 %v1887_v12  ;;  %v1884_v18 = vsel %vm680_vm0, %v7669_v41, -inf }
 0x453   : > { %1885 = vmax.xlane.f32.xlu0 %v1884_v18 }
 0x4a3   : > { %v1799_v43 = vpop.xlane.xlu1 %1798 }
 0x4a4   : > { %v1891_v51 = vsub.f32 %v7547_v23, %v1799_v43  ;;  %v1796_v22 = vpop.xlane.xlu0 %1795 }
 0x4a5   : > { %v1890_v54 = vsub.f32 %v7549_v27, %v1796_v22 }
 0x4a6   : > { %v1924_v20 = vmul.f32 1.442695, %v1891_v51 }
 0x4a7   : > { %v1922_v28 = vmul.f32 1.442695, %v1890_v54  ;;  %v1805_v32 = vpop.xlane.xlu1 %1804 }
 0x4a8   : > { %6473 = vpow2.f32 %v1924_v20  ;;  %v1893_v36 = vsub.f32 %v7555_v34, %v1805_v32  ;;  %v1802_v40 = vpop.xlane.xlu0 %1801 }
 0x4a9   : > { %6475 = vpow2.f32 %v1922_v28  ;;  %v1892_v46 = vsub.f32 %v7557_v38, %v1802_v40 }
 0x4aa   : > { %v1928_v59 = vmul.f32 1.442695, %v1893_v36 }
 0x4ab   : > { %v1926_v52 = vmul.f32 1.442695, %v1892_v46  ;;  %v1811_v47 = vpop.xlane.xlu1 %1810 }
 0x4ac   : > { %6477 = vpow2.f32 %v1928_v59  ;;  %v1895_v50 = vsub.f32 %v7563_v48, %v1811_v47  ;;  %v1808_v23 = vpop.xlane.xlu0 %1807 }
 0x4ad   : > { %6479 = vpow2.f32 %v1926_v52  ;;  %v1894_v27 = vsub.f32 %v7565_v61, %v1808_v23 }
 0x4ae   : > { %v1932_v7 = vmul.f32 1.442695, %v1895_v50 }
 0x4af   : > { %v1930_v11 = vmul.f32 1.442695, %v1894_v27  ;;  %v1817_v13 = vpop.xlane.xlu1 %1816 }
 0x4b0   : > { %6481 = vpow2.f32 %v1932_v7  ;;  %v1897_v34 = vsub.f32 %v7571_v1, %v1817_v13  ;;  %v1814_v17 = vpop.xlane.xlu0 %1813 }
 0x4b1   : > { %6483 = vpow2.f32 %v1930_v11  ;;  %v1896_v38 = vsub.f32 %v7573_v6, %v1814_v17 }
 0x4b2   : > { %v7683_v2 = vpop.eup %6473  ;;  %v1936_v21 = vmul.f32 1.442695, %v1897_v34 }
 0x4b3   : > { %v7685_v3 = vpop.eup %6475  ;;  %v1934_v48 = vmul.f32 1.442695, %v1896_v38  ;;  %v1823_v8 = vpop.xlane.xlu1 %1822  ;;  %v1989_v61 = vsel %vm680_vm0, %v7683_v2, 0.0 }
 0x4b4   : > { %6485 = vpow2.f32 %v1936_v21  ;;  %v1899_v31 = vsub.f32 %v7579_v57, %v1823_v8  ;;  %v1820_v10 = vpop.xlane.xlu0 %1819  ;;  %1990 = vadd.xlane.f32.xlu1 %v1989_v61  ;;  %v1986_v1 = vsel %vm680_vm0, %v7685_v3, 0.0 }
 0x4b5   : > { %6487 = vpow2.f32 %v1934_v48  ;;  %v1898_v6 = vsub.f32 %v7581_v55, %v1820_v10  ;;  %1987 = vadd.xlane.f32.xlu0 %v1986_v1 }
 0x4b6   : > { %v7693_v33 = vpop.eup %6477  ;;  %v1940_v37 = vmul.f32 1.442695, %v1899_v31 }
 0x4b7   : > { %v7695_v12 = vpop.eup %6479  ;;  %v1938_v18 = vmul.f32 1.442695, %v1898_v6  ;;  %v1829_v43 = vpop.xlane.xlu1 %1828  ;;  %v1995_v51 = vsel %vm680_vm0, %v7693_v33, 0.0 }
 0x4b8   : > { %6489 = vpow2.f32 %v1940_v37  ;;  %v1901_v57 = vsub.f32 %v7587_v19, %v1829_v43  ;;  %v1826_v22 = vpop.xlane.xlu0 %1825  ;;  %1996 = vadd.xlane.f32.xlu1 %v1995_v51  ;;  %v1992_v54 = vsel %vm680_vm0, %v7695_v12, 0.0 }
 0x4b9   : > { %6491 = vpow2.f32 %v1938_v18  ;;  %v1900_v55 = vsub.f32 %v7589_v63, %v1826_v22  ;;  %1993 = vadd.xlane.f32.xlu0 %v1992_v54 }
 0x4ba   : > { %v7703_v20 = vpop.eup %6481  ;;  %v1944_v28 = vmul.f32 1.442695, %v1901_v57 }
 0x4bb   : > { %v7705_v32 = vpop.eup %6483  ;;  %v1942_v36 = vmul.f32 1.442695, %v1900_v55  ;;  %v1835_v40 = vpop.xlane.xlu1 %1834  ;;  %v2001_v46 = vsel %vm680_vm0, %v7703_v20, 0.0 }
 0x4bc   : > { %6493 = vpow2.f32 %v1944_v28  ;;  %v1903_v19 = vsub.f32 %v7595_v0, %v1835_v40  ;;  %v1832_v59 = vpop.xlane.xlu0 %1831  ;;  %2002 = vadd.xlane.f32.xlu1 %v2001_v46  ;;  %v1998_v52 = vsel %vm680_vm0, %v7705_v32, 0.0 }
 0x4bd   : > { %6495 = vpow2.f32 %v1942_v36  ;;  %v1902_v63 = vsub.f32 %v7597_v26, %v1832_v59  ;;  %1999 = vadd.xlane.f32.xlu0 %v1998_v52  ;;  %v4929_v52 = vld [vmem:[%s8717_s2 + $0x40] sm:$0xff] }
 0x4be   : > { %v7713_v47 = vpop.eup %6485  ;;  %v1948_v50 = vmul.f32 1.442695, %v1903_v19 }
 0x4bf   : > { %v7715_v23 = vpop.eup %6487  ;;  %v1946_v27 = vmul.f32 1.442695, %v1902_v63  ;;  %v1841_v7 = vpop.xlane.xlu1 %1840  ;;  %v2007_v11 = vsel %vm680_vm0, %v7713_v47, 0.0  ;;  %v4930_v63 = vld [vmem:[%s8717_s2 + $0x48] sm:$0xff] }
 0x4c0   : > { %6497 = vpow2.f32 %v1948_v50  ;;  %v1905_v0 = vsub.f32 %v7603_v5, %v1841_v7  ;;  %v1838_v13 = vpop.xlane.xlu0 %1837  ;;  %2008 = vadd.xlane.f32.xlu1 %v2007_v11  ;;  %v2004_v34 = vsel %vm680_vm0, %v7715_v23, 0.0 }
 0x4c1   : > { %6499 = vpow2.f32 %v1946_v27  ;;  %v1904_v26 = vsub.f32 %v7605_v30, %v1838_v13  ;;  %2005 = vadd.xlane.f32.xlu0 %v2004_v34  ;;  %v7761_v27 = vpack.c.bf16 %v4930_v63, %v4929_v52 }
 0x4c2   : > { %v7723_v17 = vpop.eup %6489  ;;  %v1952_v38 = vmul.f32 1.442695, %v1905_v0 }
 0x4c3   : > { %v7725_v21 = vpop.eup %6491  ;;  %v1950_v48 = vmul.f32 1.442695, %v1904_v26  ;;  %v1847_v8 = vpop.xlane.xlu1 %1846  ;;  %v2013_v61 = vsel %vm680_vm0, %v7723_v17, 0.0  ;;  %6314 = vmatprep.subr.bf16.mxu1 %v7761_v27 }
 0x4c4   : > { %6501 = vpow2.f32 %v1952_v38  ;;  %v1907_v5 = vsub.f32 %v7611_v39, %v1847_v8  ;;  %v1844_v31 = vpop.xlane.xlu0 %1843  ;;  %2014 = vadd.xlane.f32.xlu1 %v2013_v61  ;;  %v2010_v10 = vsel %vm680_vm0, %v7725_v21, 0.0 }
 0x4c5   : > { %6503 = vpow2.f32 %v1950_v48  ;;  %v1906_v30 = vsub.f32 %v7613_v14, %v1844_v31  ;;  %2011 = vadd.xlane.f32.xlu0 %v2010_v10 }
 0x4c6   : > { %v7733_v1 = vpop.eup %6493  ;;  %v1956_v6 = vmul.f32 1.442695, %v1907_v5 }
 0x4c7   : > { %v7735_v37 = vpop.eup %6495  ;;  %v1954_v18 = vmul.f32 1.442695, %v1906_v30  ;;  %v1853_v43 = vpop.xlane.xlu1 %1852  ;;  %v2019_v51 = vsel %vm680_vm0, %v7733_v1, 0.0 }
 0x4c8   : > { %6505 = vpow2.f32 %v1956_v6  ;;  %v1909_v39 = vsub.f32 %v7619_v49, %v1853_v43  ;;  %v1850_v57 = vpop.xlane.xlu0 %1849  ;;  %2020 = vadd.xlane.f32.xlu1 %v2019_v51  ;;  %v2016_v22 = vsel %vm680_vm0, %v7735_v37, 0.0 }
 0x4c9   : > { %6507 = vpow2.f32 %v1954_v18  ;;  %v1908_v14 = vsub.f32 %v7621_v53, %v1850_v57  ;;  %2017 = vadd.xlane.f32.xlu0 %v2016_v22 }
 0x4ca   : > { %v7743_v54 = vpop.eup %6497  ;;  %v1960_v55 = vmul.f32 1.442695, %v1909_v39 }
 0x4cb   : > { %v7745_v28 = vpop.eup %6499  ;;  %v1958_v36 = vmul.f32 1.442695, %v1908_v14  ;;  %v1859_v40 = vpop.xlane.xlu1 %1858  ;;  %v2025_v46 = vsel %vm680_vm0, %v7743_v54, 0.0 }
 0x4cc   : > { %6509 = vpow2.f32 %v1960_v55  ;;  %v1911_v49 = vsub.f32 %v7627_v25, %v1859_v40  ;;  %v1856_v19 = vpop.xlane.xlu0 %1855  ;;  %2026 = vadd.xlane.f32.xlu1 %v2025_v46  ;;  %v2022_v59 = vsel %vm680_vm0, %v7745_v28, 0.0 }
 0x4cd   : > { %6511 = vpow2.f32 %v1958_v36  ;;  %v1910_v53 = vsub.f32 %v7629_v29, %v1856_v19  ;;  %2023 = vadd.xlane.f32.xlu0 %v2022_v59 }
 0x4ce   : > { %v7759_v50 = vpop.eup %6501  ;;  %v1964_v25 = vmul.f32 1.442695, %v1911_v49 }
 0x4cf   : > { %v7763_v7 = vpop.eup %6503  ;;  %v1962_v11 = vmul.f32 1.442695, %v1910_v53  ;;  %v1865_v0 = vpop.xlane.xlu1 %1864  ;;  %v2031_v29 = vsel %vm680_vm0, %v7759_v50, 0.0 }
 0x4d0   : > { %6513 = vpow2.f32 %v1964_v25  ;;  %v1913_v13 = vsub.f32 %v7635_v42, %v1865_v0  ;;  %v1862_v34 = vpop.xlane.xlu0 %1861  ;;  %2032 = vadd.xlane.f32.xlu1 %v2031_v29  ;;  %v2028_v26 = vsel %vm680_vm0, %v7763_v7, 0.0 }
 0x4d1   : > { %6515 = vpow2.f32 %v1962_v11  ;;  %v1912_v38 = vsub.f32 %v7637_v45, %v1862_v34  ;;  %2029 = vadd.xlane.f32.xlu0 %v2028_v26 }
 0x4d2   : > { %v7772_v48 = vpop.eup %6505  ;;  %v1968_v8 = vmul.f32 1.442695, %v1913_v13 }
 0x4d3   : > { %v7774_v61 = vpop.eup %6507  ;;  %v1966_v5 = vmul.f32 1.442695, %v1912_v38  ;;  %v1871_v31 = vpop.xlane.xlu1 %1870  ;;  %v2037_v42 = vsel %vm680_vm0, %v7772_v48, 0.0 }
 0x4d4   : > { %6517 = vpow2.f32 %v1968_v8  ;;  %v1915_v10 = vsub.f32 %v7643_v4, %v1871_v31  ;;  %v1868_v30 = vpop.xlane.xlu0 %1867  ;;  %2038 = vadd.xlane.f32.xlu1 %v2037_v42  ;;  %v2034_v6 = vsel %vm680_vm0, %v7774_v61, 0.0 }
 0x4d5   : > { %6519 = vpow2.f32 %v1966_v5  ;;  %v1914_v45 = vsub.f32 %v7645_v58, %v1868_v30  ;;  %2035 = vadd.xlane.f32.xlu0 %v2034_v6 }
 0x4d6   : > { %v7782_v18 = vpop.eup %6509  ;;  %v1972_v43 = vmul.f32 1.442695, %v1915_v10 }
 0x4d7   : > { %v7784_v51 = vpop.eup %6511  ;;  %v1970_v39 = vmul.f32 1.442695, %v1914_v45  ;;  %v1877_v57 = vpop.xlane.xlu1 %1876  ;;  %v2043_v22 = vsel %vm680_vm0, %v7782_v18, 0.0 }
 0x4d8   : > { %6521 = vpow2.f32 %v1972_v43  ;;  %v1917_v4 = vsub.f32 %v7651_v15, %v1877_v57  ;;  %v1874_v14 = vpop.xlane.xlu0 %1873  ;;  %2044 = vadd.xlane.f32.xlu1 %v2043_v22  ;;  %v2040_v55 = vsel %vm680_vm0, %v7784_v51, 0.0 }
 0x4d9   : > { %6523 = vpow2.f32 %v1970_v39  ;;  %v1916_v58 = vsub.f32 %v7653_v60, %v1874_v14  ;;  %2041 = vadd.xlane.f32.xlu0 %v2040_v55 }
 0x4da   : > { %v7792_v36 = vpop.eup %6513  ;;  %v1976_v40 = vmul.f32 1.442695, %v1917_v4 }
 0x4db   : > { %v7794_v46 = vpop.eup %6515  ;;  %v1974_v49 = vmul.f32 1.442695, %v1916_v58  ;;  %v1883_v19 = vpop.xlane.xlu1 %1882  ;;  %v2049_v59 = vsel %vm680_vm0, %v7792_v36, 0.0 }
 0x4dc   : > { %6525 = vpow2.f32 %v1976_v40  ;;  %v1919_v15 = vsub.f32 %v7659_v24, %v1883_v19  ;;  %v1880_v53 = vpop.xlane.xlu0 %1879  ;;  %2050 = vadd.xlane.f32.xlu1 %v2049_v59  ;;  %v2046_v52 = vsel %vm680_vm0, %v7794_v46, 0.0 }
 0x4dd   : > { %6527 = vpow2.f32 %v1974_v49  ;;  %v1918_v60 = vsub.f32 %v7661_v16, %v1880_v53  ;;  %2047 = vadd.xlane.f32.xlu0 %v2046_v52  ;;  %v4931_v52 = vld [vmem:[%s8717_s2 + $0x50] sm:$0xff] }
 0x4de   : > { %v7802_v63 = vpop.eup %6517  ;;  %v1980_v25 = vmul.f32 1.442695, %v1919_v15 }
 0x4df   : > { %v7804_v11 = vpop.eup %6519  ;;  %v1978_v0 = vmul.f32 1.442695, %v1918_v60  ;;  %v1889_v29 = vpop.xlane.xlu1 %1888  ;;  %v2055_v13 = vsel %vm680_vm0, %v7802_v63, 0.0  ;;  %v4932_v60 = vld [vmem:[%s8717_s2 + $0x58] sm:$0xff] }
 0x4e0   : > { %6529 = vpow2.f32 %v1980_v25  ;;  %v1921_v24 = vsub.f32 %v7667_v35, %v1889_v29  ;;  %2056 = vadd.xlane.f32.xlu1 %v2055_v13  ;;  %v1886_v34 = vpop.xlane.xlu0 %1885  ;;  %v2052_v26 = vsel %vm680_vm0, %v7804_v11, 0.0 }
 0x4e1   : > { %6531 = vpow2.f32 %v1978_v0  ;;  %v1920_v16 = vsub.f32 %v7669_v41, %v1886_v34  ;;  %2053 = vadd.xlane.f32.xlu0 %v2052_v26  ;;  %v6317_v34 = vpack.c.bf16 %v4932_v60, %v4931_v52 }
 0x4e2   : > { %v7812_v38 = vpop.eup %6521  ;;  %v1984_v8 = vmul.f32 1.442695, %v1921_v24 }
 0x4e3   : > { %v7814_v5 = vpop.eup %6523  ;;  %v1982_v31 = vmul.f32 1.442695, %v1920_v16  ;;  %v2061_v42 = vsel %vm680_vm0, %v7812_v38, 0.0  ;;  %v4933_v16 = vld [vmem:[%s8717_s2 + $0x60] sm:$0xff] }
 0x4e4   : > { %6533 = vpow2.f32 %v1984_v8  ;;  %2062 = vadd.xlane.f32.xlu1 %v2061_v42  ;;  %v2058_v35 = vsel %vm680_vm0, %v7814_v5, 0.0  ;;  %v4934_v8 = vld [vmem:[%s8717_s2 + $0x68] sm:$0xff] }
 0x4e5   : > { %6535 = vpow2.f32 %v1982_v31  ;;  %2059 = vadd.xlane.f32.xlu0 %v2058_v35 }
 0x4e6   : > { %v7820_v10 = vpop.eup %6525 }
 0x4e7   : > { %v7822_v41 = vpop.eup %6527  ;;  %v2067_v30 = vsel %vm680_vm0, %v7820_v10, 0.0 }
 0x4e8   : > { %2068 = vadd.xlane.f32.xlu1 %v2067_v30  ;;  %v2064_v6 = vsel %vm680_vm0, %v7822_v41, 0.0  ;;  %v6321_v30 = vpack.c.bf16 %v4934_v8, %v4933_v16 }
 0x4e9   : > { %2065 = vadd.xlane.f32.xlu0 %v2064_v6 }
 0x4ea   : > { %v7828_v45 = vpop.eup %6529 }
 0x4eb   : > { %v7830_v43 = vpop.eup %6531  ;;  %v2073_v39 = vsel %vm680_vm0, %v7828_v45, 0.0 }
 0x4ec   : > { %2074 = vadd.xlane.f32.xlu1 %v2073_v39  ;;  %v2070_v57 = vsel %vm680_vm0, %v7830_v43, 0.0  ;;  %v4935_v39 = vld [vmem:[%s8717_s2 + $0x70] sm:$0xff] }
 0x4ed   : > { %2071 = vadd.xlane.f32.xlu0 %v2070_v57  ;;  %v4936_v57 = vld [vmem:[%s8717_s2 + $0x78] sm:$0xff] }
 0x4ee   : > { %v7836_v22 = vpop.eup %6533 }
 0x4ef   : > { %v7838_v4 = vpop.eup %6535  ;;  %v2079_v14 = vsel %vm680_vm0, %v7836_v22, 0.0 }
 0x4f0   : > { %2080 = vadd.xlane.f32.xlu1 %v2079_v14  ;;  %v2076_v55 = vsel %vm680_vm0, %v7838_v4, 0.0 }
 0x4f1   : > { %2077 = vadd.xlane.f32.xlu0 %v2076_v55 }
 0x541   : > { %v1991_v58 = vpop.xlane.xlu1 %1990 }
 0x542   : > { %6537 = vrcp.f32 %v1991_v58  ;;  %v1988_v40 = vpop.xlane.xlu0 %1987  ;;  %v6325_v58 = vpack.c.bf16 %v4936_v57, %v4935_v39 }
 0x543   : > { %6539 = vrcp.f32 %v1988_v40 }
 0x545   : > { %v1997_v49 = vpop.xlane.xlu1 %1996 }
 0x546   : > { %6541 = vrcp.f32 %v1997_v49  ;;  %v1994_v19 = vpop.xlane.xlu0 %1993 }
 0x547   : > { %6543 = vrcp.f32 %v1994_v19 }
 0x549   : > { %v2003_v59 = vpop.xlane.xlu1 %2002 }
 0x54a   : > { %6545 = vrcp.f32 %v2003_v59  ;;  %v2000_v15 = vpop.xlane.xlu0 %1999 }
 0x54b   : > { %6547 = vrcp.f32 %v2000_v15 }
 0x54c   : > { %v6538_v53 = vpop.eup %6537 }
 0x54d   : > { %v6540_v25 = vpop.eup %6539  ;;  %v2009_v0 = vpop.xlane.xlu1 %2008  ;;  %v2115_v24 = vmul.f32 %v6538_v53, %v7683_v2 }
 0x54e   : > { %6549 = vrcp.f32 %v2009_v0  ;;  %v2006_v29 = vpop.xlane.xlu0 %2005  ;;  %v2114_v13 = vmul.f32 %v6540_v25, %v7685_v3 }
 0x54f   : > { %6551 = vrcp.f32 %v2006_v29 }
 0x550   : > { %v6542_v26 = vpop.eup %6541  ;;  %5785 = vmatprep.mubr.msk.f32.mxu1 %vm680_vm0, %v2114_v13 }
 0x551   : > { %v6544_v31 = vpop.eup %6543  ;;  %v2015_v42 = vpop.xlane.xlu1 %2014  ;;  %5786 = vmatmul.mubr.msk.f32.vlgmr.msra.gmra.mrb[64].mxu1 %vm680_vm0, %v2115_v24  ;;  %v2117_v35 = vmul.f32 %v6542_v26, %v7693_v33 }
 0x552   : > { %6553 = vrcp.f32 %v2015_v42  ;;  %6316 = vmatpush3.bf16.msra.mxu1 %v7761_v27  ;;  %v2012_v2 = vpop.xlane.xlu0 %2011  ;;  %v2116_v3 = vmul.f32 %v6544_v31, %v7695_v12 }
 0x553   : > { %6555 = vrcp.f32 %v2012_v2  ;;  %6318 = vmatprep.subr.bf16.mxu1 %v6317_v34 }
 0x554   : > { %v6546_v6 = vpop.eup %6545  ;;  %5788 = vmatprep.mubr.msk.f32.mxu1 %vm680_vm0, %v2116_v3 }
 0x555   : > { %v6548_v27 = vpop.eup %6547  ;;  %v2021_v14 = vpop.xlane.xlu1 %2020  ;;  %5789 = vmatmul.mubr.msk.f32.gmra.mrb[66].mxu1 %vm680_vm0, %v2117_v35  ;;  %v2119_v55 = vmul.f32 %v6546_v6, %v7703_v20 }
 0x556   : > { %6557 = vrcp.f32 %v2021_v14  ;;  %6320 = vmatpush3.bf16.msra.mxu1 %v6317_v34  ;;  %v2018_v12 = vpop.xlane.xlu0 %2017  ;;  %v2118_v33 = vmul.f32 %v6548_v27, %v7705_v32 }
 0x557   : > { %6559 = vrcp.f32 %v2018_v12  ;;  %6322 = vmatprep.subr.bf16.mxu1 %v6321_v30 }
 0x558   : > { %v6550_v40 = vpop.eup %6549  ;;  %5791 = vmatprep.mubr.msk.f32.mxu1 %vm680_vm0, %v2118_v33 }
 0x559   : > { %v6552_v49 = vpop.eup %6551  ;;  %v2027_v19 = vpop.xlane.xlu1 %2026  ;;  %5792 = vmatmul.mubr.msk.f32.gmra.mrb[68].mxu1 %vm680_vm0, %v2119_v55  ;;  %v2121_v32 = vmul.f32 %v6550_v40, %v7713_v47 }
 0x55a   : > { %6561 = vrcp.f32 %v2027_v19  ;;  %6324 = vmatpush3.bf16.msra.mxu1 %v6321_v30  ;;  %v2024_v59 = vpop.xlane.xlu0 %2023  ;;  %v2120_v15 = vmul.f32 %v6552_v49, %v7715_v23 }
 0x55b   : > { %6563 = vrcp.f32 %v2024_v59  ;;  %6326 = vmatprep.subr.bf16.mxu1 %v6325_v58 }
 0x55c   : > { %v6554_v53 = vpop.eup %6553  ;;  %5794 = vmatprep.mubr.msk.f32.mxu1 %vm680_vm0, %v2120_v15 }
 0x55d   : > { %v6556_v20 = vpop.eup %6555  ;;  %v2033_v52 = vpop.xlane.xlu1 %2032  ;;  %5795 = vmatmul.mubr.msk.f32.gmra.mrb[70].mxu1 %vm680_vm0, %v2121_v32  ;;  %v2123_v23 = vmul.f32 %v6554_v53, %v7723_v17 }
 0x55e   : > { %6565 = vrcp.f32 %v2033_v52  ;;  %6328 = vmatpush3.bf16.msra.mxu1 %v6325_v58  ;;  %v2030_v60 = vpop.xlane.xlu0 %2029  ;;  %v2122_v25 = vmul.f32 %v6556_v20, %v7725_v21 }
 0x55f   : > { %6386 = vmatprep.subr.bf16.mxu1 %v7499_v9  ;;  %6567 = vrcp.f32 %v2030_v60 }
 0x560   : > { %v6558_v0 = vpop.eup %6557  ;;  %5797 = vmatprep.mubr.msk.f32.mxu1 %vm680_vm0, %v2122_v25 }
 0x561   : > { %v6560_v47 = vpop.eup %6559  ;;  %v2039_v29 = vpop.xlane.xlu1 %2038  ;;  %5798 = vmatmul.mubr.msk.f32.gmra.mrb[72].mxu1 %vm680_vm0, %v2123_v23  ;;  %v2125_v34 = vmul.f32 %v6558_v0, %v7733_v1 }
 0x562   : > { %6569 = vrcp.f32 %v2039_v29  ;;  %v2036_v13 = vpop.xlane.xlu0 %2035  ;;  %v2124_v24 = vmul.f32 %v6560_v47, %v7735_v37 }
 0x563   : > { %6571 = vrcp.f32 %v2036_v13 }
 0x564   : > { %v6562_v21 = vpop.eup %6561  ;;  %5800 = vmatprep.mubr.msk.f32.mxu1 %vm680_vm0, %v2124_v24  ;;  %v6731_v24 = vld [vmem:[%s7083_s21 + $0x10] sm:$0xff] }
 0x565   : > { %v6564_v26 = vpop.eup %6563  ;;  %v2045_v16 = vpop.xlane.xlu1 %2044  ;;  %5801 = vmatmul.mubr.msk.f32.gmra.mrb[74].mxu1 %vm680_vm0, %v2125_v34  ;;  %v2127_v31 = vmul.f32 %v6562_v21, %v7743_v54  ;;  %v6735_v34 = vld [vmem:[%s7083_s21 + $0x30] sm:$0xff]  ;;  %v6737_v21 = vld [vmem:[%s7083_s21 + $0x40] sm:$0xff] }
 0x566   : > { %6573 = vrcp.f32 %v2045_v16  ;;  %v2042_v17 = vpop.xlane.xlu0 %2041  ;;  %v2126_v8 = vmul.f32 %v6564_v26, %v7745_v28  ;;  %v6738_v26 = vld [vmem:[%s7083_s21 + $0x48] sm:$0xff]  ;;  %v6740_v16 = vld [vmem:[%s7083_s21 + $0x58] sm:$0xff] }
 0x567   : > { %6575 = vrcp.f32 %v2042_v17  ;;  %v6741_v17 = vld [vmem:[%s7083_s21 + $0x60] sm:$0xff] }
 0x568   : > { %v6566_v42 = vpop.eup %6565  ;;  %5803 = vmatprep.mubr.msk.f32.mxu1 %vm680_vm0, %v2126_v8  ;;  %v6743_v8 = vld [vmem:[%s7083_s21 + $0x70] sm:$0xff] }
 0x569   : > { %v6568_v37 = vpop.eup %6567  ;;  %v2051_v2 = vpop.xlane.xlu1 %2050  ;;  %5804 = vmatmul.mubr.msk.f32.gmra.mrb[76].mxu1 %vm680_vm0, %v2127_v31  ;;  %v2129_v35 = vmul.f32 %v6566_v42, %v7759_v50  ;;  %v6744_v31 = vld [vmem:[%s7083_s21 + $0x78] sm:$0xff]  ;;  %v6745_v42 = vld [vmem:[%s7083_s21 + $0x80] sm:$0xff] }
 0x56a   : > { %6577 = vrcp.f32 %v2051_v2  ;;  %v2048_v1 = vpop.xlane.xlu0 %2047  ;;  %v2128_v3 = vmul.f32 %v6568_v37, %v7763_v7  ;;  %v6746_v37 = vld [vmem:[%s7083_s21 + $0x88] sm:$0xff]  ;;  %v6747_v2 = vld [vmem:[%s7083_s21 + $0x90] sm:$0xff] }
 0x56b   : > { %6579 = vrcp.f32 %v2048_v1  ;;  %v6748_v1 = vld [vmem:[%s7083_s21 + $0x98] sm:$0xff] }
 0x56c   : > { %v6570_v30 = vpop.eup %6569  ;;  %5806 = vmatprep.mubr.msk.f32.mxu1 %vm680_vm0, %v2128_v3  ;;  %v6749_v3 = vld [vmem:[%s7083_s21 + $0xa0] sm:$0xff] }
 0x56d   : > { %v6572_v28 = vpop.eup %6571  ;;  %v2057_v6 = vpop.xlane.xlu1 %2056  ;;  %5807 = vmatmul.mubr.msk.f32.gmra.mrb[78].mxu1 %vm680_vm0, %v2129_v35  ;;  %v2131_v57 = vmul.f32 %v6570_v30, %v7772_v48  ;;  %v6750_v35 = vld [vmem:[%s7083_s21 + $0xa8] sm:$0xff]  ;;  %v6751_v30 = vld [vmem:[%s7083_s21 + $0xb0] sm:$0xff] }
 0x56e   : > { %6581 = vrcp.f32 %v2057_v6  ;;  %v2054_v54 = vpop.xlane.xlu0 %2053  ;;  %v2130_v39 = vmul.f32 %v6572_v28, %v7774_v61  ;;  %v6752_v28 = vld [vmem:[%s7083_s21 + $0xb8] sm:$0xff]  ;;  %v6753_v6 = vld [vmem:[%s7083_s21 + $0xc0] sm:$0xff] }
 0x56f   : > { %6583 = vrcp.f32 %v2054_v54  ;;  %v6754_v54 = vld [vmem:[%s7083_s21 + $0xc8] sm:$0xff] }
 0x570   : > { %v6574_v27 = vpop.eup %6573  ;;  %5809 = vmatprep.mubr.msk.f32.mxu1 %vm680_vm0, %v2130_v39  ;;  %v6755_v39 = vld [vmem:[%s7083_s21 + $0xd0] sm:$0xff] }
 0x571   : > { %v6576_v7 = vpop.eup %6575  ;;  %v2063_v14 = vpop.xlane.xlu1 %2062  ;;  %5810 = vmatmul.mubr.msk.f32.gmra.mrb[80].mxu1 %vm680_vm0, %v2131_v57  ;;  %v2133_v33 = vmul.f32 %v6574_v27, %v7782_v18  ;;  %v6756_v57 = vld [vmem:[%s7083_s21 + $0xd8] sm:$0xff]  ;;  %v6757_v27 = vld [vmem:[%s7083_s21 + $0xe0] sm:$0xff] }
 0x572   : > { %6585 = vrcp.f32 %v2063_v14  ;;  %v2060_v50 = vpop.xlane.xlu0 %2059  ;;  %v2132_v12 = vmul.f32 %v6576_v7, %v7784_v51  ;;  %v6758_v7 = vld [vmem:[%s7083_s21 + $0xe8] sm:$0xff]  ;;  %v6759_v14 = vld [vmem:[%s7083_s21 + $0xf0] sm:$0xff] }
 0x573   : > { %6587 = vrcp.f32 %v2060_v50  ;;  %v6760_v50 = vld [vmem:[%s7083_s21 + $0xf8] sm:$0xff] }
 0x574   : > { %v6578_v55 = vpop.eup %6577  ;;  %5812 = vmatprep.mubr.msk.f32.mxu1 %vm680_vm0, %v2132_v12 }
 0x575   : > { %v6580_v61 = vpop.eup %6579  ;;  %v2069_v58 = vpop.xlane.xlu1 %2068  ;;  %5813 = vmatmul.mubr.msk.f32.gmra.mrb[82].mxu1 %vm680_vm0, %v2133_v33  ;;  %v2135_v49 = vmul.f32 %v6578_v55, %v7792_v36 }
 0x576   : > { %6589 = vrcp.f32 %v2069_v58  ;;  %v2066_v48 = vpop.xlane.xlu0 %2065  ;;  %v2134_v40 = vmul.f32 %v6580_v61, %v7794_v46 }
 0x577   : > { %6591 = vrcp.f32 %v2066_v48 }
 0x578   : > { %v6582_v19 = vpop.eup %6581  ;;  %5815 = vmatprep.mubr.msk.f32.mxu1 %vm680_vm0, %v2134_v40 }
 0x579   : > { %v6584_v51 = vpop.eup %6583  ;;  %v2075_v59 = vpop.xlane.xlu1 %2074  ;;  %5816 = vmatmul.mubr.msk.f32.gmra.mrb[84].mxu1 %vm680_vm0, %v2135_v49  ;;  %v2137_v32 = vmul.f32 %v6582_v19, %v7802_v63 }
 0x57a   : > { %6593 = vrcp.f32 %v2075_v59  ;;  %v2072_v18 = vpop.xlane.xlu0 %2071  ;;  %v2136_v15 = vmul.f32 %v6584_v51, %v7804_v11 }
 0x57b   : > { %6595 = vrcp.f32 %v2072_v18 }
 0x57c   : > { %v6586_v53 = vpop.eup %6585  ;;  %5818 = vmatprep.mubr.msk.f32.mxu1 %vm680_vm0, %v2136_v15 }
 0x57d   : > { %v6588_v46 = vpop.eup %6587  ;;  %v2081_v20 = vpop.xlane.xlu1 %2080  ;;  %5819 = vmatmul.mubr.msk.f32.gmra.mrb[86].mxu1 %vm680_vm0, %v2137_v32  ;;  %v2139_v60 = vmul.f32 %v6586_v53, %v7812_v38 }
 0x57e   : > { %6597 = vrcp.f32 %v2081_v20  ;;  %v2078_v36 = vpop.xlane.xlu0 %2077  ;;  %v2138_v52 = vmul.f32 %v6588_v46, %v7814_v5 }
 0x57f   : > { %6599 = vrcp.f32 %v2078_v36 }
 0x580   : > { %v6590_v25 = vpop.eup %6589  ;;  %5821 = vmatprep.mubr.msk.f32.mxu1 %vm680_vm0, %v2138_v52 }
 0x581   : > { %v6592_v11 = vpop.eup %6591  ;;  %5822 = vmatmul.mubr.msk.f32.gmra.mrb[88].mxu1 %vm680_vm0, %v2139_v60  ;;  %v2141_v23 = vmul.f32 %v6590_v25, %v7820_v10 }
 0x582   : > { %v2140_v63 = vmul.f32 %v6592_v11, %v7822_v41 }
 0x584   : > { %v6594_v0 = vpop.eup %6593  ;;  %5824 = vmatprep.mubr.msk.f32.mxu1 %vm680_vm0, %v2140_v63 }
 0x585   : > { %v6596_v47 = vpop.eup %6595  ;;  %5825 = vmatmul.mubr.msk.f32.gmra.mrb[90].mxu1 %vm680_vm0, %v2141_v23  ;;  %v2143_v5 = vmul.f32 %v6594_v0, %v7828_v45  ;;  %v6730_v45 = vld [vmem:[%s7083_s21 + $0x8] sm:$0xff] }
 0x586   : > { %v2142_v38 = vmul.f32 %v6596_v47, %v7830_v43  ;;  %v6729_v43 = vld [vmem:[%s7083_s21] sm:$0xff] }
 0x588   : > { %v6598_v29 = vpop.eup %6597  ;;  %5827 = vmatprep.mubr.msk.f32.mxu1 %vm680_vm0, %v2142_v38 }
 0x589   : > { %v6600_v41 = vpop.eup %6599  ;;  %5828 = vmatmul.mubr.msk.f32.gmra.mrb[92].mxu1 %vm680_vm0, %v2143_v5  ;;  %v2145_v13 = vmul.f32 %v6598_v29, %v7836_v22  ;;  %v6732_v22 = vld [vmem:[%s7083_s21 + $0x18] sm:$0xff] }
 0x58a   : > { %v2144_v10 = vmul.f32 %v6600_v41, %v7838_v4  ;;  %v6733_v4 = vld [vmem:[%s7083_s21 + $0x20] sm:$0xff] }
 0x58c   : > { %5830 = vmatprep.mubr.msk.f32.mxu1 %vm680_vm0, %v2144_v10 }
 0x58d   : > { %5831 = vmatmul.mubr.msk.f32.gmra.mrb[94].mxu1 %vm680_vm0, %v2145_v13 }
 0x58e   : > { %5849 = vmatprep.mubr.msk.f32.mxu1 %vm680_vm0, %v6729_v43  ;;  %v8066_v43 = vld [vmem:[%s8718_s3 + $0x1] ss:$0 sm:$0xff] }
 0x591   : > { %5850 = vmatmul.mubr.msk.f32.vlgmr.msra.gmra.mrb[96].mxu1 %vm680_vm0, %v6730_v45 }
 0x592   : > { %6388 = vmatpush3.bf16.msra.mxu1 %v7499_v9  ;;  %5852 = vmatprep.mubr.msk.f32.mxu1 %vm680_vm0, %v6731_v24  ;;  %v6734_v9 = vld [vmem:[%s7083_s21 + $0x28] sm:$0xff] }
 0x593   : > { %6390 = vmatprep.subr.bf16.mxu1 %v7507_v44 }
 0x595   : > { %5853 = vmatmul.mubr.msk.f32.gmra.mrb[98].mxu1 %vm680_vm0, %v6732_v22 }
 0x596   : > { %6392 = vmatpush3.bf16.msra.mxu1 %v7507_v44  ;;  %5855 = vmatprep.mubr.msk.f32.mxu1 %vm680_vm0, %v6733_v4  ;;  %v6736_v44 = vld [vmem:[%s7083_s21 + $0x38] sm:$0xff] }
 0x597   : > { %6394 = vmatprep.subr.bf16.mxu1 %v7515_v62 }
 0x599   : > { %5856 = vmatmul.mubr.msk.f32.gmra.mrb[100].mxu1 %vm680_vm0, %v6734_v9 }
 0x59a   : > { %6396 = vmatpush3.bf16.msra.mxu1 %v7515_v62  ;;  %5858 = vmatprep.mubr.msk.f32.mxu1 %vm680_vm0, %v6735_v34  ;;  %v6739_v62 = vld [vmem:[%s7083_s21 + $0x50] sm:$0xff] }
 0x59b   : > { %6398 = vmatprep.subr.bf16.mxu1 %v7523_v56 }
 0x59d   : > { %5859 = vmatmul.mubr.msk.f32.gmra.mrb[102].mxu1 %vm680_vm0, %v6736_v44 }
 0x59e   : > { %6400 = vmatpush3.bf16.msra.mxu1 %v7523_v56  ;;  %5861 = vmatprep.mubr.msk.f32.mxu1 %vm680_vm0, %v6737_v21  ;;  %v6742_v56 = vld [vmem:[%s7083_s21 + $0x68] sm:$0xff] }
 0x5a1   : > { %5862 = vmatmul.mubr.msk.f32.gmra.mrb[104].mxu1 %vm680_vm0, %v6738_v26 }
 0x5a2   : > { %5864 = vmatprep.mubr.msk.f32.mxu1 %vm680_vm0, %v6739_v62 }
 0x5a5   : > { %5865 = vmatmul.mubr.msk.f32.gmra.mrb[106].mxu1 %vm680_vm0, %v6740_v16 }
 0x5a6   : > { %5867 = vmatprep.mubr.msk.f32.mxu1 %vm680_vm0, %v6741_v17 }
 0x5a9   : > { %5868 = vmatmul.mubr.msk.f32.gmra.mrb[108].mxu1 %vm680_vm0, %v6742_v56 }
 0x5aa   : > { %5870 = vmatprep.mubr.msk.f32.mxu1 %vm680_vm0, %v6743_v8 }
 0x5ad   : > { %5871 = vmatmul.mubr.msk.f32.gmra.mrb[110].mxu1 %vm680_vm0, %v6744_v31 }
 0x5ae   : > { %5873 = vmatprep.mubr.msk.f32.mxu1 %vm680_vm0, %v6745_v42 }
 0x5b1   : > { %5874 = vmatmul.mubr.msk.f32.gmra.mrb[112].mxu1 %vm680_vm0, %v6746_v37 }
 0x5b2   : > { %5876 = vmatprep.mubr.msk.f32.mxu1 %vm680_vm0, %v6747_v2 }
 0x5b5   : > { %5877 = vmatmul.mubr.msk.f32.gmra.mrb[114].mxu1 %vm680_vm0, %v6748_v1 }
 0x5b6   : > { %5879 = vmatprep.mubr.msk.f32.mxu1 %vm680_vm0, %v6749_v3 }
 0x5b9   : > { %5880 = vmatmul.mubr.msk.f32.gmra.mrb[116].mxu1 %vm680_vm0, %v6750_v35 }
 0x5ba   : > { %5882 = vmatprep.mubr.msk.f32.mxu1 %vm680_vm0, %v6751_v30 }
 0x5bd   : > { %5883 = vmatmul.mubr.msk.f32.gmra.mrb[118].mxu1 %vm680_vm0, %v6752_v28 }
 0x5be   : > { %5885 = vmatprep.mubr.msk.f32.mxu1 %vm680_vm0, %v6753_v6 }
 0x5c1   : > { %5886 = vmatmul.mubr.msk.f32.gmra.mrb[120].mxu1 %vm680_vm0, %v6754_v54 }
 0x5c2   : > { %5888 = vmatprep.mubr.msk.f32.mxu1 %vm680_vm0, %v6755_v39 }
 0x5c5   : > { %5889 = vmatmul.mubr.msk.f32.gmra.mrb[122].mxu1 %vm680_vm0, %v6756_v57 }
 0x5c6   : > { %5891 = vmatprep.mubr.msk.f32.mxu1 %vm680_vm0, %v6757_v27 }
 0x5c9   : > { %5892 = vmatmul.mubr.msk.f32.gmra.mrb[124].mxu1 %vm680_vm0, %v6758_v7 }
 0x5ca   : > { %5894 = vmatprep.mubr.msk.f32.mxu1 %vm680_vm0, %v6759_v14 }
 0x5cd   : > { %5895 = vmatmul.mubr.msk.f32.gmra.mrb[126].mxu1 %vm680_vm0, %v6760_v50 }
 0x624   : > { %v7999_v12 = vpop.f32.mrb[64].mxu1 }
 0x625   : > { %v8001_v33 = vpop.f32.mrb[65].mxu1 }
 0x628   : > { %v8003_v55 = vpop.f32.mrb[66].mxu1 }
 0x629   : > { %v8005_v61 = vpop.f32.mrb[67].mxu1 }
 0x62c   : > { %v8007_v58 = vpop.f32.mrb[68].mxu1 }
 0x62d   : > { %v8009_v48 = vpop.f32.mrb[69].mxu1 }
 0x630   : > { %v8011_v40 = vpop.f32.mrb[70].mxu1 }
 0x631   : > { %v8013_v49 = vpop.f32.mrb[71].mxu1 }
 0x634   : > { %v8015_v19 = vpop.f32.mrb[72].mxu1 }
 0x635   : > { %v8017_v51 = vpop.f32.mrb[73].mxu1 }
 0x638   : > { %v8019_v59 = vpop.f32.mrb[74].mxu1 }
 0x639   : > { %v8021_v18 = vpop.f32.mrb[75].mxu1 }
 0x63c   : > { %v8023_v15 = vpop.f32.mrb[76].mxu1 }
 0x63d   : > { %v8025_v32 = vpop.f32.mrb[77].mxu1 }
 0x640   : > { %v8027_v53 = vpop.f32.mrb[78].mxu1 }
 0x641   : > { %v8029_v46 = vpop.f32.mrb[79].mxu1 }
 0x644   : > { %v8031_v20 = vpop.f32.mrb[80].mxu1 }
 0x645   : > { %v8033_v36 = vpop.f32.mrb[81].mxu1 }
 0x648   : > { %v8035_v52 = vpop.f32.mrb[82].mxu1 }
 0x649   : > { %8732 = vst [vmem:[#allocation2_spill] sm:$0xff] %v8035_v52  ;;  %v8037_v60 = vpop.f32.mrb[83].mxu1 }
 0x64a   : > { %8733 = vst [vmem:[#allocation3_spill] sm:$0xff] %v8037_v60 }
 0x64c   : > { %v8039_v25 = vpop.f32.mrb[84].mxu1 }
 0x64d   : > { %8734 = vst [vmem:[#allocation4_spill] sm:$0xff] %v8039_v25  ;;  %v8041_v11 = vpop.f32.mrb[85].mxu1 }
 0x64e   : > { %8735 = vst [vmem:[#allocation5_spill] sm:$0xff] %v8041_v11 }
 0x650   : > { %v8043_v63 = vpop.f32.mrb[86].mxu1 }
 0x651   : > { %8736 = vst [vmem:[#allocation6_spill] sm:$0xff] %v8043_v63  ;;  %v8045_v23 = vpop.f32.mrb[87].mxu1 }
 0x652   : > { %8737 = vst [vmem:[#allocation7_spill] sm:$0xff] %v8045_v23 }
 0x654   : > { %v8047_v0 = vpop.f32.mrb[88].mxu1 }
 0x655   : > { %8738 = vst [vmem:[#allocation8_spill] sm:$0xff] %v8047_v0  ;;  %v8049_v47 = vpop.f32.mrb[89].mxu1 }
 0x656   : > { %8739 = vst [vmem:[#allocation9_spill] sm:$0xff] %v8049_v47 }
 0x658   : > { %v8051_v38 = vpop.f32.mrb[90].mxu1 }
 0x659   : > { %8740 = vst [vmem:[#allocation10_spill] sm:$0xff] %v8051_v38  ;;  %v8053_v5 = vpop.f32.mrb[91].mxu1 }
 0x65a   : > { %8741 = vst [vmem:[#allocation11_spill] sm:$0xff] %v8053_v5 }
 0x65c   : > { %v8055_v29 = vpop.f32.mrb[92].mxu1 }
 0x65d   : > { %8742 = vst [vmem:[#allocation12_spill] sm:$0xff] %v8055_v29  ;;  %v8057_v41 = vpop.f32.mrb[93].mxu1 }
 0x65e   : > { %8743 = vst [vmem:[#allocation13_spill] sm:$0xff] %v8057_v41 }
 0x660   : > { %v8059_v10 = vpop.f32.mrb[94].mxu1 }
 0x661   : > { %8744 = vst [vmem:[#allocation14_spill] sm:$0xff] %v8059_v10  ;;  %v8061_v13 = vpop.f32.mrb[95].mxu1 }
 0x662   : > { %8745 = vst [vmem:[#allocation15_spill] sm:$0xff] %v8061_v13 }
 0x664   : > { %v5851_v45 = vpop.f32.mrb[96].mxu1 }
 0x665   : > { %v2554_v24 = vpop.f32.mrb[97].mxu1  ;;  %v2560_v4 = vadd.f32 %v5851_v45, %v8066_v43 }
 0x666   : > { %v2555_v22 = vadd.f32 %v8066_v43, %v2554_v24 }
 0x668   : > { %v5854_v9 = vpop.f32.mrb[98].mxu1  ;;  %5969 = vmatprep.mubr.msk.f32.mxu0 %vm1416_vm1, %v2555_v22 }
 0x669   : > { %v2564_v34 = vpop.f32.mrb[99].mxu1  ;;  %5970 = vmatmul.mubr.msk.f32.vlgmr.msra.gmra.mrb[48].mxu0 %vm1416_vm1, %v2560_v4  ;;  %v2570_v21 = vadd.f32 %v5854_v9, %v8066_v43 }
 0x66a   : > { %v2565_v44 = vadd.f32 %v8066_v43, %v2564_v34 }
 0x66c   : > { %v5857_v26 = vpop.f32.mrb[100].mxu1  ;;  %5972 = vmatprep.mubr.msk.f32.mxu0 %vm1416_vm1, %v2565_v44 }
 0x66d   : > { %v2574_v62 = vpop.f32.mrb[101].mxu1  ;;  %5973 = vmatmul.mubr.msk.f32.gmra.mrb[50].mxu0 %vm1416_vm1, %v2570_v21  ;;  %v2580_v17 = vadd.f32 %v5857_v26, %v8066_v43 }
 0x66e   : > { %v2575_v16 = vadd.f32 %v8066_v43, %v2574_v62 }
 0x670   : > { %v5860_v56 = vpop.f32.mrb[102].mxu1  ;;  %5975 = vmatprep.mubr.msk.f32.mxu0 %vm1416_vm1, %v2575_v16 }
 0x671   : > { %v2584_v8 = vpop.f32.mrb[103].mxu1  ;;  %5976 = vmatmul.mubr.msk.f32.gmra.mrb[52].mxu0 %vm1416_vm1, %v2580_v17  ;;  %v2590_v42 = vadd.f32 %v5860_v56, %v8066_v43 }
 0x672   : > { %v2585_v31 = vadd.f32 %v8066_v43, %v2584_v8 }
 0x674   : > { %v5863_v37 = vpop.f32.mrb[104].mxu1  ;;  %5978 = vmatprep.mubr.msk.f32.mxu0 %vm1416_vm1, %v2585_v31 }
 0x675   : > { %v2594_v2 = vpop.f32.mrb[105].mxu1  ;;  %5979 = vmatmul.mubr.msk.f32.gmra.mrb[54].mxu0 %vm1416_vm1, %v2590_v42  ;;  %v2600_v3 = vadd.f32 %v5863_v37, %v8066_v43 }
 0x676   : > { %v2595_v1 = vadd.f32 %v8066_v43, %v2594_v2 }
 0x678   : > { %v5866_v35 = vpop.f32.mrb[106].mxu1  ;;  %5981 = vmatprep.mubr.msk.f32.mxu0 %vm1416_vm1, %v2595_v1 }
 0x679   : > { %v2604_v30 = vpop.f32.mrb[107].mxu1  ;;  %5982 = vmatmul.mubr.msk.f32.gmra.mrb[56].mxu0 %vm1416_vm1, %v2600_v3  ;;  %v2610_v6 = vadd.f32 %v5866_v35, %v8066_v43 }
 0x67a   : > { %v2605_v28 = vadd.f32 %v8066_v43, %v2604_v30 }
 0x67c   : > { %v5869_v54 = vpop.f32.mrb[108].mxu1  ;;  %5984 = vmatprep.mubr.msk.f32.mxu0 %vm1416_vm1, %v2605_v28 }
 0x67d   : > { %v2614_v39 = vpop.f32.mrb[109].mxu1  ;;  %5985 = vmatmul.mubr.msk.f32.gmra.mrb[58].mxu0 %vm1416_vm1, %v2610_v6  ;;  %v2620_v27 = vadd.f32 %v5869_v54, %v8066_v43 }
 0x67e   : > { %v2615_v57 = vadd.f32 %v8066_v43, %v2614_v39 }
 0x680   : > { %v5872_v7 = vpop.f32.mrb[110].mxu1  ;;  %5987 = vmatprep.mubr.msk.f32.mxu0 %vm1416_vm1, %v2615_v57 }
 0x681   : > { %v2624_v14 = vpop.f32.mrb[111].mxu1  ;;  %5988 = vmatmul.mubr.msk.f32.gmra.mrb[60].mxu0 %vm1416_vm1, %v2620_v27  ;;  %v2630_v45 = vadd.f32 %v5872_v7, %v8066_v43 }
 0x682   : > { %v2625_v50 = vadd.f32 %v8066_v43, %v2624_v14 }
 0x684   : > { %v5875_v24 = vpop.f32.mrb[112].mxu1  ;;  %5990 = vmatprep.mubr.msk.f32.mxu0 %vm1416_vm1, %v2625_v50 }
 0x685   : > { %v2634_v22 = vpop.f32.mrb[113].mxu1  ;;  %5991 = vmatmul.mubr.msk.f32.gmra.mrb[62].mxu0 %vm1416_vm1, %v2630_v45  ;;  %v2640_v9 = vadd.f32 %v5875_v24, %v8066_v43 }
 0x686   : > { %v2635_v4 = vadd.f32 %v8066_v43, %v2634_v22 }
 0x688   : > { %v5878_v34 = vpop.f32.mrb[114].mxu1  ;;  %5993 = vmatprep.mubr.msk.f32.mxu0 %vm1416_vm1, %v2635_v4 }
 0x689   : > { %v2644_v44 = vpop.f32.mrb[115].mxu1  ;;  %5994 = vmatmul.mubr.msk.f32.gmra.mrb[64].mxu0 %vm1416_vm1, %v2640_v9  ;;  %v2650_v26 = vadd.f32 %v5878_v34, %v8066_v43 }
 0x68a   : > { %v2645_v21 = vadd.f32 %v8066_v43, %v2644_v44 }
 0x68c   : > { %v5881_v62 = vpop.f32.mrb[116].mxu1  ;;  %5996 = vmatprep.mubr.msk.f32.mxu0 %vm1416_vm1, %v2645_v21 }
 0x68d   : > { %v2654_v16 = vpop.f32.mrb[117].mxu1  ;;  %5997 = vmatmul.mubr.msk.f32.gmra.mrb[66].mxu0 %vm1416_vm1, %v2650_v26  ;;  %v2660_v56 = vadd.f32 %v5881_v62, %v8066_v43 }
 0x68e   : > { %v2655_v17 = vadd.f32 %v8066_v43, %v2654_v16 }
 0x690   : > { %v5884_v8 = vpop.f32.mrb[118].mxu1  ;;  %5999 = vmatprep.mubr.msk.f32.mxu0 %vm1416_vm1, %v2655_v17 }
 0x691   : > { %v2664_v31 = vpop.f32.mrb[119].mxu1  ;;  %6000 = vmatmul.mubr.msk.f32.gmra.mrb[68].mxu0 %vm1416_vm1, %v2660_v56  ;;  %v2670_v37 = vadd.f32 %v5884_v8, %v8066_v43 }
 0x692   : > { %v2665_v42 = vadd.f32 %v8066_v43, %v2664_v31 }
 0x694   : > { %v5887_v2 = vpop.f32.mrb[120].mxu1  ;;  %6002 = vmatprep.mubr.msk.f32.mxu0 %vm1416_vm1, %v2665_v42 }
 0x695   : > { %v2674_v1 = vpop.f32.mrb[121].mxu1  ;;  %6003 = vmatmul.mubr.msk.f32.gmra.mrb[70].mxu0 %vm1416_vm1, %v2670_v37  ;;  %v2680_v35 = vadd.f32 %v5887_v2, %v8066_v43 }
 0x696   : > { %v2675_v3 = vadd.f32 %v8066_v43, %v2674_v1 }
 0x698   : > { %v5890_v30 = vpop.f32.mrb[122].mxu1  ;;  %6005 = vmatprep.mubr.msk.f32.mxu0 %vm1416_vm1, %v2675_v3 }
 0x699   : > { %v2684_v28 = vpop.f32.mrb[123].mxu1  ;;  %6006 = vmatmul.mubr.msk.f32.gmra.mrb[72].mxu0 %vm1416_vm1, %v2680_v35  ;;  %v2690_v54 = vadd.f32 %v5890_v30, %v8066_v43 }
 0x69a   : > { %v2685_v6 = vadd.f32 %v8066_v43, %v2684_v28 }
 0x69c   : > { %v5893_v39 = vpop.f32.mrb[124].mxu1  ;;  %6008 = vmatprep.mubr.msk.f32.mxu0 %vm1416_vm1, %v2685_v6 }
 0x69d   : > { %v2694_v57 = vpop.f32.mrb[125].mxu1  ;;  %6009 = vmatmul.mubr.msk.f32.gmra.mrb[74].mxu0 %vm1416_vm1, %v2690_v54  ;;  %v2700_v7 = vadd.f32 %v5893_v39, %v8066_v43 }
 0x69e   : > { %v2695_v27 = vadd.f32 %v8066_v43, %v2694_v57 }
 0x6a0   : > { %v5896_v14 = vpop.f32.mrb[126].mxu1  ;;  %6011 = vmatprep.mubr.msk.f32.mxu0 %vm1416_vm1, %v2695_v27 }
 0x6a1   : > { %v2704_v50 = vpop.f32.mrb[127].mxu1  ;;  %6012 = vmatmul.mubr.msk.f32.gmra.mrb[76].mxu0 %vm1416_vm1, %v2700_v7  ;;  %v2710_v24 = vadd.f32 %v5896_v14, %v8066_v43 }
 0x6a2   : > { %v2705_v45 = vadd.f32 %v8066_v43, %v2704_v50 }
 0x6a4   : > { %6014 = vmatprep.mubr.msk.f32.mxu0 %vm1416_vm1, %v2705_v45 }
 0x6a5   : > { %6015 = vmatmul.mubr.msk.f32.gmra.mrb[78].mxu0 %vm1416_vm1, %v2710_v24 }
 0x73c   : > { %v5971_v22 = vpop.f32.mrb[48].mxu0 }
 0x73d   : > { %v8132_v4 = vmul.f32 0.17677669, %v5971_v22  ;;  %v3143_v9 = vpop.f32.mrb[49].mxu0 }
 0x73e   : > { %v8134_v34 = vmul.f32 0.17677669, %v3143_v9 }
 0x73f   : > { %v3337_v44 = vsel %vm680_vm0, %v8132_v4, -inf }
 0x740   : > { %3338 = vmax.xlane.f32.xlu1 %v3337_v44  ;;  %v5974_v21 = vpop.f32.mrb[50].mxu0  ;;  %v3334_v26 = vsel %vm680_vm0, %v8134_v34, -inf }
 0x741   : > { %v8140_v62 = vmul.f32 0.17677669, %v5974_v21  ;;  %3335 = vmax.xlane.f32.xlu0 %v3334_v26  ;;  %v3153_v43 = vpop.f32.mrb[51].mxu0 }
 0x742   : > { %v8142_v16 = vmul.f32 0.17677669, %v3153_v43 }
 0x743   : > { %v3343_v17 = vsel %vm680_vm0, %v8140_v62, -inf }
 0x744   : > { %3344 = vmax.xlane.f32.xlu1 %v3343_v17  ;;  %v5977_v56 = vpop.f32.mrb[52].mxu0  ;;  %v3340_v8 = vsel %vm680_vm0, %v8142_v16, -inf }
 0x745   : > { %v8148_v31 = vmul.f32 0.17677669, %v5977_v56  ;;  %3341 = vmax.xlane.f32.xlu0 %v3340_v8  ;;  %v3163_v42 = vpop.f32.mrb[53].mxu0 }
 0x746   : > { %v8150_v37 = vmul.f32 0.17677669, %v3163_v42 }
 0x747   : > { %v3349_v2 = vsel %vm680_vm0, %v8148_v31, -inf }
 0x748   : > { %3350 = vmax.xlane.f32.xlu1 %v3349_v2  ;;  %v5980_v1 = vpop.f32.mrb[54].mxu0  ;;  %v3346_v3 = vsel %vm680_vm0, %v8150_v37, -inf }
 0x749   : > { %v8156_v35 = vmul.f32 0.17677669, %v5980_v1  ;;  %3347 = vmax.xlane.f32.xlu0 %v3346_v3  ;;  %v3173_v30 = vpop.f32.mrb[55].mxu0 }
 0x74a   : > { %v8158_v28 = vmul.f32 0.17677669, %v3173_v30 }
 0x74b   : > { %v3355_v6 = vsel %vm680_vm0, %v8156_v35, -inf }
 0x74c   : > { %3356 = vmax.xlane.f32.xlu1 %v3355_v6  ;;  %v5983_v54 = vpop.f32.mrb[56].mxu0  ;;  %v3352_v39 = vsel %vm680_vm0, %v8158_v28, -inf }
 0x74d   : > { %v8164_v57 = vmul.f32 0.17677669, %v5983_v54  ;;  %3353 = vmax.xlane.f32.xlu0 %v3352_v39  ;;  %v3183_v27 = vpop.f32.mrb[57].mxu0 }
 0x74e   : > { %v8166_v7 = vmul.f32 0.17677669, %v3183_v27 }
 0x74f   : > { %v3361_v14 = vsel %vm680_vm0, %v8164_v57, -inf }
 0x750   : > { %3362 = vmax.xlane.f32.xlu1 %v3361_v14  ;;  %v5986_v50 = vpop.f32.mrb[58].mxu0  ;;  %v3358_v45 = vsel %vm680_vm0, %v8166_v7, -inf }
 0x751   : > { %v8172_v24 = vmul.f32 0.17677669, %v5986_v50  ;;  %3359 = vmax.xlane.f32.xlu0 %v3358_v45  ;;  %v3193_v22 = vpop.f32.mrb[59].mxu0 }
 0x752   : > { %v8174_v9 = vmul.f32 0.17677669, %v3193_v22 }
 0x753   : > { %v3367_v44 = vsel %vm680_vm0, %v8172_v24, -inf }
 0x754   : > { %3368 = vmax.xlane.f32.xlu1 %v3367_v44  ;;  %v5989_v21 = vpop.f32.mrb[60].mxu0  ;;  %v3364_v26 = vsel %vm680_vm0, %v8174_v9, -inf }
 0x755   : > { %v8180_v43 = vmul.f32 0.17677669, %v5989_v21  ;;  %3365 = vmax.xlane.f32.xlu0 %v3364_v26  ;;  %v3203_v17 = vpop.f32.mrb[61].mxu0 }
 0x756   : > { %v8182_v56 = vmul.f32 0.17677669, %v3203_v17 }
 0x757   : > { %v3373_v8 = vsel %vm680_vm0, %v8180_v43, -inf }
 0x758   : > { %3374 = vmax.xlane.f32.xlu1 %v3373_v8  ;;  %v5992_v42 = vpop.f32.mrb[62].mxu0  ;;  %v3370_v2 = vsel %vm680_vm0, %v8182_v56, -inf }
 0x759   : > { %v8188_v1 = vmul.f32 0.17677669, %v5992_v42  ;;  %3371 = vmax.xlane.f32.xlu0 %v3370_v2  ;;  %v3213_v3 = vpop.f32.mrb[63].mxu0 }
 0x75a   : > { %v8190_v30 = vmul.f32 0.17677669, %v3213_v3 }
 0x75b   : > { %v3379_v6 = vsel %vm680_vm0, %v8188_v1, -inf }
 0x75c   : > { %3380 = vmax.xlane.f32.xlu1 %v3379_v6  ;;  %v5995_v54 = vpop.f32.mrb[64].mxu0  ;;  %v3376_v39 = vsel %vm680_vm0, %v8190_v30, -inf }
 0x75d   : > { %v8196_v27 = vmul.f32 0.17677669, %v5995_v54  ;;  %3377 = vmax.xlane.f32.xlu0 %v3376_v39  ;;  %v3223_v14 = vpop.f32.mrb[65].mxu0 }
 0x75e   : > { %v8198_v50 = vmul.f32 0.17677669, %v3223_v14 }
 0x75f   : > { %v3385_v45 = vsel %vm680_vm0, %v8196_v27, -inf }
 0x760   : > { %3386 = vmax.xlane.f32.xlu1 %v3385_v45  ;;  %v5998_v22 = vpop.f32.mrb[66].mxu0  ;;  %v3382_v44 = vsel %vm680_vm0, %v8198_v50, -inf }
 0x761   : > { %v8204_v21 = vmul.f32 0.17677669, %v5998_v22  ;;  %3383 = vmax.xlane.f32.xlu0 %v3382_v44  ;;  %v3233_v26 = vpop.f32.mrb[67].mxu0 }
 0x762   : > { %v8206_v17 = vmul.f32 0.17677669, %v3233_v26 }
 0x763   : > { %v3391_v8 = vsel %vm680_vm0, %v8204_v21, -inf }
 0x764   : > { %3392 = vmax.xlane.f32.xlu1 %v3391_v8  ;;  %v6001_v42 = vpop.f32.mrb[68].mxu0  ;;  %v3388_v2 = vsel %vm680_vm0, %v8206_v17, -inf }
 0x765   : > { %v8212_v3 = vmul.f32 0.17677669, %v6001_v42  ;;  %3389 = vmax.xlane.f32.xlu0 %v3388_v2  ;;  %v3243_v6 = vpop.f32.mrb[69].mxu0 }
 0x766   : > { %v8214_v54 = vmul.f32 0.17677669, %v3243_v6 }
 0x767   : > { %v3397_v39 = vsel %vm680_vm0, %v8212_v3, -inf }
 0x768   : > { %3398 = vmax.xlane.f32.xlu1 %v3397_v39  ;;  %v6004_v14 = vpop.f32.mrb[70].mxu0  ;;  %v3394_v45 = vsel %vm680_vm0, %v8214_v54, -inf }
 0x769   : > { %v8220_v22 = vmul.f32 0.17677669, %v6004_v14  ;;  %3395 = vmax.xlane.f32.xlu0 %v3394_v45  ;;  %v3253_v44 = vpop.f32.mrb[71].mxu0 }
 0x76a   : > { %v8222_v26 = vmul.f32 0.17677669, %v3253_v44 }
 0x76b   : > { %v3403_v8 = vsel %vm680_vm0, %v8220_v22, -inf }
 0x76c   : > { %3404 = vmax.xlane.f32.xlu1 %v3403_v8  ;;  %v6007_v42 = vpop.f32.mrb[72].mxu0  ;;  %v3400_v2 = vsel %vm680_vm0, %v8222_v26, -inf }
 0x76d   : > { %v8228_v6 = vmul.f32 0.17677669, %v6007_v42  ;;  %3401 = vmax.xlane.f32.xlu0 %v3400_v2  ;;  %v3263_v39 = vpop.f32.mrb[73].mxu0 }
 0x76e   : > { %v8230_v10 = vmul.f32 0.17677669, %v3263_v39 }
 0x76f   : > { %v3409_v14 = vsel %vm680_vm0, %v8228_v6, -inf }
 0x770   : > { %3410 = vmax.xlane.f32.xlu1 %v3409_v14  ;;  %v6010_v45 = vpop.f32.mrb[74].mxu0  ;;  %v3406_v44 = vsel %vm680_vm0, %v8230_v10, -inf }
 0x771   : > { %v8236_v13 = vmul.f32 0.17677669, %v6010_v45  ;;  %3407 = vmax.xlane.f32.xlu0 %v3406_v44  ;;  %v3273_v8 = vpop.f32.mrb[75].mxu0 }
 0x772   : > { %v8238_v29 = vmul.f32 0.17677669, %v3273_v8 }
 0x773   : > { %v3415_v42 = vsel %vm680_vm0, %v8236_v13, -inf }
 0x774   : > { %3416 = vmax.xlane.f32.xlu1 %v3415_v42  ;;  %v6013_v2 = vpop.f32.mrb[76].mxu0  ;;  %v3412_v39 = vsel %vm680_vm0, %v8238_v29, -inf }
 0x775   : > { %v8244_v41 = vmul.f32 0.17677669, %v6013_v2  ;;  %3413 = vmax.xlane.f32.xlu0 %v3412_v39  ;;  %v3283_v14 = vpop.f32.mrb[77].mxu0 }
 0x776   : > { %v8246_v38 = vmul.f32 0.17677669, %v3283_v14 }
 0x777   : > { %v3421_v45 = vsel %vm680_vm0, %v8244_v41, -inf }
 0x778   : > { %3422 = vmax.xlane.f32.xlu1 %v3421_v45  ;;  %v6016_v44 = vpop.f32.mrb[78].mxu0  ;;  %v3418_v8 = vsel %vm680_vm0, %v8246_v38, -inf }
 0x779   : > { %v8252_v5 = vmul.f32 0.17677669, %v6016_v44  ;;  %3419 = vmax.xlane.f32.xlu0 %v3418_v8  ;;  %v3293_v42 = vpop.f32.mrb[79].mxu0 }
 0x77a   : > { %v8254_v0 = vmul.f32 0.17677669, %v3293_v42 }
 0x77b   : > { %v3427_v2 = vsel %vm680_vm0, %v8252_v5, -inf }
 0x77c   : > { %3428 = vmax.xlane.f32.xlu1 %v3427_v2  ;;  %v3424_v39 = vsel %vm680_vm0, %v8254_v0, -inf }
 0x77d   : > { %3425 = vmax.xlane.f32.xlu0 %v3424_v39 }
 0x7cd   : > { %v3339_v14 = vpop.xlane.xlu1 %3338 }
 0x7ce   : > { %v3431_v45 = vsub.f32 %v8132_v4, %v3339_v14  ;;  %v3336_v47 = vpop.xlane.xlu0 %3335 }
 0x7cf   : > { %v3430_v63 = vsub.f32 %v8134_v34, %v3336_v47 }
 0x7d0   : > { %v3464_v44 = vmul.f32 1.442695, %v3431_v45 }
 0x7d1   : > { %v3462_v23 = vmul.f32 1.442695, %v3430_v63  ;;  %v3345_v8 = vpop.xlane.xlu1 %3344 }
 0x7d2   : > { %6601 = vpow2.f32 %v3464_v44  ;;  %v3433_v42 = vsub.f32 %v8140_v62, %v3345_v8  ;;  %v3342_v25 = vpop.xlane.xlu0 %3341 }
 0x7d3   : > { %6603 = vpow2.f32 %v3462_v23  ;;  %v3432_v2 = vsub.f32 %v8142_v16, %v3342_v25 }
 0x7d4   : > { %v3468_v11 = vmul.f32 1.442695, %v3433_v42 }
 0x7d5   : > { %v3466_v52 = vmul.f32 1.442695, %v3432_v2  ;;  %v3351_v60 = vpop.xlane.xlu1 %3350 }
 0x7d6   : > { %6605 = vpow2.f32 %v3468_v11  ;;  %v3435_v39 = vsub.f32 %v8148_v31, %v3351_v60  ;;  %v3348_v4 = vpop.xlane.xlu0 %3347 }
 0x7d7   : > { %6607 = vpow2.f32 %v3466_v52  ;;  %v3434_v47 = vsub.f32 %v8150_v37, %v3348_v4 }
 0x7d8   : > { %v3472_v34 = vmul.f32 1.442695, %v3435_v39 }
 0x7d9   : > { %v3470_v63 = vmul.f32 1.442695, %v3434_v47  ;;  %v3357_v14 = vpop.xlane.xlu1 %3356 }
 0x7da   : > { %6609 = vpow2.f32 %v3472_v34  ;;  %v3437_v62 = vsub.f32 %v8156_v35, %v3357_v14  ;;  %v3354_v45 = vpop.xlane.xlu0 %3353 }
 0x7db   : > { %6611 = vpow2.f32 %v3470_v63  ;;  %v3436_v25 = vsub.f32 %v8158_v28, %v3354_v45 }
 0x7dc   : > { %v8268_v23 = vpop.eup %6601  ;;  %v3476_v16 = vmul.f32 1.442695, %v3437_v62 }
 0x7dd   : > { %v8270_v11 = vpop.eup %6603  ;;  %v3474_v60 = vmul.f32 1.442695, %v3436_v25  ;;  %v3363_v31 = vpop.xlane.xlu1 %3362  ;;  %v3529_v52 = vsel %vm680_vm0, %v8268_v23, 0.0 }
 0x7de   : > { %6613 = vpow2.f32 %v3476_v16  ;;  %v3439_v37 = vsub.f32 %v8164_v57, %v3363_v31  ;;  %v3360_v44 = vpop.xlane.xlu0 %3359  ;;  %3530 = vadd.xlane.f32.xlu1 %v3529_v52  ;;  %v3526_v35 = vsel %vm680_vm0, %v8270_v11, 0.0 }
 0x7df   : > { %6615 = vpow2.f32 %v3474_v60  ;;  %v3438_v28 = vsub.f32 %v8166_v7, %v3360_v44  ;;  %3527 = vadd.xlane.f32.xlu0 %v3526_v35 }
 0x7e0   : > { %v8278_v8 = vpop.eup %6605  ;;  %v3480_v42 = vmul.f32 1.442695, %v3439_v37 }
 0x7e1   : > { %v8280_v2 = vpop.eup %6607  ;;  %v3478_v39 = vmul.f32 1.442695, %v3438_v28  ;;  %v3369_v4 = vpop.xlane.xlu1 %3368  ;;  %v3535_v47 = vsel %vm680_vm0, %v8278_v8, 0.0 }
 0x7e2   : > { %6617 = vpow2.f32 %v3480_v42  ;;  %v3441_v57 = vsub.f32 %v8172_v24, %v3369_v4  ;;  %v3366_v34 = vpop.xlane.xlu0 %3365  ;;  %3536 = vadd.xlane.f32.xlu1 %v3535_v47  ;;  %v3532_v63 = vsel %vm680_vm0, %v8280_v2, 0.0 }
 0x7e3   : > { %6619 = vpow2.f32 %v3478_v39  ;;  %v3440_v7 = vsub.f32 %v8174_v9, %v3366_v34  ;;  %3533 = vadd.xlane.f32.xlu0 %v3532_v63 }
 0x7e4   : > { %v8288_v14 = vpop.eup %6609  ;;  %v3484_v62 = vmul.f32 1.442695, %v3441_v57 }
 0x7e5   : > { %v8290_v45 = vpop.eup %6611  ;;  %v3482_v25 = vmul.f32 1.442695, %v3440_v7  ;;  %v3375_v16 = vpop.xlane.xlu1 %3374  ;;  %v3541_v60 = vsel %vm680_vm0, %v8288_v14, 0.0 }
 0x7e6   : > { %6621 = vpow2.f32 %v3484_v62  ;;  %v3443_v24 = vsub.f32 %v8180_v43, %v3375_v16  ;;  %v3372_v31 = vpop.xlane.xlu0 %3371  ;;  %3542 = vadd.xlane.f32.xlu1 %v3541_v60  ;;  %v3538_v52 = vsel %vm680_vm0, %v8290_v45, 0.0 }
 0x7e7   : > { %6623 = vpow2.f32 %v3482_v25  ;;  %v3442_v9 = vsub.f32 %v8182_v56, %v3372_v31  ;;  %3539 = vadd.xlane.f32.xlu0 %v3538_v52 }
 0x7e8   : > { %v8298_v37 = vpop.eup %6613  ;;  %v3488_v44 = vmul.f32 1.442695, %v3443_v24 }
 0x7e9   : > { %v8300_v35 = vpop.eup %6615  ;;  %v3486_v28 = vmul.f32 1.442695, %v3442_v9  ;;  %v3381_v42 = vpop.xlane.xlu1 %3380  ;;  %v3547_v39 = vsel %vm680_vm0, %v8298_v37, 0.0 }
 0x7ea   : > { %6625 = vpow2.f32 %v3488_v44  ;;  %v3445_v43 = vsub.f32 %v8188_v1, %v3381_v42  ;;  %v3378_v4 = vpop.xlane.xlu0 %3377  ;;  %3548 = vadd.xlane.f32.xlu1 %v3547_v39  ;;  %v3544_v47 = vsel %vm680_vm0, %v8300_v35, 0.0 }
 0x7eb   : > { %6627 = vpow2.f32 %v3486_v28  ;;  %v3444_v56 = vsub.f32 %v8190_v30, %v3378_v4  ;;  %3545 = vadd.xlane.f32.xlu0 %v3544_v47 }
 0x7ec   : > { %v8308_v57 = vpop.eup %6617  ;;  %v3492_v34 = vmul.f32 1.442695, %v3445_v43 }
 0x7ed   : > { %v8310_v63 = vpop.eup %6619  ;;  %v3490_v7 = vmul.f32 1.442695, %v3444_v56  ;;  %v3387_v62 = vpop.xlane.xlu1 %3386  ;;  %v3553_v25 = vsel %vm680_vm0, %v8308_v57, 0.0 }
 0x7ee   : > { %6629 = vpow2.f32 %v3492_v34  ;;  %v3447_v1 = vsub.f32 %v8196_v27, %v3387_v62  ;;  %v3384_v16 = vpop.xlane.xlu0 %3383  ;;  %3554 = vadd.xlane.f32.xlu1 %v3553_v25  ;;  %v3550_v60 = vsel %vm680_vm0, %v8310_v63, 0.0 }
 0x7ef   : > { %6631 = vpow2.f32 %v3490_v7  ;;  %v3446_v30 = vsub.f32 %v8198_v50, %v3384_v16  ;;  %3551 = vadd.xlane.f32.xlu0 %v3550_v60 }
 0x7f0   : > { %v8318_v24 = vpop.eup %6621  ;;  %v3496_v31 = vmul.f32 1.442695, %v3447_v1 }
 0x7f1   : > { %v8320_v52 = vpop.eup %6623  ;;  %v3494_v9 = vmul.f32 1.442695, %v3446_v30  ;;  %v3393_v44 = vpop.xlane.xlu1 %3392  ;;  %v3559_v28 = vsel %vm680_vm0, %v8318_v24, 0.0 }
 0x7f2   : > { %6633 = vpow2.f32 %v3496_v31  ;;  %v3449_v27 = vsub.f32 %v8204_v21, %v3393_v44  ;;  %v3390_v42 = vpop.xlane.xlu0 %3389  ;;  %3560 = vadd.xlane.f32.xlu1 %v3559_v28  ;;  %v3556_v39 = vsel %vm680_vm0, %v8320_v52, 0.0 }
 0x7f3   : > { %6635 = vpow2.f32 %v3494_v9  ;;  %v3448_v50 = vsub.f32 %v8206_v17, %v3390_v42  ;;  %3557 = vadd.xlane.f32.xlu0 %v3556_v39 }
 0x7f4   : > { %v8328_v43 = vpop.eup %6625  ;;  %v3500_v4 = vmul.f32 1.442695, %v3449_v27 }
 0x7f5   : > { %v8330_v47 = vpop.eup %6627  ;;  %v3498_v56 = vmul.f32 1.442695, %v3448_v50  ;;  %v3399_v34 = vpop.xlane.xlu1 %3398  ;;  %v3565_v7 = vsel %vm680_vm0, %v8328_v43, 0.0 }
 0x7f6   : > { %6637 = vpow2.f32 %v3500_v4  ;;  %v3451_v21 = vsub.f32 %v8212_v3, %v3399_v34  ;;  %v3396_v62 = vpop.xlane.xlu0 %3395  ;;  %3566 = vadd.xlane.f32.xlu1 %v3565_v7  ;;  %v3562_v25 = vsel %vm680_vm0, %v8330_v47, 0.0 }
 0x7f7   : > { %6639 = vpow2.f32 %v3498_v56  ;;  %v3450_v17 = vsub.f32 %v8214_v54, %v3396_v62  ;;  %3563 = vadd.xlane.f32.xlu0 %v3562_v25 }
 0x7f8   : > { %v8338_v1 = vpop.eup %6629  ;;  %v3504_v16 = vmul.f32 1.442695, %v3451_v21 }
 0x7f9   : > { %v8340_v60 = vpop.eup %6631  ;;  %v3502_v30 = vmul.f32 1.442695, %v3450_v17  ;;  %v3405_v31 = vpop.xlane.xlu1 %3404  ;;  %v3571_v9 = vsel %vm680_vm0, %v8338_v1, 0.0 }
 0x7fa   : > { %6641 = vpow2.f32 %v3504_v16  ;;  %v3453_v3 = vsub.f32 %v8220_v22, %v3405_v31  ;;  %v3402_v44 = vpop.xlane.xlu0 %3401  ;;  %3572 = vadd.xlane.f32.xlu1 %v3571_v9  ;;  %v3568_v28 = vsel %vm680_vm0, %v8340_v60, 0.0 }
 0x7fb   : > { %6643 = vpow2.f32 %v3502_v30  ;;  %v3452_v54 = vsub.f32 %v8222_v26, %v3402_v44  ;;  %3569 = vadd.xlane.f32.xlu0 %v3568_v28 }
 0x7fc   : > { %v8348_v27 = vpop.eup %6633  ;;  %v3508_v42 = vmul.f32 1.442695, %v3453_v3 }
 0x7fd   : > { %v8350_v39 = vpop.eup %6635  ;;  %v3506_v50 = vmul.f32 1.442695, %v3452_v54  ;;  %v3411_v4 = vpop.xlane.xlu1 %3410  ;;  %v3577_v56 = vsel %vm680_vm0, %v8348_v27, 0.0 }
 0x7fe   : > { %6645 = vpow2.f32 %v3508_v42  ;;  %v3455_v22 = vsub.f32 %v8228_v6, %v3411_v4  ;;  %v3408_v34 = vpop.xlane.xlu0 %3407  ;;  %3578 = vadd.xlane.f32.xlu1 %v3577_v56  ;;  %v3574_v7 = vsel %vm680_vm0, %v8350_v39, 0.0 }
 0x7ff   : > { %6647 = vpow2.f32 %v3506_v50  ;;  %v3454_v26 = vsub.f32 %v8230_v10, %v3408_v34  ;;  %3575 = vadd.xlane.f32.xlu0 %v3574_v7 }
 0x800   : > { %v8358_v21 = vpop.eup %6637  ;;  %v3512_v62 = vmul.f32 1.442695, %v3455_v22 }
 0x801   : > { %v8360_v25 = vpop.eup %6639  ;;  %v3510_v17 = vmul.f32 1.442695, %v3454_v26  ;;  %v3417_v16 = vpop.xlane.xlu1 %3416  ;;  %v3583_v30 = vsel %vm680_vm0, %v8358_v21, 0.0 }
 0x802   : > { %6649 = vpow2.f32 %v3512_v62  ;;  %v3457_v6 = vsub.f32 %v8236_v13, %v3417_v16  ;;  %v3414_v31 = vpop.xlane.xlu0 %3413  ;;  %3584 = vadd.xlane.f32.xlu1 %v3583_v30  ;;  %v3580_v9 = vsel %vm680_vm0, %v8360_v25, 0.0 }
 0x803   : > { %6651 = vpow2.f32 %v3510_v17  ;;  %v3456_v10 = vsub.f32 %v8238_v29, %v3414_v31  ;;  %3581 = vadd.xlane.f32.xlu0 %v3580_v9 }
 0x804   : > { %v8368_v3 = vpop.eup %6641  ;;  %v3516_v44 = vmul.f32 1.442695, %v3457_v6 }
 0x805   : > { %v8370_v28 = vpop.eup %6643  ;;  %v3514_v54 = vmul.f32 1.442695, %v3456_v10  ;;  %v3423_v42 = vpop.xlane.xlu1 %3422  ;;  %v3589_v50 = vsel %vm680_vm0, %v8368_v3, 0.0 }
 0x806   : > { %6653 = vpow2.f32 %v3516_v44  ;;  %v3459_v13 = vsub.f32 %v8244_v41, %v3423_v42  ;;  %v3420_v4 = vpop.xlane.xlu0 %3419  ;;  %3590 = vadd.xlane.f32.xlu1 %v3589_v50  ;;  %v3586_v56 = vsel %vm680_vm0, %v8370_v28, 0.0 }
 0x807   : > { %6655 = vpow2.f32 %v3514_v54  ;;  %v3458_v29 = vsub.f32 %v8246_v38, %v3420_v4  ;;  %3587 = vadd.xlane.f32.xlu0 %v3586_v56 }
 0x808   : > { %v8378_v22 = vpop.eup %6645  ;;  %v3520_v34 = vmul.f32 1.442695, %v3459_v13 }
 0x809   : > { %v8380_v7 = vpop.eup %6647  ;;  %v3518_v26 = vmul.f32 1.442695, %v3458_v29  ;;  %v3429_v62 = vpop.xlane.xlu1 %3428  ;;  %v3595_v17 = vsel %vm680_vm0, %v8378_v22, 0.0 }
 0x80a   : > { %6657 = vpow2.f32 %v3520_v34  ;;  %v3461_v41 = vsub.f32 %v8252_v5, %v3429_v62  ;;  %3596 = vadd.xlane.f32.xlu1 %v3595_v17  ;;  %v3426_v16 = vpop.xlane.xlu0 %3425  ;;  %v3592_v30 = vsel %vm680_vm0, %v8380_v7, 0.0 }
 0x80b   : > { %6659 = vpow2.f32 %v3518_v26  ;;  %v3460_v38 = vsub.f32 %v8254_v0, %v3426_v16  ;;  %3593 = vadd.xlane.f32.xlu0 %v3592_v30  ;;  %v5080_v16 = vld [vmem:[%s8727_s12 + $0x28] sm:$0xff]  ;;  %v5081_v30 = vld [vmem:[%s8727_s12 + $0x30] sm:$0xff] }
 0x80c   : > { %v8388_v6 = vpop.eup %6649  ;;  %v3524_v31 = vmul.f32 1.442695, %v3461_v41  ;;  %v5079_v41 = vld [vmem:[%s8727_s12 + $0x20] sm:$0xff] }
 0x80d   : > { %v8390_v9 = vpop.eup %6651  ;;  %v3522_v10 = vmul.f32 1.442695, %v3460_v38  ;;  %v3601_v44 = vsel %vm680_vm0, %v8388_v6, 0.0  ;;  %v6401_v38 = vpack.c.bf16 %v5080_v16, %v5079_v41 }
 0x80e   : > { %6661 = vpow2.f32 %v3524_v31  ;;  %3602 = vadd.xlane.f32.xlu1 %v3601_v44  ;;  %v3598_v5 = vsel %vm680_vm0, %v8390_v9, 0.0  ;;  %v5082_v31 = vld [vmem:[%s8727_s12 + $0x38] sm:$0xff] }
 0x80f   : > { %6663 = vpow2.f32 %v3522_v10  ;;  %3599 = vadd.xlane.f32.xlu0 %v3598_v5  ;;  %v6405_v10 = vpack.c.bf16 %v5082_v31, %v5081_v30  ;;  %6402 = vmatprep.subr.bf16.mxu0 %v6401_v38 }
 0x810   : > { %v8396_v54 = vpop.eup %6653  ;;  %6404 = vmatpush3.bf16.msra.mxu0 %v6401_v38 }
 0x811   : > { %v8398_v0 = vpop.eup %6655  ;;  %v3607_v42 = vsel %vm680_vm0, %v8396_v54, 0.0  ;;  %6406 = vmatprep.subr.bf16.mxu0 %v6405_v10 }
 0x812   : > { %3608 = vadd.xlane.f32.xlu1 %v3607_v42  ;;  %v3604_v50 = vsel %vm680_vm0, %v8398_v0, 0.0 }
 0x813   : > { %3605 = vadd.xlane.f32.xlu0 %v3604_v50 }
 0x814   : > { %v8404_v13 = vpop.eup %6657  ;;  %6408 = vmatpush3.bf16.msra.mxu0 %v6405_v10 }
 0x815   : > { %v8406_v4 = vpop.eup %6659  ;;  %v3613_v56 = vsel %vm680_vm0, %v8404_v13, 0.0 }
 0x816   : > { %3614 = vadd.xlane.f32.xlu1 %v3613_v56  ;;  %v3610_v29 = vsel %vm680_vm0, %v8406_v4, 0.0 }
 0x817   : > { %3611 = vadd.xlane.f32.xlu0 %v3610_v29 }
 0x818   : > { %v8412_v34 = vpop.eup %6661 }
 0x819   : > { %v8414_v26 = vpop.eup %6663  ;;  %v3619_v62 = vsel %vm680_vm0, %v8412_v34, 0.0 }
 0x81a   : > { %3620 = vadd.xlane.f32.xlu1 %v3619_v62  ;;  %v3616_v17 = vsel %vm680_vm0, %v8414_v26, 0.0 }
 0x81b   : > { %3617 = vadd.xlane.f32.xlu0 %v3616_v17 }
 0x86b   : > { %v3531_v44 = vpop.xlane.xlu1 %3530 }
 0x86c   : > { %6665 = vrcp.f32 %v3531_v44  ;;  %v3528_v5 = vpop.xlane.xlu0 %3527 }
 0x86d   : > { %6667 = vrcp.f32 %v3528_v5 }
 0x86f   : > { %v3537_v42 = vpop.xlane.xlu1 %3536 }
 0x870   : > { %6669 = vrcp.f32 %v3537_v42  ;;  %v3534_v50 = vpop.xlane.xlu0 %3533 }
 0x871   : > { %6671 = vrcp.f32 %v3534_v50 }
 0x873   : > { %v3543_v56 = vpop.xlane.xlu1 %3542 }
 0x874   : > { %6673 = vrcp.f32 %v3543_v56  ;;  %v3540_v29 = vpop.xlane.xlu0 %3539 }
 0x875   : > { %6675 = vrcp.f32 %v3540_v29 }
 0x876   : > { %v6666_v62 = vpop.eup %6665 }
 0x877   : > { %v6668_v17 = vpop.eup %6667  ;;  %v3549_v41 = vpop.xlane.xlu1 %3548  ;;  %v3655_v38 = vmul.f32 %v6666_v62, %v8268_v23 }
 0x878   : > { %6677 = vrcp.f32 %v3549_v41  ;;  %v3546_v16 = vpop.xlane.xlu0 %3545  ;;  %v3654_v30 = vmul.f32 %v6668_v17, %v8270_v11 }
 0x879   : > { %6679 = vrcp.f32 %v3546_v16 }
 0x87a   : > { %v6670_v31 = vpop.eup %6669  ;;  %6033 = vmatprep.mubr.msk.f32.mxu1 %vm680_vm0, %v3654_v30 }
 0x87b   : > { %v6672_v10 = vpop.eup %6671  ;;  %v3555_v44 = vpop.xlane.xlu1 %3554  ;;  %6034 = vmatmul.mubr.msk.f32.vlgmr.msra.gmra.mrb[128].mxu1 %vm680_vm0, %v3655_v38  ;;  %v3657_v50 = vmul.f32 %v6670_v31, %v8278_v8 }
 0x87c   : > { %6681 = vrcp.f32 %v3555_v44  ;;  %v3552_v5 = vpop.xlane.xlu0 %3551  ;;  %v3656_v42 = vmul.f32 %v6672_v10, %v8280_v2 }
 0x87d   : > { %6683 = vrcp.f32 %v3552_v5 }
 0x87e   : > { %v6674_v56 = vpop.eup %6673  ;;  %6036 = vmatprep.mubr.msk.f32.mxu1 %vm680_vm0, %v3656_v42 }
 0x87f   : > { %v6676_v11 = vpop.eup %6675  ;;  %v3561_v23 = vpop.xlane.xlu1 %3560  ;;  %6037 = vmatmul.mubr.msk.f32.gmra.mrb[130].mxu1 %vm680_vm0, %v3657_v50  ;;  %v3659_v17 = vmul.f32 %v6674_v56, %v8288_v14 }
 0x880   : > { %6685 = vrcp.f32 %v3561_v23  ;;  %v3558_v29 = vpop.xlane.xlu0 %3557  ;;  %v3658_v62 = vmul.f32 %v6676_v11, %v8290_v45 }
 0x881   : > { %6687 = vrcp.f32 %v3558_v29 }
 0x882   : > { %v6678_v41 = vpop.eup %6677  ;;  %6039 = vmatprep.mubr.msk.f32.mxu1 %vm680_vm0, %v3658_v62 }
 0x883   : > { %v6680_v2 = vpop.eup %6679  ;;  %v3567_v16 = vpop.xlane.xlu1 %3566  ;;  %6040 = vmatmul.mubr.msk.f32.gmra.mrb[132].mxu1 %vm680_vm0, %v3659_v17  ;;  %v3661_v38 = vmul.f32 %v6678_v41, %v8298_v37 }
 0x884   : > { %6689 = vrcp.f32 %v3567_v16  ;;  %v3564_v8 = vpop.xlane.xlu0 %3563  ;;  %v3660_v30 = vmul.f32 %v6680_v2, %v8300_v35 }
 0x885   : > { %6691 = vrcp.f32 %v3564_v8 }
 0x886   : > { %v6682_v31 = vpop.eup %6681  ;;  %6042 = vmatprep.mubr.msk.f32.mxu1 %vm680_vm0, %v3660_v30 }
 0x887   : > { %v6684_v45 = vpop.eup %6683  ;;  %v3573_v10 = vpop.xlane.xlu1 %3572  ;;  %6043 = vmatmul.mubr.msk.f32.gmra.mrb[134].mxu1 %vm680_vm0, %v3661_v38  ;;  %v3663_v5 = vmul.f32 %v6682_v31, %v8308_v57 }
 0x888   : > { %6693 = vrcp.f32 %v3573_v10  ;;  %v3570_v14 = vpop.xlane.xlu0 %3569  ;;  %v3662_v44 = vmul.f32 %v6684_v45, %v8310_v63 }
 0x889   : > { %6695 = vrcp.f32 %v3570_v14 }
 0x88a   : > { %v6686_v42 = vpop.eup %6685  ;;  %6045 = vmatprep.mubr.msk.f32.mxu1 %vm680_vm0, %v3662_v44 }
 0x88b   : > { %v6688_v35 = vpop.eup %6687  ;;  %v3579_v50 = vpop.xlane.xlu1 %3578  ;;  %6046 = vmatmul.mubr.msk.f32.gmra.mrb[136].mxu1 %vm680_vm0, %v3663_v5  ;;  %v3665_v11 = vmul.f32 %v6686_v42, %v8318_v24 }
 0x88c   : > { %6697 = vrcp.f32 %v3579_v50  ;;  %v3576_v37 = vpop.xlane.xlu0 %3575  ;;  %v3664_v56 = vmul.f32 %v6688_v35, %v8320_v52 }
 0x88d   : > { %6699 = vrcp.f32 %v3576_v37 }
 0x88e   : > { %v6690_v23 = vpop.eup %6689  ;;  %6048 = vmatprep.mubr.msk.f32.mxu1 %vm680_vm0, %v3664_v56 }
 0x88f   : > { %v6692_v63 = vpop.eup %6691  ;;  %v3585_v29 = vpop.xlane.xlu1 %3584  ;;  %6049 = vmatmul.mubr.msk.f32.gmra.mrb[138].mxu1 %vm680_vm0, %v3665_v11  ;;  %v3667_v17 = vmul.f32 %v6690_v23, %v8328_v43 }
 0x890   : > { %6701 = vrcp.f32 %v3585_v29  ;;  %v3582_v57 = vpop.xlane.xlu0 %3581  ;;  %v3666_v62 = vmul.f32 %v6692_v63, %v8330_v47 }
 0x891   : > { %6703 = vrcp.f32 %v3582_v57 }
 0x892   : > { %v6694_v41 = vpop.eup %6693  ;;  %6051 = vmatprep.mubr.msk.f32.mxu1 %vm680_vm0, %v3666_v62 }
 0x893   : > { %v6696_v52 = vpop.eup %6695  ;;  %v3591_v2 = vpop.xlane.xlu1 %3590  ;;  %6052 = vmatmul.mubr.msk.f32.gmra.mrb[140].mxu1 %vm680_vm0, %v3667_v17  ;;  %v3669_v8 = vmul.f32 %v6694_v41, %v8338_v1 }
 0x894   : > { %6705 = vrcp.f32 %v3591_v2  ;;  %v3588_v24 = vpop.xlane.xlu0 %3587  ;;  %v3668_v16 = vmul.f32 %v6696_v52, %v8340_v60 }
 0x895   : > { %6707 = vrcp.f32 %v3588_v24 }
 0x896   : > { %v6698_v30 = vpop.eup %6697  ;;  %6054 = vmatprep.mubr.msk.f32.mxu1 %vm680_vm0, %v3668_v16 }
 0x897   : > { %v6700_v47 = vpop.eup %6699  ;;  %v3597_v38 = vpop.xlane.xlu1 %3596  ;;  %6055 = vmatmul.mubr.msk.f32.gmra.mrb[142].mxu1 %vm680_vm0, %v3669_v8  ;;  %v3671_v45 = vmul.f32 %v6698_v30, %v8348_v27 }
 0x898   : > { %6709 = vrcp.f32 %v3597_v38  ;;  %v3594_v43 = vpop.xlane.xlu0 %3593  ;;  %v3670_v31 = vmul.f32 %v6700_v47, %v8350_v39 }
 0x899   : > { %6711 = vrcp.f32 %v3594_v43 }
 0x89a   : > { %v6702_v10 = vpop.eup %6701  ;;  %6057 = vmatprep.mubr.msk.f32.mxu1 %vm680_vm0, %v3670_v31 }
 0x89b   : > { %v6704_v60 = vpop.eup %6703  ;;  %v3603_v14 = vpop.xlane.xlu1 %3602  ;;  %6058 = vmatmul.mubr.msk.f32.gmra.mrb[144].mxu1 %vm680_vm0, %v3671_v45  ;;  %v3673_v5 = vmul.f32 %v6702_v10, %v8358_v21 }
 0x89c   : > { %6713 = vrcp.f32 %v3603_v14  ;;  %v3600_v1 = vpop.xlane.xlu0 %3599  ;;  %v3672_v44 = vmul.f32 %v6704_v60, %v8360_v25 }
 0x89d   : > { %6715 = vrcp.f32 %v3600_v1 }
 0x89e   : > { %v6706_v42 = vpop.eup %6705  ;;  %6060 = vmatprep.mubr.msk.f32.mxu1 %vm680_vm0, %v3672_v44 }
 0x89f   : > { %v6708_v39 = vpop.eup %6707  ;;  %v3609_v35 = vpop.xlane.xlu1 %3608  ;;  %6061 = vmatmul.mubr.msk.f32.gmra.mrb[146].mxu1 %vm680_vm0, %v3673_v5  ;;  %v3675_v37 = vmul.f32 %v6706_v42, %v8368_v3 }
 0x8a0   : > { %6717 = vrcp.f32 %v3609_v35  ;;  %v3606_v27 = vpop.xlane.xlu0 %3605  ;;  %v3674_v50 = vmul.f32 %v6708_v39, %v8370_v28 }
 0x8a1   : > { %6719 = vrcp.f32 %v3606_v27 }
 0x8a2   : > { %v6710_v56 = vpop.eup %6709  ;;  %6063 = vmatprep.mubr.msk.f32.mxu1 %vm680_vm0, %v3674_v50 }
 0x8a3   : > { %v6712_v25 = vpop.eup %6711  ;;  %v3615_v11 = vpop.xlane.xlu1 %3614  ;;  %6064 = vmatmul.mubr.msk.f32.gmra.mrb[148].mxu1 %vm680_vm0, %v3675_v37  ;;  %v3677_v63 = vmul.f32 %v6710_v56, %v8378_v22 }
 0x8a4   : > { %6721 = vrcp.f32 %v3615_v11  ;;  %v3612_v21 = vpop.xlane.xlu0 %3611  ;;  %v3676_v23 = vmul.f32 %v6712_v25, %v8380_v7 }
 0x8a5   : > { %6723 = vrcp.f32 %v3612_v21 }
 0x8a6   : > { %v6714_v29 = vpop.eup %6713  ;;  %6066 = vmatprep.mubr.msk.f32.mxu1 %vm680_vm0, %v3676_v23 }
 0x8a7   : > { %v6716_v28 = vpop.eup %6715  ;;  %v3621_v57 = vpop.xlane.xlu1 %3620  ;;  %6067 = vmatmul.mubr.msk.f32.gmra.mrb[150].mxu1 %vm680_vm0, %v3677_v63  ;;  %v3679_v17 = vmul.f32 %v6714_v29, %v8388_v6 }
 0x8a8   : > { %6725 = vrcp.f32 %v3621_v57  ;;  %v3618_v3 = vpop.xlane.xlu0 %3617  ;;  %v3678_v62 = vmul.f32 %v6716_v28, %v8390_v9 }
 0x8a9   : > { %6727 = vrcp.f32 %v3618_v3 }
 0x8aa   : > { %v6718_v41 = vpop.eup %6717  ;;  %6069 = vmatprep.mubr.msk.f32.mxu1 %vm680_vm0, %v3678_v62 }
 0x8ab   : > { %v6720_v7 = vpop.eup %6719  ;;  %6070 = vmatmul.mubr.msk.f32.gmra.mrb[152].mxu1 %vm680_vm0, %v3679_v17  ;;  %v3681_v52 = vmul.f32 %v6718_v41, %v8396_v54 }
 0x8ac   : > { %v3680_v22 = vmul.f32 %v6720_v7, %v8398_v0 }
 0x8ae   : > { %v6722_v2 = vpop.eup %6721  ;;  %6072 = vmatprep.mubr.msk.f32.mxu1 %vm680_vm0, %v3680_v22 }
 0x8af   : > { %v6724_v24 = vpop.eup %6723  ;;  %6073 = vmatmul.mubr.msk.f32.gmra.mrb[154].mxu1 %vm680_vm0, %v3681_v52  ;;  %v3683_v6 = vmul.f32 %v6722_v2, %v8404_v13  ;;  %v2468_v13 = vld [vmem:[%s8727_s12 + $0x8] sm:$0xff] }
 0x8b0   : > { %v3682_v9 = vmul.f32 %v6724_v24, %v8406_v4  ;;  %v2467_v4 = vld [vmem:[%s8727_s12] sm:$0xff] }
 0x8b1   : > { %v6409_v30 = vpack.c.bf16 %v2468_v13, %v2467_v4 }
 0x8b2   : > { %v6726_v16 = vpop.eup %6725  ;;  %6075 = vmatprep.mubr.msk.f32.mxu1 %vm680_vm0, %v3682_v9 }
 0x8b3   : > { %v6728_v8 = vpop.eup %6727  ;;  %6076 = vmatmul.mubr.msk.f32.gmra.mrb[156].mxu1 %vm680_vm0, %v3683_v6  ;;  %v3685_v54 = vmul.f32 %v6726_v16, %v8412_v34  ;;  %6410 = vmatprep.subr.bf16.mxu0 %v6409_v30  ;;  %v2470_v34 = vld [vmem:[%s8727_s12 + $0x18] sm:$0xff] }
 0x8b4   : > { %v3684_v0 = vmul.f32 %v6728_v8, %v8414_v26  ;;  %v2469_v26 = vld [vmem:[%s8727_s12 + $0x10] sm:$0xff] }
 0x8b5   : > { %v6413_v43 = vpack.c.bf16 %v2470_v34, %v2469_v26 }
 0x8b6   : > { %6078 = vmatprep.mubr.msk.f32.mxu1 %vm680_vm0, %v3684_v0 }
 0x8b7   : > { %6079 = vmatmul.mubr.msk.f32.gmra.mrb[158].mxu1 %vm680_vm0, %v3685_v54 }
 0x94e   : > { %v6035_v47 = vpop.f32.mrb[128].mxu1 }
 0x94f   : > { %v3848_v38 = vpop.f32.mrb[129].mxu1 }
 0x950   : > { %6089 = vmatprep.mubr.msk.f32.mxu0 %vm1416_vm1, %v3848_v38 }
 0x951   : > { %6090 = vmatmul.mubr.msk.f32.vlgmr.msra.gmra.mrb[80].mxu0 %vm1416_vm1, %v6035_v47 }
 0x952   : > { %v6038_v31 = vpop.f32.mrb[130].mxu1  ;;  %6412 = vmatpush3.bf16.msra.mxu0 %v6409_v30 }
 0x953   : > { %v3858_v45 = vpop.f32.mrb[131].mxu1  ;;  %6414 = vmatprep.subr.bf16.mxu0 %v6413_v43 }
 0x954   : > { %6092 = vmatprep.mubr.msk.f32.mxu0 %vm1416_vm1, %v3858_v45 }
 0x955   : > { %6093 = vmatmul.mubr.msk.f32.gmra.mrb[82].mxu0 %vm1416_vm1, %v6038_v31 }
 0x956   : > { %v6041_v10 = vpop.f32.mrb[132].mxu1  ;;  %6416 = vmatpush3.bf16.msra.mxu0 %v6413_v43 }
 0x957   : > { %v3868_v60 = vpop.f32.mrb[133].mxu1 }
 0x958   : > { %6095 = vmatprep.mubr.msk.f32.mxu0 %vm1416_vm1, %v3868_v60 }
 0x959   : > { %6096 = vmatmul.mubr.msk.f32.gmra.mrb[84].mxu0 %vm1416_vm1, %v6041_v10 }
 0x95a   : > { %v6044_v14 = vpop.f32.mrb[134].mxu1 }
 0x95b   : > { %v3878_v1 = vpop.f32.mrb[135].mxu1 }
 0x95c   : > { %6098 = vmatprep.mubr.msk.f32.mxu0 %vm1416_vm1, %v3878_v1 }
 0x95d   : > { %6099 = vmatmul.mubr.msk.f32.gmra.mrb[86].mxu0 %vm1416_vm1, %v6044_v14 }
 0x95e   : > { %v6047_v44 = vpop.f32.mrb[136].mxu1 }
 0x95f   : > { %v3888_v5 = vpop.f32.mrb[137].mxu1 }
 0x960   : > { %6101 = vmatprep.mubr.msk.f32.mxu0 %vm1416_vm1, %v3888_v5 }
 0x961   : > { %6102 = vmatmul.mubr.msk.f32.gmra.mrb[88].mxu0 %vm1416_vm1, %v6047_v44 }
 0x962   : > { %v6050_v42 = vpop.f32.mrb[138].mxu1 }
 0x963   : > { %v3898_v39 = vpop.f32.mrb[139].mxu1 }
 0x964   : > { %6104 = vmatprep.mubr.msk.f32.mxu0 %vm1416_vm1, %v3898_v39 }
 0x965   : > { %6105 = vmatmul.mubr.msk.f32.gmra.mrb[90].mxu0 %vm1416_vm1, %v6050_v42 }
 0x966   : > { %v6053_v35 = vpop.f32.mrb[140].mxu1 }
 0x967   : > { %v3908_v27 = vpop.f32.mrb[141].mxu1 }
 0x968   : > { %6107 = vmatprep.mubr.msk.f32.mxu0 %vm1416_vm1, %v3908_v27 }
 0x969   : > { %6108 = vmatmul.mubr.msk.f32.gmra.mrb[92].mxu0 %vm1416_vm1, %v6053_v35 }
 0x96a   : > { %v6056_v50 = vpop.f32.mrb[142].mxu1 }
 0x96b   : > { %v3918_v37 = vpop.f32.mrb[143].mxu1 }
 0x96c   : > { %6110 = vmatprep.mubr.msk.f32.mxu0 %vm1416_vm1, %v3918_v37 }
 0x96d   : > { %6111 = vmatmul.mubr.msk.f32.gmra.mrb[94].mxu0 %vm1416_vm1, %v6056_v50 }
 0x96e   : > { %v6059_v56 = vpop.f32.mrb[144].mxu1 }
 0x96f   : > { %v3928_v25 = vpop.f32.mrb[145].mxu1 }
 0x970   : > { %6113 = vmatprep.mubr.msk.f32.mxu0 %vm1416_vm1, %v3928_v25 }
 0x971   : > { %6114 = vmatmul.mubr.msk.f32.gmra.mrb[96].mxu0 %vm1416_vm1, %v6059_v56 }
 0x972   : > { %v6062_v11 = vpop.f32.mrb[146].mxu1 }
 0x973   : > { %v3938_v21 = vpop.f32.mrb[147].mxu1 }
 0x974   : > { %6116 = vmatprep.mubr.msk.f32.mxu0 %vm1416_vm1, %v3938_v21 }
 0x975   : > { %6117 = vmatmul.mubr.msk.f32.gmra.mrb[98].mxu0 %vm1416_vm1, %v6062_v11 }
 0x976   : > { %v6065_v23 = vpop.f32.mrb[148].mxu1 }
 0x977   : > { %v3948_v63 = vpop.f32.mrb[149].mxu1 }
 0x978   : > { %6119 = vmatprep.mubr.msk.f32.mxu0 %vm1416_vm1, %v3948_v63 }
 0x979   : > { %6120 = vmatmul.mubr.msk.f32.gmra.mrb[100].mxu0 %vm1416_vm1, %v6065_v23 }
 0x97a   : > { %v6068_v29 = vpop.f32.mrb[150].mxu1 }
 0x97b   : > { %v3958_v28 = vpop.f32.mrb[151].mxu1 }
 0x97c   : > { %6122 = vmatprep.mubr.msk.f32.mxu0 %vm1416_vm1, %v3958_v28 }
 0x97d   : > { %6123 = vmatmul.mubr.msk.f32.gmra.mrb[102].mxu0 %vm1416_vm1, %v6068_v29 }
 0x97e   : > { %v6071_v57 = vpop.f32.mrb[152].mxu1 }
 0x97f   : > { %v3968_v3 = vpop.f32.mrb[153].mxu1 }
 0x980   : > { %6125 = vmatprep.mubr.msk.f32.mxu0 %vm1416_vm1, %v3968_v3 }
 0x981   : > { %6126 = vmatmul.mubr.msk.f32.gmra.mrb[104].mxu0 %vm1416_vm1, %v6071_v57 }
 0x982   : > { %v6074_v62 = vpop.f32.mrb[154].mxu1 }
 0x983   : > { %v3978_v17 = vpop.f32.mrb[155].mxu1 }
 0x984   : > { %6128 = vmatprep.mubr.msk.f32.mxu0 %vm1416_vm1, %v3978_v17 }
 0x985   : > { %6129 = vmatmul.mubr.msk.f32.gmra.mrb[106].mxu0 %vm1416_vm1, %v6074_v62 }
 0x986   : > { %v6077_v41 = vpop.f32.mrb[156].mxu1 }
 0x987   : > { %v3988_v7 = vpop.f32.mrb[157].mxu1 }
 0x988   : > { %6131 = vmatprep.mubr.msk.f32.mxu0 %vm1416_vm1, %v3988_v7 }
 0x989   : > { %6132 = vmatmul.mubr.msk.f32.gmra.mrb[108].mxu0 %vm1416_vm1, %v6077_v41 }
 0x98a   : > { %v6080_v22 = vpop.f32.mrb[158].mxu1 }
 0x98b   : > { %v3998_v52 = vpop.f32.mrb[159].mxu1 }
 0x98c   : > { %6134 = vmatprep.mubr.msk.f32.mxu0 %vm1416_vm1, %v3998_v52 }
 0x98d   : > { %6135 = vmatmul.mubr.msk.f32.gmra.mrb[110].mxu0 %vm1416_vm1, %v6080_v22 }
 0x98e   : > { %6145 = vmatprep.mubr.msk.f32.mxu0 %vm1416_vm1, %v8001_v33  ;;  %v8747_v33 = vld [vmem:[#allocation2_spill] sm:$0xff] }
 0x991   : > { %6146 = vmatmul.mubr.msk.f32.vlgmr.msra.gmra.mrb[80].mxu0 %vm1416_vm1, %v7999_v12  ;;  %v8746_v12 = vld [vmem:[#allocation3_spill] sm:$0xff] }
 0x992   : > { %6148 = vmatprep.mubr.msk.f32.mxu0 %vm1416_vm1, %v8005_v61  ;;  %v8749_v61 = vld [vmem:[#allocation4_spill] sm:$0xff] }
 0x995   : > { %6149 = vmatmul.mubr.msk.f32.gmra.mrb[82].mxu0 %vm1416_vm1, %v8003_v55  ;;  %v8748_v55 = vld [vmem:[#allocation5_spill] sm:$0xff] }
 0x996   : > { %6151 = vmatprep.mubr.msk.f32.mxu0 %vm1416_vm1, %v8009_v48  ;;  %v8751_v48 = vld [vmem:[#allocation6_spill] sm:$0xff] }
 0x999   : > { %6152 = vmatmul.mubr.msk.f32.gmra.mrb[84].mxu0 %vm1416_vm1, %v8007_v58  ;;  %v8750_v58 = vld [vmem:[#allocation7_spill] sm:$0xff] }
 0x99a   : > { %6154 = vmatprep.mubr.msk.f32.mxu0 %vm1416_vm1, %v8013_v49  ;;  %v8753_v49 = vld [vmem:[#allocation8_spill] sm:$0xff] }
 0x99d   : > { %6155 = vmatmul.mubr.msk.f32.gmra.mrb[86].mxu0 %vm1416_vm1, %v8011_v40  ;;  %v8752_v40 = vld [vmem:[#allocation9_spill] sm:$0xff] }
 0x99e   : > { %6157 = vmatprep.mubr.msk.f32.mxu0 %vm1416_vm1, %v8017_v51  ;;  %v8755_v51 = vld [vmem:[#allocation10_spill] sm:$0xff] }
 0x9a1   : > { %6158 = vmatmul.mubr.msk.f32.gmra.mrb[88].mxu0 %vm1416_vm1, %v8015_v19  ;;  %v8754_v19 = vld [vmem:[#allocation11_spill] sm:$0xff] }
 0x9a2   : > { %6160 = vmatprep.mubr.msk.f32.mxu0 %vm1416_vm1, %v8021_v18  ;;  %v8757_v18 = vld [vmem:[#allocation12_spill] sm:$0xff] }
 0x9a5   : > { %6161 = vmatmul.mubr.msk.f32.gmra.mrb[90].mxu0 %vm1416_vm1, %v8019_v59  ;;  %v8756_v59 = vld [vmem:[#allocation13_spill] sm:$0xff] }
 0x9a6   : > { %6163 = vmatprep.mubr.msk.f32.mxu0 %vm1416_vm1, %v8025_v32  ;;  %v8759_v32 = vld [vmem:[#allocation14_spill] sm:$0xff] }
 0x9a9   : > { %6164 = vmatmul.mubr.msk.f32.gmra.mrb[92].mxu0 %vm1416_vm1, %v8023_v15  ;;  %v8758_v15 = vld [vmem:[#allocation15_spill] sm:$0xff] }
 0x9aa   : > { %6166 = vmatprep.mubr.msk.f32.mxu0 %vm1416_vm1, %v8029_v46 }
 0x9ad   : > { %6167 = vmatmul.mubr.msk.f32.gmra.mrb[94].mxu0 %vm1416_vm1, %v8027_v53  ;;  %v8607_v53 = vld [vmem:[%s8728_s13] ss:$0 sm:$0xff] }
 0x9ae   : > { %6169 = vmatprep.mubr.msk.f32.mxu0 %vm1416_vm1, %v8033_v36 }
 0x9b1   : > { %6170 = vmatmul.mubr.msk.f32.gmra.mrb[96].mxu0 %vm1416_vm1, %v8031_v20 }
 0x9b2   : > { %6172 = vmatprep.mubr.msk.f32.mxu0 %vm1416_vm1, %v8746_v12 }
 0x9b5   : > { %6173 = vmatmul.mubr.msk.f32.gmra.mrb[98].mxu0 %vm1416_vm1, %v8747_v33 }
 0x9b6   : > { %6175 = vmatprep.mubr.msk.f32.mxu0 %vm1416_vm1, %v8748_v55 }
 0x9b9   : > { %6176 = vmatmul.mubr.msk.f32.gmra.mrb[100].mxu0 %vm1416_vm1, %v8749_v61 }
 0x9ba   : > { %6178 = vmatprep.mubr.msk.f32.mxu0 %vm1416_vm1, %v8750_v58 }
 0x9bd   : > { %6179 = vmatmul.mubr.msk.f32.gmra.mrb[102].mxu0 %vm1416_vm1, %v8751_v48 }
 0x9be   : > { %6181 = vmatprep.mubr.msk.f32.mxu0 %vm1416_vm1, %v8752_v40 }
 0x9c1   : > { %6182 = vmatmul.mubr.msk.f32.gmra.mrb[104].mxu0 %vm1416_vm1, %v8753_v49 }
 0x9c2   : > { %6184 = vmatprep.mubr.msk.f32.mxu0 %vm1416_vm1, %v8754_v19 }
 0x9c5   : > { %6185 = vmatmul.mubr.msk.f32.gmra.mrb[106].mxu0 %vm1416_vm1, %v8755_v51 }
 0x9c6   : > { %6187 = vmatprep.mubr.msk.f32.mxu0 %vm1416_vm1, %v8756_v59 }
 0x9c9   : > { %6188 = vmatmul.mubr.msk.f32.gmra.mrb[108].mxu0 %vm1416_vm1, %v8757_v18 }
 0x9ca   : > { %6190 = vmatprep.mubr.msk.f32.mxu0 %vm1416_vm1, %v8758_v15 }
 0x9cd   : > { %6191 = vmatmul.mubr.msk.f32.gmra.mrb[110].mxu0 %vm1416_vm1, %v8759_v32 }
 0xa64   : > { %v6147_v46 = vpop.f32.mrb[80].mxu0 }
 0xa65   : > { %v4662_v20 = vadd.f32 %v6147_v46, %v8607_v53  ;;  %v4495_v36 = vpop.f32.mrb[81].mxu0 }
 0xa66   : > { %v4661_v2 = vadd.f32 %v8607_v53, %v4495_v36 }
 0xa67   : > { %4694 = vst.msk [vmem:[%s8614_s27 + $0x8] sm:$0xff] %vm680_vm0, %v4662_v20 }
 0xa68   : > { %4693 = vst.msk [vmem:[%s8614_s27] sm:$0xff] %vm680_vm0, %v4661_v2  ;;  %v6150_v24 = vpop.f32.mrb[82].mxu0 }
 0xa69   : > { %v4664_v9 = vadd.f32 %v6150_v24, %v8607_v53  ;;  %v4505_v6 = vpop.f32.mrb[83].mxu0 }
 0xa6a   : > { %v4663_v16 = vadd.f32 %v8607_v53, %v4505_v6 }
 0xa6b   : > { %4696 = vst.msk [vmem:[%s8614_s27 + $0x18] sm:$0xff] %vm680_vm0, %v4664_v9 }
 0xa6c   : > { %4695 = vst.msk [vmem:[%s8614_s27 + $0x10] sm:$0xff] %vm680_vm0, %v4663_v16  ;;  %v6153_v8 = vpop.f32.mrb[84].mxu0 }
 0xa6d   : > { %v4666_v0 = vadd.f32 %v6153_v8, %v8607_v53  ;;  %v4515_v54 = vpop.f32.mrb[85].mxu0 }
 0xa6e   : > { %v4665_v4 = vadd.f32 %v8607_v53, %v4515_v54 }
 0xa6f   : > { %4698 = vst.msk [vmem:[%s8614_s27 + $0x28] sm:$0xff] %vm680_vm0, %v4666_v0 }
 0xa70   : > { %4697 = vst.msk [vmem:[%s8614_s27 + $0x20] sm:$0xff] %vm680_vm0, %v4665_v4  ;;  %v6156_v13 = vpop.f32.mrb[86].mxu0 }
 0xa71   : > { %v4668_v30 = vadd.f32 %v6156_v13, %v8607_v53  ;;  %v4525_v26 = vpop.f32.mrb[87].mxu0 }
 0xa72   : > { %v4667_v34 = vadd.f32 %v8607_v53, %v4525_v26 }
 0xa73   : > { %4700 = vst.msk [vmem:[%s8614_s27 + $0x38] sm:$0xff] %vm680_vm0, %v4668_v30 }
 0xa74   : > { %4699 = vst.msk [vmem:[%s8614_s27 + $0x30] sm:$0xff] %vm680_vm0, %v4667_v34  ;;  %v6159_v47 = vpop.f32.mrb[88].mxu0 }
 0xa75   : > { %v4670_v38 = vadd.f32 %v6159_v47, %v8607_v53  ;;  %v4535_v43 = vpop.f32.mrb[89].mxu0 }
 0xa76   : > { %v4669_v31 = vadd.f32 %v8607_v53, %v4535_v43 }
 0xa77   : > { %4702 = vst.msk [vmem:[%s8614_s27 + $0x48] sm:$0xff] %vm680_vm0, %v4670_v38 }
 0xa78   : > { %4701 = vst.msk [vmem:[%s8614_s27 + $0x40] sm:$0xff] %vm680_vm0, %v4669_v31  ;;  %v6162_v45 = vpop.f32.mrb[90].mxu0 }
 0xa79   : > { %v4672_v10 = vadd.f32 %v6162_v45, %v8607_v53  ;;  %v4545_v60 = vpop.f32.mrb[91].mxu0 }
 0xa7a   : > { %v4671_v14 = vadd.f32 %v8607_v53, %v4545_v60 }
 0xa7b   : > { %4704 = vst.msk [vmem:[%s8614_s27 + $0x58] sm:$0xff] %vm680_vm0, %v4672_v10 }
 0xa7c   : > { %4703 = vst.msk [vmem:[%s8614_s27 + $0x50] sm:$0xff] %vm680_vm0, %v4671_v14  ;;  %v6165_v1 = vpop.f32.mrb[92].mxu0 }
 0xa7d   : > { %v4674_v44 = vadd.f32 %v6165_v1, %v8607_v53  ;;  %v4555_v5 = vpop.f32.mrb[93].mxu0 }
 0xa7e   : > { %v4673_v42 = vadd.f32 %v8607_v53, %v4555_v5 }
 0xa7f   : > { %4706 = vst.msk [vmem:[%s8614_s27 + $0x68] sm:$0xff] %vm680_vm0, %v4674_v44 }
 0xa80   : > { %4705 = vst.msk [vmem:[%s8614_s27 + $0x60] sm:$0xff] %vm680_vm0, %v4673_v42  ;;  %v6168_v39 = vpop.f32.mrb[94].mxu0 }
 0xa81   : > { %v4676_v35 = vadd.f32 %v6168_v39, %v8607_v53  ;;  %v4565_v27 = vpop.f32.mrb[95].mxu0 }
 0xa82   : > { %v4675_v50 = vadd.f32 %v8607_v53, %v4565_v27 }
 0xa83   : > { %4708 = vst.msk [vmem:[%s8614_s27 + $0x78] sm:$0xff] %vm680_vm0, %v4676_v35 }
 0xa84   : > { %4707 = vst.msk [vmem:[%s8614_s27 + $0x70] sm:$0xff] %vm680_vm0, %v4675_v50  ;;  %v6171_v37 = vpop.f32.mrb[96].mxu0 }
 0xa85   : > { %v4678_v56 = vadd.f32 %v6171_v37, %v8607_v53  ;;  %v4575_v25 = vpop.f32.mrb[97].mxu0 }
 0xa86   : > { %v4677_v11 = vadd.f32 %v8607_v53, %v4575_v25 }
 0xa87   : > { %4710 = vst.msk [vmem:[%s8614_s27 + $0x88] sm:$0xff] %vm680_vm0, %v4678_v56 }
 0xa88   : > { %4709 = vst.msk [vmem:[%s8614_s27 + $0x80] sm:$0xff] %vm680_vm0, %v4677_v11  ;;  %v6174_v21 = vpop.f32.mrb[98].mxu0 }
 0xa89   : > { %v4680_v23 = vadd.f32 %v6174_v21, %v8607_v53  ;;  %v4585_v63 = vpop.f32.mrb[99].mxu0 }
 0xa8a   : > { %v4679_v29 = vadd.f32 %v8607_v53, %v4585_v63 }
 0xa8b   : > { %4712 = vst.msk [vmem:[%s8614_s27 + $0x98] sm:$0xff] %vm680_vm0, %v4680_v23 }
 0xa8c   : > { %4711 = vst.msk [vmem:[%s8614_s27 + $0x90] sm:$0xff] %vm680_vm0, %v4679_v29  ;;  %v6177_v28 = vpop.f32.mrb[100].mxu0 }
 0xa8d   : > { %v4682_v57 = vadd.f32 %v6177_v28, %v8607_v53  ;;  %v4595_v3 = vpop.f32.mrb[101].mxu0 }
 0xa8e   : > { %v4681_v62 = vadd.f32 %v8607_v53, %v4595_v3 }
 0xa8f   : > { %4714 = vst.msk [vmem:[%s8614_s27 + $0xa8] sm:$0xff] %vm680_vm0, %v4682_v57 }
 0xa90   : > { %4713 = vst.msk [vmem:[%s8614_s27 + $0xa0] sm:$0xff] %vm680_vm0, %v4681_v62  ;;  %v6180_v17 = vpop.f32.mrb[102].mxu0 }
 0xa91   : > { %v4684_v41 = vadd.f32 %v6180_v17, %v8607_v53  ;;  %v4605_v7 = vpop.f32.mrb[103].mxu0 }
 0xa92   : > { %v4683_v22 = vadd.f32 %v8607_v53, %v4605_v7 }
 0xa93   : > { %4716 = vst.msk [vmem:[%s8614_s27 + $0xb8] sm:$0xff] %vm680_vm0, %v4684_v41 }
 0xa94   : > { %4715 = vst.msk [vmem:[%s8614_s27 + $0xb0] sm:$0xff] %vm680_vm0, %v4683_v22  ;;  %v6183_v52 = vpop.f32.mrb[104].mxu0 }
 0xa95   : > { %v4686_v12 = vadd.f32 %v6183_v52, %v8607_v53  ;;  %v4615_v33 = vpop.f32.mrb[105].mxu0 }
 0xa96   : > { %v4685_v55 = vadd.f32 %v8607_v53, %v4615_v33 }
 0xa97   : > { %4718 = vst.msk [vmem:[%s8614_s27 + $0xc8] sm:$0xff] %vm680_vm0, %v4686_v12 }
 0xa98   : > { %4717 = vst.msk [vmem:[%s8614_s27 + $0xc0] sm:$0xff] %vm680_vm0, %v4685_v55  ;;  %v6186_v61 = vpop.f32.mrb[106].mxu0 }
 0xa99   : > { %v4688_v58 = vadd.f32 %v6186_v61, %v8607_v53  ;;  %v4625_v48 = vpop.f32.mrb[107].mxu0 }
 0xa9a   : > { %v4687_v40 = vadd.f32 %v8607_v53, %v4625_v48 }
 0xa9b   : > { %4720 = vst.msk [vmem:[%s8614_s27 + $0xd8] sm:$0xff] %vm680_vm0, %v4688_v58 }
 0xa9c   : > { %4719 = vst.msk [vmem:[%s8614_s27 + $0xd0] sm:$0xff] %vm680_vm0, %v4687_v40  ;;  %v6189_v49 = vpop.f32.mrb[108].mxu0 }
 0xa9d   : > { %v4690_v19 = vadd.f32 %v6189_v49, %v8607_v53  ;;  %v4635_v51 = vpop.f32.mrb[109].mxu0 }
 0xa9e   : > { %v4689_v59 = vadd.f32 %v8607_v53, %v4635_v51 }
 0xa9f   : > { %4722 = vst.msk [vmem:[%s8614_s27 + $0xe8] sm:$0xff] %vm680_vm0, %v4690_v19 }
 0xaa0   : > { %4721 = vst.msk [vmem:[%s8614_s27 + $0xe0] sm:$0xff] %vm680_vm0, %v4689_v59  ;;  %v6192_v18 = vpop.f32.mrb[110].mxu0 }
 0xaa1   : > { %v4692_v15 = vadd.f32 %v6192_v18, %v8607_v53  ;;  %v4645_v32 = vpop.f32.mrb[111].mxu0 }
 0xaa2   : > { %v4691_v46 = vadd.f32 %v8607_v53, %v4645_v32 }
 0xaa3   : > { %4724 = vst.msk [vmem:[%s8614_s27 + $0xf8] sm:$0xff] %vm680_vm0, %v4692_v15 }
 0xaa4   : > { %4723 = vst.msk [vmem:[%s8614_s27 + $0xf0] sm:$0xff] %vm680_vm0, %v4691_v46 }
 0xaa5 PF: > { %s24_s29 = sadd.s32 1, %s6767_s29  }
 0xaa6   : > { %p21_p4 = scmp.ge.s32.totalorder %s24_s29, 4  }
 0xaa8   :  { %23 = sbr.rel (!%p21_p4) target bundleno = 1 (0x1), region = 116 }

</bundles_post_ra>
